<compile_context>
chip_gen: v6e
topology: v6e:2x2x1
jax: 0.10.0
libtpu: 0.0.40
codegen_flags: <defaults>
</compile_context>

<pallas_src>
import functools

import jax
import jax.numpy as jnp
from jax.experimental import pallas as pl
from jax.experimental.pallas import tpu as pltpu

_T = 750            # time samples -- Linear(in_features=736) => 32*(T//4//8)=736 => T=750
_H = 2              # electrode rows
_K1, _P1 = 51, 25   # firstconv kernel / pad (along time)
_K3, _P3 = 15, 7    # separableConv kernel / pad (along time)
_W1 = (_T - 4) // 4 + 1        # 187 after AvgPool2d((1,4), stride 4)
_W2 = (_W1 - 8) // 8 + 1       # 23  after AvgPool2d((1,8), stride 8)
_FLAT = 32 * _W2               # 736
_KC = 2 * _K1                  # 102: im2col rows (51 taps x 2 electrodes)
_PC1 = -(-_W1 // 32)           # 6 pooling chunks (pool-by-4, 128 input lanes each)


def _elu(v):   return jnp.where(v > 0.0, v, jnp.exp(jnp.minimum(v, 0.0)) - 1.0)
def _relu(v):  return jnp.maximum(v, 0.0)
def _leaky(v): return jnp.where(v > 0.0, v, 0.01 * v)

_ACTS = {"ELU": _elu, "ReLU": _relu, "LeakyReLU": _leaky}


# ------------------------------- Pallas kernel -------------------------------

def _eegnet_kernel(x_ref, wc_ref, bf_ref, w3f_ref, b3f_ref, w4r_ref, b4_ref,
                   p4_ref, p8_ref, out_ref,
                   xpad_ref, ic1_ref, h2pad_ref, ic2_ref, *, act):
    f32, bf16 = jnp.float32, jnp.bfloat16
    bsz = x_ref.shape[0]                                      # samples per grid step

    # Constant zero pad columns.  Re-written once per grid step (a few tiny
    # masked stores) so the kernel stays correct when the "parallel" batch
    # grid is sharded across TensorCores (scratch VMEM starts uninitialized).
    xpad_ref[:, 0:_P1] = jnp.zeros((_H, _P1), bf16)
    xpad_ref[:, _P1 + _T:] = jnp.zeros((_H, _P1), bf16)
    h2pad_ref[:, 0:_P3] = jnp.zeros((32, _P3), bf16)
    h2pad_ref[:, _P3 + _W1:] = jnp.zeros((32, _P3), bf16)

    @pl.loop(0, bsz)
    def _(b):
        # -- firstconv + BN1 + depthwiseCov + BN2, fused into one bf16 matmul --
        xpad_ref[:, _P1:_P1 + _T] = x_ref[b].astype(bf16)     # (2, 750) interior
        for k in range(_K1):                                  # im2col: tap k -> rows 2k, 2k+1
            ic1_ref[2 * k:2 * k + 2, :] = xpad_ref[:, k:k + _T]
        h2 = jnp.dot(wc_ref[...], ic1_ref[...],
                     preferred_element_type=f32) + bf_ref[...]
        h2 = act(h2)                                          # (32, 750) f32
        # Dropout(0.25): identity in eval mode.

        # -- AvgPool2d((1,4)): chunked matmuls against a small (128,32) matrix --
        for c in range(_PC1):
            lo = 128 * c
            hi = min(lo + 128, _T)
            n_out = min(32, _W1 - 32 * c)                     # 32,...,32,27
            blk = jnp.dot(h2[:, lo:hi], p4_ref[0:hi - lo, :],
                          preferred_element_type=f32)         # (32, 32)
            h2pad_ref[:, _P3 + 32 * c:_P3 + 32 * c + n_out] = \
                blk[:, 0:n_out].astype(bf16)

        # -- separableConv + BN3, fused into one (32,480)@(480,187) bf16 matmul --
        for k in range(_K3):                                  # im2col: tap k -> rows 32k..32k+31
            ic2_ref[32 * k:32 * k + 32, :] = h2pad_ref[:, k:k + _W1]
        h3 = jnp.dot(w3f_ref[...], ic2_ref[...],
                     preferred_element_type=f32) + b3f_ref[...]
        h3 = act(h3)                                          # (32, 187) f32
        # Dropout(0.25): identity in eval mode.

        # -- AvgPool2d((1,8)) as one dense matmul, then Linear(736 -> 2) -------
        h3p = jnp.dot(h3, p8_ref[...], preferred_element_type=f32)   # (32, 23)
        prod = w4r_ref[...] * h3p[None, :, :]                        # (2, 32, 23)
        logits = jnp.sum(jnp.sum(prod, axis=-1), axis=-1).reshape(1, 2) + b4_ref[...]
        out_ref[pl.ds(b, 1), :] = logits


def eegnet_forward(x, packed, activate="ELU", block_b=8):
    """x: (N, H, T) float32; packed: tuple from pack_params(). Returns (N, 2)."""
    N = x.shape[0]
    act = _ACTS[activate]
    assert block_b % 8 == 0, "block_b must be a multiple of 8 (sublane tiling)"
    n_pad = -(-N // block_b) * block_b
    if n_pad != N:                                            # pad batch to a B multiple
        x = jnp.concatenate([x, jnp.zeros((n_pad - N, _H, _T), x.dtype)], axis=0)

    def wspec(a):
        nd = a.ndim
        return pl.BlockSpec(a.shape, lambda n, _nd=nd: (0,) * _nd)

    in_specs = [pl.BlockSpec((block_b, _H, _T), lambda n: (n, 0, 0))] + \
               [wspec(a) for a in packed]
    out_specs = pl.BlockSpec((block_b, 2), lambda n: (n, 0))

    flops_per_sample = 2 * (32 * _KC * _T + 32 * _T * 32
                            + 32 * (32 * _K3) * _W1 + 32 * _W1 * _W2 + 2 * _FLAT)
    cost = pl.CostEstimate(
        flops=int(n_pad * flops_per_sample),
        transcendentals=int(n_pad * 32 * (_T + _W1)),         # ELU exp
        bytes_accessed=int(x.size * x.dtype.itemsize + n_pad * 2 * 4 +
                           sum(int(a.size) * a.dtype.itemsize for a in packed)))

    out = pl.pallas_call(
        functools.partial(_eegnet_kernel, act=act),
        out_shape=jax.ShapeDtypeStruct((n_pad, 2), jnp.float32),
        grid=(n_pad // block_b,),                             # batched, parallel grid axis
        in_specs=in_specs,
        out_specs=out_specs,
        scratch_shapes=[
            pltpu.VMEM((_H, _T + 2 * _P1), jnp.bfloat16),     # xpad   (2, 800)
            pltpu.VMEM((_KC, _T), jnp.bfloat16),              # ic1    (102, 750)
            pltpu.VMEM((32, _W1 + 2 * _P3), jnp.bfloat16),    # h2pad  (32, 201)
            pltpu.VMEM((32 * _K3, _W1), jnp.bfloat16),        # ic2    (480, 187)
        ],
        compiler_params=pltpu.CompilerParams(
            dimension_semantics=("parallel",)),
        cost_estimate=cost,
    )(x, *packed)
    return out[:N]


# --------------------------- parameter setup (glue) ---------------------------

def _init_bn(key, c):
    k1, k2, k3, k4 = jax.random.split(key, 4)
    gamma = 1.0 + 0.1 * jax.random.normal(k1, (c,), jnp.float32)
    beta = 0.1 * jax.random.normal(k2, (c,), jnp.float32)
    mean = 0.1 * jax.random.normal(k3, (c,), jnp.float32)
    var = 0.5 + jax.random.uniform(k4, (c,), jnp.float32)
    return gamma, beta, mean, var


def init_params(key):
    ks = jax.random.split(key, 8)
    return {
        "w1": 0.1 * jax.random.normal(ks[0], (16, 1, 1, 51), jnp.float32),
        "bn1": _init_bn(ks[1], 16),
        "w2": 0.1 * jax.random.normal(ks[2], (32, 1, 2, 1), jnp.float32),
        "bn2": _init_bn(ks[3], 32),
        "w3": 0.1 * jax.random.normal(ks[4], (32, 32, 1, 15), jnp.float32),
        "bn3": _init_bn(ks[5], 32),
        "w4": 0.1 * jax.random.normal(ks[6], (2, _FLAT), jnp.float32),
        "b4": 0.1 * jax.random.normal(ks[7], (2,), jnp.float32),
    }


def pack_params(p, eps=1e-5):
    """Fold eval-mode BatchNorms + the grouped depthwise conv into the conv
    weights, arranged for the in-kernel im2col matmuls (bf16 MXU operands)."""
    def fold(bn):
        g, b, m, v = bn
        s = g / jnp.sqrt(v + eps)
        return s, b - m * s

    s1, b1 = fold(p["bn1"])
    s2, b2 = fold(p["bn2"])
    s3, b3 = fold(p["bn3"])

    w1 = p["w1"][:, 0, 0, :]                                   # (16, 51)
    w2 = p["w2"][:, 0, :, 0]                                   # (32, 2)  [out_ch, kh]
    g = jnp.arange(32) // 2                                    # group index (groups=16)

    # firstconv * BN1 * depthwise * BN2-scale -> (32, 102), columns (tap, electrode).
    base = (s2[:, None] * s1[g][:, None]) * w1[g]              # (32, 51)
    wc = jnp.stack([w2[:, 0:1] * base, w2[:, 1:2] * base],
                   axis=-1).reshape(32, _KC).astype(jnp.bfloat16)
    bias_f = (s2 * (w2[:, 0] + w2[:, 1]) * b1[g] + b2).reshape(32, 1)

    # separableConv * BN3-scale -> (32, 480) bf16, columns ordered (tap, in_ch).
    w3 = p["w3"][:, :, 0, :]                                   # (32, 32, 15)
    w3f = (s3[:, None, None] * w3).transpose(0, 2, 1).reshape(32, 32 * _K3)
    w3f = w3f.astype(jnp.bfloat16)
    b3f = b3.reshape(32, 1)

    w4r = p["w4"].reshape(2, 32, _W2)                          # channel-major flatten
    b4 = p["b4"].reshape(1, 2)

    # Small dense pooling matrices (f32), applied inside the kernel.
    p4 = 0.25 * (jnp.arange(128)[:, None] // 4 ==
                 jnp.arange(32)[None, :]).astype(jnp.float32)   # (128, 32)
    p8 = 0.125 * (jnp.arange(_W1)[:, None] // 8 ==
                  jnp.arange(_W2)[None, :]).astype(jnp.float32)  # (187, 23)
    return (wc, bias_f, w3f, b3f, w4r, b4, p4, p8)


# ------------------------- plain-JAX reference (check) ------------------------

def eegnet_reference(x, p, activate="ELU", eps=1e-5):
    """Eval-mode reference computed in f32 from the raw (unfolded) parameters."""
    act = _ACTS[activate]
    N = x.shape[0]

    def bn(z, bnp, axis=1):
        ga, be, mu, va = bnp
        s = ga / jnp.sqrt(va + eps)
        sh = [1] * z.ndim
        sh[axis] = -1
        return z * s.reshape(sh) + (be - mu * s).reshape(sh)

    # firstconv: Conv2d(1->16, (1,51), pad (0,25), bias=False) + BN(16)
    w1 = p["w1"][:, 0, 0, :]                                     # (16, 51)
    xpad = jnp.pad(x, ((0, 0), (0, 0), (_P1, _P1)))              # (N, 2, 800)
    cols = jnp.stack([xpad[:, :, k:k + _T] for k in range(_K1)], axis=-1)
    h1 = bn(jnp.einsum('nhtk,ck->ncht', cols, w1), p["bn1"])     # (N, 16, 2, T)

    # depthwiseCov: Conv2d(16->32, (2,1), groups=16) + BN(32) + act + AvgPool(1,4)
    w2 = p["w2"][:, 0, :, 0]                                     # (32, 2)
    gi = jnp.arange(32) // 2
    h2 = (w2[:, 0][None, :, None] * h1[:, gi, 0, :] +
          w2[:, 1][None, :, None] * h1[:, gi, 1, :])             # (N, 32, T)
    h2 = act(bn(h2, p["bn2"]))
    h2 = h2[:, :, :4 * _W1].reshape(N, 32, _W1, 4).mean(-1)

    # separableConv: Conv2d(32->32, (1,15), pad (0,7)) + BN(32) + act + AvgPool(1,8)
    w3 = p["w3"][:, :, 0, :]                                     # (32, 32, 15)
    hpp = jnp.pad(h2, ((0, 0), (0, 0), (_P3, _P3)))
    cols3 = jnp.stack([hpp[:, :, k:k + _W1] for k in range(_K3)], axis=-1)
    h3 = act(bn(jnp.einsum('nitk,oik->not', cols3, w3), p["bn3"]))
    h3 = h3[:, :, :8 * _W2].reshape(N, 32, _W2, 8).mean(-1)      # (N, 32, 23)

    flat = h3.reshape(N, 32 * _W2)                               # channel-major flatten
    return flat @ p["w4"].T + p["b4"][None, :]


if __name__ == "__main__":
    key = jax.random.PRNGKey(0)
    kx, kp = jax.random.split(key)

    # PyTorch-style NCHW input: (N=12, C=1, H=2, W=750).  N=12 exercises the
    # batched grid (2 steps of block_b=8) and the batch-padding path.
    N = 12
    x_nchw = jax.random.normal(kx, (N, 1, _H, _T), jnp.float32)
    params = init_params(kp)
    packed = pack_params(params)

    x = x_nchw[:, 0]                                  # squeeze C=1 -> (N, H, T)
    out = jax.block_until_ready(eegnet_forward(x, packed, activate="ELU", block_b=8))

    ref = eegnet_reference(x, params, activate="ELU")
    # bf16 im2col / conv weights on the MXU path => slightly looser tolerance.
    if not bool(jnp.allclose(out, ref, rtol=5e-2, atol=5e-2)):
        err = float(jnp.max(jnp.abs(out - ref)))
        raise AssertionError(
            f"Pallas/reference mismatch (max abs err {err}):\n{out}\nvs\n{ref}")

    print("KERNEL_OK")
</pallas_src>

<mosaic_0001>
module attributes {stable_mosaic.version = 11 : i64} {
  func.func @_eegnet_kernel(%arg0: i32, %arg1: memref<8x2x750xf32, #tpu.memory_space<vmem>>, %arg2: memref<32x102xbf16, #tpu.memory_space<vmem>>, %arg3: memref<32x1xf32, #tpu.memory_space<vmem>>, %arg4: memref<32x480xbf16, #tpu.memory_space<vmem>>, %arg5: memref<32x1xf32, #tpu.memory_space<vmem>>, %arg6: memref<2x32x23xf32, #tpu.memory_space<vmem>>, %arg7: memref<1x2xf32, #tpu.memory_space<vmem>>, %arg8: memref<128x32xf32, #tpu.memory_space<vmem>>, %arg9: memref<187x23xf32, #tpu.memory_space<vmem>>, %arg10: memref<8x2xf32, #tpu.memory_space<vmem>>, %arg11: memref<2x800xbf16, #tpu.memory_space<vmem>>, %arg12: memref<102x750xbf16, #tpu.memory_space<vmem>>, %arg13: memref<32x201xbf16, #tpu.memory_space<vmem>>, %arg14: memref<480x187xbf16, #tpu.memory_space<vmem>>) attributes {dimension_semantics = [#tpu.dimension_semantics<parallel>], iteration_bounds = array<i64: 2>, scalar_prefetch = 0 : i64, scratch_operands = 4 : i64, tpu.core_type = #tpu.core_type<tc>, window_params = [{transform_indices = @transform_0, window_bounds = array<i64: 8, 2, 750>}, {pipeline_mode = #tpu.pipeline_mode<synchronous>, transform_indices = @transform_1, window_bounds = array<i64: 32, 102>}, {pipeline_mode = #tpu.pipeline_mode<synchronous>, transform_indices = @transform_2, window_bounds = array<i64: 32, 1>}, {pipeline_mode = #tpu.pipeline_mode<synchronous>, transform_indices = @transform_3, window_bounds = array<i64: 32, 480>}, {pipeline_mode = #tpu.pipeline_mode<synchronous>, transform_indices = @transform_4, window_bounds = array<i64: 32, 1>}, {pipeline_mode = #tpu.pipeline_mode<synchronous>, transform_indices = @transform_5, window_bounds = array<i64: 2, 32, 23>}, {pipeline_mode = #tpu.pipeline_mode<synchronous>, transform_indices = @transform_6, window_bounds = array<i64: 1, 2>}, {pipeline_mode = #tpu.pipeline_mode<synchronous>, transform_indices = @transform_7, window_bounds = array<i64: 128, 32>}, {pipeline_mode = #tpu.pipeline_mode<synchronous>, transform_indices = @transform_8, window_bounds = array<i64: 187, 23>}, {transform_indices = @transform_9, window_bounds = array<i64: 8, 2>}]} {
    %cst = arith.constant 0.000000e+00 : bf16
    %0 = vector.broadcast %cst : bf16 to vector<2x25xbf16>
    %c0 = arith.constant 0 : index
    %c0_0 = arith.constant 0 : index
    %1 = vector.load %arg11[%c0, %c0_0] : memref<2x800xbf16, #tpu.memory_space<vmem>>, vector<2x25xbf16>
    tpu.vector_store %arg11[%c0, %c0_0], %0 {strides = array<i32>} : memref<2x800xbf16, #tpu.memory_space<vmem>>, vector<2x25xbf16>,
    %cst_1 = arith.constant 0.000000e+00 : bf16
    %2 = vector.broadcast %cst_1 : bf16 to vector<2x25xbf16>
    %c0_2 = arith.constant 0 : index
    %c775 = arith.constant 775 : index
    %3 = vector.load %arg11[%c0_2, %c775] : memref<2x800xbf16, #tpu.memory_space<vmem>>, vector<2x25xbf16>
    tpu.vector_store %arg11[%c0_2, %c775], %2 {strides = array<i32>} : memref<2x800xbf16, #tpu.memory_space<vmem>>, vector<2x25xbf16>,
    %cst_3 = arith.constant 0.000000e+00 : bf16
    %4 = vector.broadcast %cst_3 : bf16 to vector<32x7xbf16>
    %c0_4 = arith.constant 0 : index
    %c0_5 = arith.constant 0 : index
    %5 = vector.load %arg13[%c0_4, %c0_5] : memref<32x201xbf16, #tpu.memory_space<vmem>>, vector<32x7xbf16>
    tpu.vector_store %arg13[%c0_4, %c0_5], %4 {strides = array<i32>} : memref<32x201xbf16, #tpu.memory_space<vmem>>, vector<32x7xbf16>,
    %cst_6 = arith.constant 0.000000e+00 : bf16
    %6 = vector.broadcast %cst_6 : bf16 to vector<32x7xbf16>
    %c0_7 = arith.constant 0 : index
    %c194 = arith.constant 194 : index
    %7 = vector.load %arg13[%c0_7, %c194] : memref<32x201xbf16, #tpu.memory_space<vmem>>, vector<32x7xbf16>
    tpu.vector_store %arg13[%c0_7, %c194], %6 {strides = array<i32>} : memref<32x201xbf16, #tpu.memory_space<vmem>>, vector<32x7xbf16>,
    %c0_i32 = arith.constant 0 : i32
    %c8_i32 = arith.constant 8 : i32
    %8 = arith.addi %c0_i32, %c8_i32 : i32
    %c1_i32 = arith.constant 1 : i32
    scf.for %arg15 = %c0_i32 to %8 step %c1_i32  : i32 {
      %c1_i32_9 = arith.constant 1 : i32
      %9 = arith.muli %arg15, %c1_i32_9 : i32
      %c0_i32_10 = arith.constant 0 : i32
      %10 = arith.addi %c0_i32_10, %9 : i32
      %11 = arith.index_cast %10 : i32 to index
      %c0_11 = arith.constant 0 : index
      %c0_12 = arith.constant 0 : index
      %12 = vector.load %arg1[%11, %c0_11, %c0_12] : memref<8x2x750xf32, #tpu.memory_space<vmem>>, vector<1x2x750xf32>
      %13 = vector.shape_cast %12 : vector<1x2x750xf32> to vector<2x750xf32>
      %14 = arith.truncf %13 : vector<2x750xf32> to vector<2x750xbf16>
      %c0_13 = arith.constant 0 : index
      %c25 = arith.constant 25 : index
      %15 = vector.load %arg11[%c0_13, %c25] : memref<2x800xbf16, #tpu.memory_space<vmem>>, vector<2x750xbf16>
      tpu.vector_store %arg11[%c0_13, %c25], %14 {strides = array<i32>} : memref<2x800xbf16, #tpu.memory_space<vmem>>, vector<2x750xbf16>,
      %c0_14 = arith.constant 0 : index
      %c0_15 = arith.constant 0 : index
      %16 = vector.load %arg11[%c0_14, %c0_15] : memref<2x800xbf16, #tpu.memory_space<vmem>>, vector<2x750xbf16>
      %c0_16 = arith.constant 0 : index
      %c0_17 = arith.constant 0 : index
      %17 = vector.load %arg12[%c0_16, %c0_17] : memref<102x750xbf16, #tpu.memory_space<vmem>>, vector<2x750xbf16>
      tpu.vector_store %arg12[%c0_16, %c0_17], %16 {strides = array<i32>} : memref<102x750xbf16, #tpu.memory_space<vmem>>, vector<2x750xbf16>,
      %c0_18 = arith.constant 0 : index
      %c1 = arith.constant 1 : index
      %18 = vector.load %arg11[%c0_18, %c1] : memref<2x800xbf16, #tpu.memory_space<vmem>>, vector<2x750xbf16>
      %c2 = arith.constant 2 : index
      %c0_19 = arith.constant 0 : index
      %19 = vector.load %arg12[%c2, %c0_19] : memref<102x750xbf16, #tpu.memory_space<vmem>>, vector<2x750xbf16>
      tpu.vector_store %arg12[%c2, %c0_19], %18 {strides = array<i32>} : memref<102x750xbf16, #tpu.memory_space<vmem>>, vector<2x750xbf16>,
      %c0_20 = arith.constant 0 : index
      %c2_21 = arith.constant 2 : index
      %20 = vector.load %arg11[%c0_20, %c2_21] : memref<2x800xbf16, #tpu.memory_space<vmem>>, vector<2x750xbf16>
      %c4 = arith.constant 4 : index
      %c0_22 = arith.constant 0 : index
      %21 = vector.load %arg12[%c4, %c0_22] : memref<102x750xbf16, #tpu.memory_space<vmem>>, vector<2x750xbf16>
      tpu.vector_store %arg12[%c4, %c0_22], %20 {strides = array<i32>} : memref<102x750xbf16, #tpu.memory_space<vmem>>, vector<2x750xbf16>,
      %c0_23 = arith.constant 0 : index
      %c3 = arith.constant 3 : index
      %22 = vector.load %arg11[%c0_23, %c3] : memref<2x800xbf16, #tpu.memory_space<vmem>>, vector<2x750xbf16>
      %c6 = arith.constant 6 : index
      %c0_24 = arith.constant 0 : index
      %23 = vector.load %arg12[%c6, %c0_24] : memref<102x750xbf16, #tpu.memory_space<vmem>>, vector<2x750xbf16>
      tpu.vector_store %arg12[%c6, %c0_24], %22 {strides = array<i32>} : memref<102x750xbf16, #tpu.memory_space<vmem>>, vector<2x750xbf16>,
      %c0_25 = arith.constant 0 : index
      %c4_26 = arith.constant 4 : index
      %24 = vector.load %arg11[%c0_25, %c4_26] : memref<2x800xbf16, #tpu.memory_space<vmem>>, vector<2x750xbf16>
      %c8 = arith.constant 8 : index
      %c0_27 = arith.constant 0 : index
      %25 = vector.load %arg12[%c8, %c0_27] : memref<102x750xbf16, #tpu.memory_space<vmem>>, vector<2x750xbf16>
      tpu.vector_store %arg12[%c8, %c0_27], %24 {strides = array<i32>} : memref<102x750xbf16, #tpu.memory_space<vmem>>, vector<2x750xbf16>,
      %c0_28 = arith.constant 0 : index
      %c5 = arith.constant 5 : index
      %26 = vector.load %arg11[%c0_28, %c5] : memref<2x800xbf16, #tpu.memory_space<vmem>>, vector<2x750xbf16>
      %c10 = arith.constant 10 : index
      %c0_29 = arith.constant 0 : index
      %27 = vector.load %arg12[%c10, %c0_29] : memref<102x750xbf16, #tpu.memory_space<vmem>>, vector<2x750xbf16>
      tpu.vector_store %arg12[%c10, %c0_29], %26 {strides = array<i32>} : memref<102x750xbf16, #tpu.memory_space<vmem>>, vector<2x750xbf16>,
      %c0_30 = arith.constant 0 : index
      %c6_31 = arith.constant 6 : index
      %28 = vector.load %arg11[%c0_30, %c6_31] : memref<2x800xbf16, #tpu.memory_space<vmem>>, vector<2x750xbf16>
      %c12 = arith.constant 12 : index
      %c0_32 = arith.constant 0 : index
      %29 = vector.load %arg12[%c12, %c0_32] : memref<102x750xbf16, #tpu.memory_space<vmem>>, vector<2x750xbf16>
      tpu.vector_store %arg12[%c12, %c0_32], %28 {strides = array<i32>} : memref<102x750xbf16, #tpu.memory_space<vmem>>, vector<2x750xbf16>,
      %c0_33 = arith.constant 0 : index
      %c7 = arith.constant 7 : index
      %30 = vector.load %arg11[%c0_33, %c7] : memref<2x800xbf16, #tpu.memory_space<vmem>>, vector<2x750xbf16>
      %c14 = arith.constant 14 : index
      %c0_34 = arith.constant 0 : index
      %31 = vector.load %arg12[%c14, %c0_34] : memref<102x750xbf16, #tpu.memory_space<vmem>>, vector<2x750xbf16>
      tpu.vector_store %arg12[%c14, %c0_34], %30 {strides = array<i32>} : memref<102x750xbf16, #tpu.memory_space<vmem>>, vector<2x750xbf16>,
      %c0_35 = arith.constant 0 : index
      %c8_36 = arith.constant 8 : index
      %32 = vector.load %arg11[%c0_35, %c8_36] : memref<2x800xbf16, #tpu.memory_space<vmem>>, vector<2x750xbf16>
      %c16 = arith.constant 16 : index
      %c0_37 = arith.constant 0 : index
      %33 = vector.load %arg12[%c16, %c0_37] : memref<102x750xbf16, #tpu.memory_space<vmem>>, vector<2x750xbf16>
      tpu.vector_store %arg12[%c16, %c0_37], %32 {strides = array<i32>} : memref<102x750xbf16, #tpu.memory_space<vmem>>, vector<2x750xbf16>,
      %c0_38 = arith.constant 0 : index
      %c9 = arith.constant 9 : index
      %34 = vector.load %arg11[%c0_38, %c9] : memref<2x800xbf16, #tpu.memory_space<vmem>>, vector<2x750xbf16>
      %c18 = arith.constant 18 : index
      %c0_39 = arith.constant 0 : index
      %35 = vector.load %arg12[%c18, %c0_39] : memref<102x750xbf16, #tpu.memory_space<vmem>>, vector<2x750xbf16>
      tpu.vector_store %arg12[%c18, %c0_39], %34 {strides = array<i32>} : memref<102x750xbf16, #tpu.memory_space<vmem>>, vector<2x750xbf16>,
      %c0_40 = arith.constant 0 : index
      %c10_41 = arith.constant 10 : index
      %36 = vector.load %arg11[%c0_40, %c10_41] : memref<2x800xbf16, #tpu.memory_space<vmem>>, vector<2x750xbf16>
      %c20 = arith.constant 20 : index
      %c0_42 = arith.constant 0 : index
      %37 = vector.load %arg12[%c20, %c0_42] : memref<102x750xbf16, #tpu.memory_space<vmem>>, vector<2x750xbf16>
      tpu.vector_store %arg12[%c20, %c0_42], %36 {strides = array<i32>} : memref<102x750xbf16, #tpu.memory_space<vmem>>, vector<2x750xbf16>,
      %c0_43 = arith.constant 0 : index
      %c11 = arith.constant 11 : index
      %38 = vector.load %arg11[%c0_43, %c11] : memref<2x800xbf16, #tpu.memory_space<vmem>>, vector<2x750xbf16>
      %c22 = arith.constant 22 : index
      %c0_44 = arith.constant 0 : index
      %39 = vector.load %arg12[%c22, %c0_44] : memref<102x750xbf16, #tpu.memory_space<vmem>>, vector<2x750xbf16>
      tpu.vector_store %arg12[%c22, %c0_44], %38 {strides = array<i32>} : memref<102x750xbf16, #tpu.memory_space<vmem>>, vector<2x750xbf16>,
      %c0_45 = arith.constant 0 : index
      %c12_46 = arith.constant 12 : index
      %40 = vector.load %arg11[%c0_45, %c12_46] : memref<2x800xbf16, #tpu.memory_space<vmem>>, vector<2x750xbf16>
      %c24 = arith.constant 24 : index
      %c0_47 = arith.constant 0 : index
      %41 = vector.load %arg12[%c24, %c0_47] : memref<102x750xbf16, #tpu.memory_space<vmem>>, vector<2x750xbf16>
      tpu.vector_store %arg12[%c24, %c0_47], %40 {strides = array<i32>} : memref<102x750xbf16, #tpu.memory_space<vmem>>, vector<2x750xbf16>,
      %c0_48 = arith.constant 0 : index
      %c13 = arith.constant 13 : index
      %42 = vector.load %arg11[%c0_48, %c13] : memref<2x800xbf16, #tpu.memory_space<vmem>>, vector<2x750xbf16>
      %c26 = arith.constant 26 : index
      %c0_49 = arith.constant 0 : index
      %43 = vector.load %arg12[%c26, %c0_49] : memref<102x750xbf16, #tpu.memory_space<vmem>>, vector<2x750xbf16>
      tpu.vector_store %arg12[%c26, %c0_49], %42 {strides = array<i32>} : memref<102x750xbf16, #tpu.memory_space<vmem>>, vector<2x750xbf16>,
      %c0_50 = arith.constant 0 : index
      %c14_51 = arith.constant 14 : index
      %44 = vector.load %arg11[%c0_50, %c14_51] : memref<2x800xbf16, #tpu.memory_space<vmem>>, vector<2x750xbf16>
      %c28 = arith.constant 28 : index
      %c0_52 = arith.constant 0 : index
      %45 = vector.load %arg12[%c28, %c0_52] : memref<102x750xbf16, #tpu.memory_space<vmem>>, vector<2x750xbf16>
      tpu.vector_store %arg12[%c28, %c0_52], %44 {strides = array<i32>} : memref<102x750xbf16, #tpu.memory_space<vmem>>, vector<2x750xbf16>,
      %c0_53 = arith.constant 0 : index
      %c15 = arith.constant 15 : index
      %46 = vector.load %arg11[%c0_53, %c15] : memref<2x800xbf16, #tpu.memory_space<vmem>>, vector<2x750xbf16>
      %c30 = arith.constant 30 : index
      %c0_54 = arith.constant 0 : index
      %47 = vector.load %arg12[%c30, %c0_54] : memref<102x750xbf16, #tpu.memory_space<vmem>>, vector<2x750xbf16>
      tpu.vector_store %arg12[%c30, %c0_54], %46 {strides = array<i32>} : memref<102x750xbf16, #tpu.memory_space<vmem>>, vector<2x750xbf16>,
      %c0_55 = arith.constant 0 : index
      %c16_56 = arith.constant 16 : index
      %48 = vector.load %arg11[%c0_55, %c16_56] : memref<2x800xbf16, #tpu.memory_space<vmem>>, vector<2x750xbf16>
      %c32 = arith.constant 32 : index
      %c0_57 = arith.constant 0 : index
      %49 = vector.load %arg12[%c32, %c0_57] : memref<102x750xbf16, #tpu.memory_space<vmem>>, vector<2x750xbf16>
      tpu.vector_store %arg12[%c32, %c0_57], %48 {strides = array<i32>} : memref<102x750xbf16, #tpu.memory_space<vmem>>, vector<2x750xbf16>,
      %c0_58 = arith.constant 0 : index
      %c17 = arith.constant 17 : index
      %50 = vector.load %arg11[%c0_58, %c17] : memref<2x800xbf16, #tpu.memory_space<vmem>>, vector<2x750xbf16>
      %c34 = arith.constant 34 : index
      %c0_59 = arith.constant 0 : index
      %51 = vector.load %arg12[%c34, %c0_59] : memref<102x750xbf16, #tpu.memory_space<vmem>>, vector<2x750xbf16>
      tpu.vector_store %arg12[%c34, %c0_59], %50 {strides = array<i32>} : memref<102x750xbf16, #tpu.memory_space<vmem>>, vector<2x750xbf16>,
      %c0_60 = arith.constant 0 : index
      %c18_61 = arith.constant 18 : index
      %52 = vector.load %arg11[%c0_60, %c18_61] : memref<2x800xbf16, #tpu.memory_space<vmem>>, vector<2x750xbf16>
      %c36 = arith.constant 36 : index
      %c0_62 = arith.constant 0 : index
      %53 = vector.load %arg12[%c36, %c0_62] : memref<102x750xbf16, #tpu.memory_space<vmem>>, vector<2x750xbf16>
      tpu.vector_store %arg12[%c36, %c0_62], %52 {strides = array<i32>} : memref<102x750xbf16, #tpu.memory_space<vmem>>, vector<2x750xbf16>,
      %c0_63 = arith.constant 0 : index
      %c19 = arith.constant 19 : index
      %54 = vector.load %arg11[%c0_63, %c19] : memref<2x800xbf16, #tpu.memory_space<vmem>>, vector<2x750xbf16>
      %c38 = arith.constant 38 : index
      %c0_64 = arith.constant 0 : index
      %55 = vector.load %arg12[%c38, %c0_64] : memref<102x750xbf16, #tpu.memory_space<vmem>>, vector<2x750xbf16>
      tpu.vector_store %arg12[%c38, %c0_64], %54 {strides = array<i32>} : memref<102x750xbf16, #tpu.memory_space<vmem>>, vector<2x750xbf16>,
      %c0_65 = arith.constant 0 : index
      %c20_66 = arith.constant 20 : index
      %56 = vector.load %arg11[%c0_65, %c20_66] : memref<2x800xbf16, #tpu.memory_space<vmem>>, vector<2x750xbf16>
      %c40 = arith.constant 40 : index
      %c0_67 = arith.constant 0 : index
      %57 = vector.load %arg12[%c40, %c0_67] : memref<102x750xbf16, #tpu.memory_space<vmem>>, vector<2x750xbf16>
      tpu.vector_store %arg12[%c40, %c0_67], %56 {strides = array<i32>} : memref<102x750xbf16, #tpu.memory_space<vmem>>, vector<2x750xbf16>,
      %c0_68 = arith.constant 0 : index
      %c21 = arith.constant 21 : index
      %58 = vector.load %arg11[%c0_68, %c21] : memref<2x800xbf16, #tpu.memory_space<vmem>>, vector<2x750xbf16>
      %c42 = arith.constant 42 : index
      %c0_69 = arith.constant 0 : index
      %59 = vector.load %arg12[%c42, %c0_69] : memref<102x750xbf16, #tpu.memory_space<vmem>>, vector<2x750xbf16>
      tpu.vector_store %arg12[%c42, %c0_69], %58 {strides = array<i32>} : memref<102x750xbf16, #tpu.memory_space<vmem>>, vector<2x750xbf16>,
      %c0_70 = arith.constant 0 : index
      %c22_71 = arith.constant 22 : index
      %60 = vector.load %arg11[%c0_70, %c22_71] : memref<2x800xbf16, #tpu.memory_space<vmem>>, vector<2x750xbf16>
      %c44 = arith.constant 44 : index
      %c0_72 = arith.constant 0 : index
      %61 = vector.load %arg12[%c44, %c0_72] : memref<102x750xbf16, #tpu.memory_space<vmem>>, vector<2x750xbf16>
      tpu.vector_store %arg12[%c44, %c0_72], %60 {strides = array<i32>} : memref<102x750xbf16, #tpu.memory_space<vmem>>, vector<2x750xbf16>,
      %c0_73 = arith.constant 0 : index
      %c23 = arith.constant 23 : index
      %62 = vector.load %arg11[%c0_73, %c23] : memref<2x800xbf16, #tpu.memory_space<vmem>>, vector<2x750xbf16>
      %c46 = arith.constant 46 : index
      %c0_74 = arith.constant 0 : index
      %63 = vector.load %arg12[%c46, %c0_74] : memref<102x750xbf16, #tpu.memory_space<vmem>>, vector<2x750xbf16>
      tpu.vector_store %arg12[%c46, %c0_74], %62 {strides = array<i32>} : memref<102x750xbf16, #tpu.memory_space<vmem>>, vector<2x750xbf16>,
      %c0_75 = arith.constant 0 : index
      %c24_76 = arith.constant 24 : index
      %64 = vector.load %arg11[%c0_75, %c24_76] : memref<2x800xbf16, #tpu.memory_space<vmem>>, vector<2x750xbf16>
      %c48 = arith.constant 48 : index
      %c0_77 = arith.constant 0 : index
      %65 = vector.load %arg12[%c48, %c0_77] : memref<102x750xbf16, #tpu.memory_space<vmem>>, vector<2x750xbf16>
      tpu.vector_store %arg12[%c48, %c0_77], %64 {strides = array<i32>} : memref<102x750xbf16, #tpu.memory_space<vmem>>, vector<2x750xbf16>,
      %c0_78 = arith.constant 0 : index
      %c25_79 = arith.constant 25 : index
      %66 = vector.load %arg11[%c0_78, %c25_79] : memref<2x800xbf16, #tpu.memory_space<vmem>>, vector<2x750xbf16>
      %c50 = arith.constant 50 : index
      %c0_80 = arith.constant 0 : index
      %67 = vector.load %arg12[%c50, %c0_80] : memref<102x750xbf16, #tpu.memory_space<vmem>>, vector<2x750xbf16>
      tpu.vector_store %arg12[%c50, %c0_80], %66 {strides = array<i32>} : memref<102x750xbf16, #tpu.memory_space<vmem>>, vector<2x750xbf16>,
      %c0_81 = arith.constant 0 : index
      %c26_82 = arith.constant 26 : index
      %68 = vector.load %arg11[%c0_81, %c26_82] : memref<2x800xbf16, #tpu.memory_space<vmem>>, vector<2x750xbf16>
      %c52 = arith.constant 52 : index
      %c0_83 = arith.constant 0 : index
      %69 = vector.load %arg12[%c52, %c0_83] : memref<102x750xbf16, #tpu.memory_space<vmem>>, vector<2x750xbf16>
      tpu.vector_store %arg12[%c52, %c0_83], %68 {strides = array<i32>} : memref<102x750xbf16, #tpu.memory_space<vmem>>, vector<2x750xbf16>,
      %c0_84 = arith.constant 0 : index
      %c27 = arith.constant 27 : index
      %70 = vector.load %arg11[%c0_84, %c27] : memref<2x800xbf16, #tpu.memory_space<vmem>>, vector<2x750xbf16>
      %c54 = arith.constant 54 : index
      %c0_85 = arith.constant 0 : index
      %71 = vector.load %arg12[%c54, %c0_85] : memref<102x750xbf16, #tpu.memory_space<vmem>>, vector<2x750xbf16>
      tpu.vector_store %arg12[%c54, %c0_85], %70 {strides = array<i32>} : memref<102x750xbf16, #tpu.memory_space<vmem>>, vector<2x750xbf16>,
      %c0_86 = arith.constant 0 : index
      %c28_87 = arith.constant 28 : index
      %72 = vector.load %arg11[%c0_86, %c28_87] : memref<2x800xbf16, #tpu.memory_space<vmem>>, vector<2x750xbf16>
      %c56 = arith.constant 56 : index
      %c0_88 = arith.constant 0 : index
      %73 = vector.load %arg12[%c56, %c0_88] : memref<102x750xbf16, #tpu.memory_space<vmem>>, vector<2x750xbf16>
      tpu.vector_store %arg12[%c56, %c0_88], %72 {strides = array<i32>} : memref<102x750xbf16, #tpu.memory_space<vmem>>, vector<2x750xbf16>,
      %c0_89 = arith.constant 0 : index
      %c29 = arith.constant 29 : index
      %74 = vector.load %arg11[%c0_89, %c29] : memref<2x800xbf16, #tpu.memory_space<vmem>>, vector<2x750xbf16>
      %c58 = arith.constant 58 : index
      %c0_90 = arith.constant 0 : index
      %75 = vector.load %arg12[%c58, %c0_90] : memref<102x750xbf16, #tpu.memory_space<vmem>>, vector<2x750xbf16>
      tpu.vector_store %arg12[%c58, %c0_90], %74 {strides = array<i32>} : memref<102x750xbf16, #tpu.memory_space<vmem>>, vector<2x750xbf16>,
      %c0_91 = arith.constant 0 : index
      %c30_92 = arith.constant 30 : index
      %76 = vector.load %arg11[%c0_91, %c30_92] : memref<2x800xbf16, #tpu.memory_space<vmem>>, vector<2x750xbf16>
      %c60 = arith.constant 60 : index
      %c0_93 = arith.constant 0 : index
      %77 = vector.load %arg12[%c60, %c0_93] : memref<102x750xbf16, #tpu.memory_space<vmem>>, vector<2x750xbf16>
      tpu.vector_store %arg12[%c60, %c0_93], %76 {strides = array<i32>} : memref<102x750xbf16, #tpu.memory_space<vmem>>, vector<2x750xbf16>,
      %c0_94 = arith.constant 0 : index
      %c31 = arith.constant 31 : index
      %78 = vector.load %arg11[%c0_94, %c31] : memref<2x800xbf16, #tpu.memory_space<vmem>>, vector<2x750xbf16>
      %c62 = arith.constant 62 : index
      %c0_95 = arith.constant 0 : index
      %79 = vector.load %arg12[%c62, %c0_95] : memref<102x750xbf16, #tpu.memory_space<vmem>>, vector<2x750xbf16>
      tpu.vector_store %arg12[%c62, %c0_95], %78 {strides = array<i32>} : memref<102x750xbf16, #tpu.memory_space<vmem>>, vector<2x750xbf16>,
      %c0_96 = arith.constant 0 : index
      %c32_97 = arith.constant 32 : index
      %80 = vector.load %arg11[%c0_96, %c32_97] : memref<2x800xbf16, #tpu.memory_space<vmem>>, vector<2x750xbf16>
      %c64 = arith.constant 64 : index
      %c0_98 = arith.constant 0 : index
      %81 = vector.load %arg12[%c64, %c0_98] : memref<102x750xbf16, #tpu.memory_space<vmem>>, vector<2x750xbf16>
      tpu.vector_store %arg12[%c64, %c0_98], %80 {strides = array<i32>} : memref<102x750xbf16, #tpu.memory_space<vmem>>, vector<2x750xbf16>,
      %c0_99 = arith.constant 0 : index
      %c33 = arith.constant 33 : index
      %82 = vector.load %arg11[%c0_99, %c33] : memref<2x800xbf16, #tpu.memory_space<vmem>>, vector<2x750xbf16>
      %c66 = arith.constant 66 : index
      %c0_100 = arith.constant 0 : index
      %83 = vector.load %arg12[%c66, %c0_100] : memref<102x750xbf16, #tpu.memory_space<vmem>>, vector<2x750xbf16>
      tpu.vector_store %arg12[%c66, %c0_100], %82 {strides = array<i32>} : memref<102x750xbf16, #tpu.memory_space<vmem>>, vector<2x750xbf16>,
      %c0_101 = arith.constant 0 : index
      %c34_102 = arith.constant 34 : index
      %84 = vector.load %arg11[%c0_101, %c34_102] : memref<2x800xbf16, #tpu.memory_space<vmem>>, vector<2x750xbf16>
      %c68 = arith.constant 68 : index
      %c0_103 = arith.constant 0 : index
      %85 = vector.load %arg12[%c68, %c0_103] : memref<102x750xbf16, #tpu.memory_space<vmem>>, vector<2x750xbf16>
      tpu.vector_store %arg12[%c68, %c0_103], %84 {strides = array<i32>} : memref<102x750xbf16, #tpu.memory_space<vmem>>, vector<2x750xbf16>,
      %c0_104 = arith.constant 0 : index
      %c35 = arith.constant 35 : index
      %86 = vector.load %arg11[%c0_104, %c35] : memref<2x800xbf16, #tpu.memory_space<vmem>>, vector<2x750xbf16>
      %c70 = arith.constant 70 : index
      %c0_105 = arith.constant 0 : index
      %87 = vector.load %arg12[%c70, %c0_105] : memref<102x750xbf16, #tpu.memory_space<vmem>>, vector<2x750xbf16>
      tpu.vector_store %arg12[%c70, %c0_105], %86 {strides = array<i32>} : memref<102x750xbf16, #tpu.memory_space<vmem>>, vector<2x750xbf16>,
      %c0_106 = arith.constant 0 : index
      %c36_107 = arith.constant 36 : index
      %88 = vector.load %arg11[%c0_106, %c36_107] : memref<2x800xbf16, #tpu.memory_space<vmem>>, vector<2x750xbf16>
      %c72 = arith.constant 72 : index
      %c0_108 = arith.constant 0 : index
      %89 = vector.load %arg12[%c72, %c0_108] : memref<102x750xbf16, #tpu.memory_space<vmem>>, vector<2x750xbf16>
      tpu.vector_store %arg12[%c72, %c0_108], %88 {strides = array<i32>} : memref<102x750xbf16, #tpu.memory_space<vmem>>, vector<2x750xbf16>,
      %c0_109 = arith.constant 0 : index
      %c37 = arith.constant 37 : index
      %90 = vector.load %arg11[%c0_109, %c37] : memref<2x800xbf16, #tpu.memory_space<vmem>>, vector<2x750xbf16>
      %c74 = arith.constant 74 : index
      %c0_110 = arith.constant 0 : index
      %91 = vector.load %arg12[%c74, %c0_110] : memref<102x750xbf16, #tpu.memory_space<vmem>>, vector<2x750xbf16>
      tpu.vector_store %arg12[%c74, %c0_110], %90 {strides = array<i32>} : memref<102x750xbf16, #tpu.memory_space<vmem>>, vector<2x750xbf16>,
      %c0_111 = arith.constant 0 : index
      %c38_112 = arith.constant 38 : index
      %92 = vector.load %arg11[%c0_111, %c38_112] : memref<2x800xbf16, #tpu.memory_space<vmem>>, vector<2x750xbf16>
      %c76 = arith.constant 76 : index
      %c0_113 = arith.constant 0 : index
      %93 = vector.load %arg12[%c76, %c0_113] : memref<102x750xbf16, #tpu.memory_space<vmem>>, vector<2x750xbf16>
      tpu.vector_store %arg12[%c76, %c0_113], %92 {strides = array<i32>} : memref<102x750xbf16, #tpu.memory_space<vmem>>, vector<2x750xbf16>,
      %c0_114 = arith.constant 0 : index
      %c39 = arith.constant 39 : index
      %94 = vector.load %arg11[%c0_114, %c39] : memref<2x800xbf16, #tpu.memory_space<vmem>>, vector<2x750xbf16>
      %c78 = arith.constant 78 : index
      %c0_115 = arith.constant 0 : index
      %95 = vector.load %arg12[%c78, %c0_115] : memref<102x750xbf16, #tpu.memory_space<vmem>>, vector<2x750xbf16>
      tpu.vector_store %arg12[%c78, %c0_115], %94 {strides = array<i32>} : memref<102x750xbf16, #tpu.memory_space<vmem>>, vector<2x750xbf16>,
      %c0_116 = arith.constant 0 : index
      %c40_117 = arith.constant 40 : index
      %96 = vector.load %arg11[%c0_116, %c40_117] : memref<2x800xbf16, #tpu.memory_space<vmem>>, vector<2x750xbf16>
      %c80 = arith.constant 80 : index
      %c0_118 = arith.constant 0 : index
      %97 = vector.load %arg12[%c80, %c0_118] : memref<102x750xbf16, #tpu.memory_space<vmem>>, vector<2x750xbf16>
      tpu.vector_store %arg12[%c80, %c0_118], %96 {strides = array<i32>} : memref<102x750xbf16, #tpu.memory_space<vmem>>, vector<2x750xbf16>,
      %c0_119 = arith.constant 0 : index
      %c41 = arith.constant 41 : index
      %98 = vector.load %arg11[%c0_119, %c41] : memref<2x800xbf16, #tpu.memory_space<vmem>>, vector<2x750xbf16>
      %c82 = arith.constant 82 : index
      %c0_120 = arith.constant 0 : index
      %99 = vector.load %arg12[%c82, %c0_120] : memref<102x750xbf16, #tpu.memory_space<vmem>>, vector<2x750xbf16>
      tpu.vector_store %arg12[%c82, %c0_120], %98 {strides = array<i32>} : memref<102x750xbf16, #tpu.memory_space<vmem>>, vector<2x750xbf16>,
      %c0_121 = arith.constant 0 : index
      %c42_122 = arith.constant 42 : index
      %100 = vector.load %arg11[%c0_121, %c42_122] : memref<2x800xbf16, #tpu.memory_space<vmem>>, vector<2x750xbf16>
      %c84 = arith.constant 84 : index
      %c0_123 = arith.constant 0 : index
      %101 = vector.load %arg12[%c84, %c0_123] : memref<102x750xbf16, #tpu.memory_space<vmem>>, vector<2x750xbf16>
      tpu.vector_store %arg12[%c84, %c0_123], %100 {strides = array<i32>} : memref<102x750xbf16, #tpu.memory_space<vmem>>, vector<2x750xbf16>,
      %c0_124 = arith.constant 0 : index
      %c43 = arith.constant 43 : index
      %102 = vector.load %arg11[%c0_124, %c43] : memref<2x800xbf16, #tpu.memory_space<vmem>>, vector<2x750xbf16>
      %c86 = arith.constant 86 : index
      %c0_125 = arith.constant 0 : index
      %103 = vector.load %arg12[%c86, %c0_125] : memref<102x750xbf16, #tpu.memory_space<vmem>>, vector<2x750xbf16>
      tpu.vector_store %arg12[%c86, %c0_125], %102 {strides = array<i32>} : memref<102x750xbf16, #tpu.memory_space<vmem>>, vector<2x750xbf16>,
      %c0_126 = arith.constant 0 : index
      %c44_127 = arith.constant 44 : index
      %104 = vector.load %arg11[%c0_126, %c44_127] : memref<2x800xbf16, #tpu.memory_space<vmem>>, vector<2x750xbf16>
      %c88 = arith.constant 88 : index
      %c0_128 = arith.constant 0 : index
      %105 = vector.load %arg12[%c88, %c0_128] : memref<102x750xbf16, #tpu.memory_space<vmem>>, vector<2x750xbf16>
      tpu.vector_store %arg12[%c88, %c0_128], %104 {strides = array<i32>} : memref<102x750xbf16, #tpu.memory_space<vmem>>, vector<2x750xbf16>,
      %c0_129 = arith.constant 0 : index
      %c45 = arith.constant 45 : index
      %106 = vector.load %arg11[%c0_129, %c45] : memref<2x800xbf16, #tpu.memory_space<vmem>>, vector<2x750xbf16>
      %c90 = arith.constant 90 : index
      %c0_130 = arith.constant 0 : index
      %107 = vector.load %arg12[%c90, %c0_130] : memref<102x750xbf16, #tpu.memory_space<vmem>>, vector<2x750xbf16>
      tpu.vector_store %arg12[%c90, %c0_130], %106 {strides = array<i32>} : memref<102x750xbf16, #tpu.memory_space<vmem>>, vector<2x750xbf16>,
      %c0_131 = arith.constant 0 : index
      %c46_132 = arith.constant 46 : index
      %108 = vector.load %arg11[%c0_131, %c46_132] : memref<2x800xbf16, #tpu.memory_space<vmem>>, vector<2x750xbf16>
      %c92 = arith.constant 92 : index
      %c0_133 = arith.constant 0 : index
      %109 = vector.load %arg12[%c92, %c0_133] : memref<102x750xbf16, #tpu.memory_space<vmem>>, vector<2x750xbf16>
      tpu.vector_store %arg12[%c92, %c0_133], %108 {strides = array<i32>} : memref<102x750xbf16, #tpu.memory_space<vmem>>, vector<2x750xbf16>,
      %c0_134 = arith.constant 0 : index
      %c47 = arith.constant 47 : index
      %110 = vector.load %arg11[%c0_134, %c47] : memref<2x800xbf16, #tpu.memory_space<vmem>>, vector<2x750xbf16>
      %c94 = arith.constant 94 : index
      %c0_135 = arith.constant 0 : index
      %111 = vector.load %arg12[%c94, %c0_135] : memref<102x750xbf16, #tpu.memory_space<vmem>>, vector<2x750xbf16>
      tpu.vector_store %arg12[%c94, %c0_135], %110 {strides = array<i32>} : memref<102x750xbf16, #tpu.memory_space<vmem>>, vector<2x750xbf16>,
      %c0_136 = arith.constant 0 : index
      %c48_137 = arith.constant 48 : index
      %112 = vector.load %arg11[%c0_136, %c48_137] : memref<2x800xbf16, #tpu.memory_space<vmem>>, vector<2x750xbf16>
      %c96 = arith.constant 96 : index
      %c0_138 = arith.constant 0 : index
      %113 = vector.load %arg12[%c96, %c0_138] : memref<102x750xbf16, #tpu.memory_space<vmem>>, vector<2x750xbf16>
      tpu.vector_store %arg12[%c96, %c0_138], %112 {strides = array<i32>} : memref<102x750xbf16, #tpu.memory_space<vmem>>, vector<2x750xbf16>,
      %c0_139 = arith.constant 0 : index
      %c49 = arith.constant 49 : index
      %114 = vector.load %arg11[%c0_139, %c49] : memref<2x800xbf16, #tpu.memory_space<vmem>>, vector<2x750xbf16>
      %c98 = arith.constant 98 : index
      %c0_140 = arith.constant 0 : index
      %115 = vector.load %arg12[%c98, %c0_140] : memref<102x750xbf16, #tpu.memory_space<vmem>>, vector<2x750xbf16>
      tpu.vector_store %arg12[%c98, %c0_140], %114 {strides = array<i32>} : memref<102x750xbf16, #tpu.memory_space<vmem>>, vector<2x750xbf16>,
      %c0_141 = arith.constant 0 : index
      %c50_142 = arith.constant 50 : index
      %116 = vector.load %arg11[%c0_141, %c50_142] : memref<2x800xbf16, #tpu.memory_space<vmem>>, vector<2x750xbf16>
      %c100 = arith.constant 100 : index
      %c0_143 = arith.constant 0 : index
      %117 = vector.load %arg12[%c100, %c0_143] : memref<102x750xbf16, #tpu.memory_space<vmem>>, vector<2x750xbf16>
      tpu.vector_store %arg12[%c100, %c0_143], %116 {strides = array<i32>} : memref<102x750xbf16, #tpu.memory_space<vmem>>, vector<2x750xbf16>,
      %c0_144 = arith.constant 0 : index
      %c0_145 = arith.constant 0 : index
      %118 = vector.load %arg2[%c0_144, %c0_145] : memref<32x102xbf16, #tpu.memory_space<vmem>>, vector<32x102xbf16>
      %c0_146 = arith.constant 0 : index
      %c0_147 = arith.constant 0 : index
      %119 = vector.load %arg12[%c0_146, %c0_147] : memref<102x750xbf16, #tpu.memory_space<vmem>>, vector<102x750xbf16>
      %cst_148 = arith.constant dense<0.000000e+00> : vector<32x750xf32>
      %120 = tpu.matmul %118, %119, %cst_148 {dimension_numbers = #tpu.dot_dimension_numbers<[1], [0], [0], [1], [0, 0, 1, 1], [], []>} : vector<32x102xbf16>, vector<102x750xbf16>, vector<32x750xf32> -> vector<32x750xf32>
      %c0_149 = arith.constant 0 : index
      %c0_150 = arith.constant 0 : index
      %121 = vector.load %arg3[%c0_149, %c0_150] : memref<32x1xf32, #tpu.memory_space<vmem>>, vector<32x1xf32>
      %122 = vector.broadcast %121 : vector<32x1xf32> to vector<32x750xf32>
      %123 = arith.addf %120, %122 : vector<32x750xf32>
      %cst_151 = arith.constant 0.000000e+00 : f32
      %124 = vector.broadcast %cst_151 : f32 to vector<32x750xf32>
      %125 = arith.cmpf ogt, %123, %124 : vector<32x750xf32>
      %cst_152 = arith.constant 0.000000e+00 : f32
      %126 = vector.broadcast %cst_152 : f32 to vector<32x750xf32>
      %127 = arith.minimumf %123, %126 : vector<32x750xf32>
      %128 = math.exp %127 : vector<32x750xf32>
      %cst_153 = arith.constant 1.000000e+00 : f32
      %129 = vector.broadcast %cst_153 : f32 to vector<32x750xf32>
      %130 = arith.subf %128, %129 : vector<32x750xf32>
      %131 = arith.select %125, %123, %130 : vector<32x750xi1>, vector<32x750xf32>
      %132 = vector.extract_strided_slice %131 {offsets = [0, 0], sizes = [32, 128], strides = [1, 1]} : vector<32x750xf32> to vector<32x128xf32>
      %c0_154 = arith.constant 0 : index
      %c0_155 = arith.constant 0 : index
      %133 = vector.load %arg8[%c0_154, %c0_155] : memref<128x32xf32, #tpu.memory_space<vmem>>, vector<128x32xf32>
      %cst_156 = arith.constant dense<0.000000e+00> : vector<32x32xf32>
      %134 = tpu.matmul %132, %133, %cst_156 {dimension_numbers = #tpu.dot_dimension_numbers<[1], [0], [0], [1], [0, 0, 1, 1], [], []>} : vector<32x128xf32>, vector<128x32xf32>, vector<32x32xf32> -> vector<32x32xf32>
      %135 = arith.truncf %134 : vector<32x32xf32> to vector<32x32xbf16>
      %c0_157 = arith.constant 0 : index
      %c7_158 = arith.constant 7 : index
      %136 = vector.load %arg13[%c0_157, %c7_158] : memref<32x201xbf16, #tpu.memory_space<vmem>>, vector<32x32xbf16>
      tpu.vector_store %arg13[%c0_157, %c7_158], %135 {strides = array<i32>} : memref<32x201xbf16, #tpu.memory_space<vmem>>, vector<32x32xbf16>,
      %137 = vector.extract_strided_slice %131 {offsets = [0, 128], sizes = [32, 128], strides = [1, 1]} : vector<32x750xf32> to vector<32x128xf32>
      %c0_159 = arith.constant 0 : index
      %c0_160 = arith.constant 0 : index
      %138 = vector.load %arg8[%c0_159, %c0_160] : memref<128x32xf32, #tpu.memory_space<vmem>>, vector<128x32xf32>
      %cst_161 = arith.constant dense<0.000000e+00> : vector<32x32xf32>
      %139 = tpu.matmul %137, %138, %cst_161 {dimension_numbers = #tpu.dot_dimension_numbers<[1], [0], [0], [1], [0, 0, 1, 1], [], []>} : vector<32x128xf32>, vector<128x32xf32>, vector<32x32xf32> -> vector<32x32xf32>
      %140 = arith.truncf %139 : vector<32x32xf32> to vector<32x32xbf16>
      %c0_162 = arith.constant 0 : index
      %c39_163 = arith.constant 39 : index
      %141 = vector.load %arg13[%c0_162, %c39_163] : memref<32x201xbf16, #tpu.memory_space<vmem>>, vector<32x32xbf16>
      tpu.vector_store %arg13[%c0_162, %c39_163], %140 {strides = array<i32>} : memref<32x201xbf16, #tpu.memory_space<vmem>>, vector<32x32xbf16>,
      %142 = vector.extract_strided_slice %131 {offsets = [0, 256], sizes = [32, 128], strides = [1, 1]} : vector<32x750xf32> to vector<32x128xf32>
      %c0_164 = arith.constant 0 : index
      %c0_165 = arith.constant 0 : index
      %143 = vector.load %arg8[%c0_164, %c0_165] : memref<128x32xf32, #tpu.memory_space<vmem>>, vector<128x32xf32>
      %cst_166 = arith.constant dense<0.000000e+00> : vector<32x32xf32>
      %144 = tpu.matmul %142, %143, %cst_166 {dimension_numbers = #tpu.dot_dimension_numbers<[1], [0], [0], [1], [0, 0, 1, 1], [], []>} : vector<32x128xf32>, vector<128x32xf32>, vector<32x32xf32> -> vector<32x32xf32>
      %145 = arith.truncf %144 : vector<32x32xf32> to vector<32x32xbf16>
      %c0_167 = arith.constant 0 : index
      %c71 = arith.constant 71 : index
      %146 = vector.load %arg13[%c0_167, %c71] : memref<32x201xbf16, #tpu.memory_space<vmem>>, vector<32x32xbf16>
      tpu.vector_store %arg13[%c0_167, %c71], %145 {strides = array<i32>} : memref<32x201xbf16, #tpu.memory_space<vmem>>, vector<32x32xbf16>,
      %147 = vector.extract_strided_slice %131 {offsets = [0, 384], sizes = [32, 128], strides = [1, 1]} : vector<32x750xf32> to vector<32x128xf32>
      %c0_168 = arith.constant 0 : index
      %c0_169 = arith.constant 0 : index
      %148 = vector.load %arg8[%c0_168, %c0_169] : memref<128x32xf32, #tpu.memory_space<vmem>>, vector<128x32xf32>
      %cst_170 = arith.constant dense<0.000000e+00> : vector<32x32xf32>
      %149 = tpu.matmul %147, %148, %cst_170 {dimension_numbers = #tpu.dot_dimension_numbers<[1], [0], [0], [1], [0, 0, 1, 1], [], []>} : vector<32x128xf32>, vector<128x32xf32>, vector<32x32xf32> -> vector<32x32xf32>
      %150 = arith.truncf %149 : vector<32x32xf32> to vector<32x32xbf16>
      %c0_171 = arith.constant 0 : index
      %c103 = arith.constant 103 : index
      %151 = vector.load %arg13[%c0_171, %c103] : memref<32x201xbf16, #tpu.memory_space<vmem>>, vector<32x32xbf16>
      tpu.vector_store %arg13[%c0_171, %c103], %150 {strides = array<i32>} : memref<32x201xbf16, #tpu.memory_space<vmem>>, vector<32x32xbf16>,
      %152 = vector.extract_strided_slice %131 {offsets = [0, 512], sizes = [32, 128], strides = [1, 1]} : vector<32x750xf32> to vector<32x128xf32>
      %c0_172 = arith.constant 0 : index
      %c0_173 = arith.constant 0 : index
      %153 = vector.load %arg8[%c0_172, %c0_173] : memref<128x32xf32, #tpu.memory_space<vmem>>, vector<128x32xf32>
      %cst_174 = arith.constant dense<0.000000e+00> : vector<32x32xf32>
      %154 = tpu.matmul %152, %153, %cst_174 {dimension_numbers = #tpu.dot_dimension_numbers<[1], [0], [0], [1], [0, 0, 1, 1], [], []>} : vector<32x128xf32>, vector<128x32xf32>, vector<32x32xf32> -> vector<32x32xf32>
      %155 = arith.truncf %154 : vector<32x32xf32> to vector<32x32xbf16>
      %c0_175 = arith.constant 0 : index
      %c135 = arith.constant 135 : index
      %156 = vector.load %arg13[%c0_175, %c135] : memref<32x201xbf16, #tpu.memory_space<vmem>>, vector<32x32xbf16>
      tpu.vector_store %arg13[%c0_175, %c135], %155 {strides = array<i32>} : memref<32x201xbf16, #tpu.memory_space<vmem>>, vector<32x32xbf16>,
      %157 = vector.extract_strided_slice %131 {offsets = [0, 640], sizes = [32, 110], strides = [1, 1]} : vector<32x750xf32> to vector<32x110xf32>
      %c0_176 = arith.constant 0 : index
      %c0_177 = arith.constant 0 : index
      %158 = vector.load %arg8[%c0_176, %c0_177] : memref<128x32xf32, #tpu.memory_space<vmem>>, vector<110x32xf32>
      %cst_178 = arith.constant dense<0.000000e+00> : vector<32x32xf32>
      %159 = tpu.matmul %157, %158, %cst_178 {dimension_numbers = #tpu.dot_dimension_numbers<[1], [0], [0], [1], [0, 0, 1, 1], [], []>} : vector<32x110xf32>, vector<110x32xf32>, vector<32x32xf32> -> vector<32x32xf32>
      %160 = vector.extract_strided_slice %159 {offsets = [0, 0], sizes = [32, 27], strides = [1, 1]} : vector<32x32xf32> to vector<32x27xf32>
      %161 = arith.truncf %160 : vector<32x27xf32> to vector<32x27xbf16>
      %c0_179 = arith.constant 0 : index
      %c167 = arith.constant 167 : index
      %162 = vector.load %arg13[%c0_179, %c167] : memref<32x201xbf16, #tpu.memory_space<vmem>>, vector<32x27xbf16>
      tpu.vector_store %arg13[%c0_179, %c167], %161 {strides = array<i32>} : memref<32x201xbf16, #tpu.memory_space<vmem>>, vector<32x27xbf16>,
      %c0_180 = arith.constant 0 : index
      %c0_181 = arith.constant 0 : index
      %163 = vector.load %arg13[%c0_180, %c0_181] : memref<32x201xbf16, #tpu.memory_space<vmem>>, vector<32x187xbf16>
      %c0_182 = arith.constant 0 : index
      %c0_183 = arith.constant 0 : index
      %164 = vector.load %arg14[%c0_182, %c0_183] : memref<480x187xbf16, #tpu.memory_space<vmem>>, vector<32x187xbf16>
      tpu.vector_store %arg14[%c0_182, %c0_183], %163 {strides = array<i32>} : memref<480x187xbf16, #tpu.memory_space<vmem>>, vector<32x187xbf16>,
      %c0_184 = arith.constant 0 : index
      %c1_185 = arith.constant 1 : index
      %165 = vector.load %arg13[%c0_184, %c1_185] : memref<32x201xbf16, #tpu.memory_space<vmem>>, vector<32x187xbf16>
      %c32_186 = arith.constant 32 : index
      %c0_187 = arith.constant 0 : index
      %166 = vector.load %arg14[%c32_186, %c0_187] : memref<480x187xbf16, #tpu.memory_space<vmem>>, vector<32x187xbf16>
      tpu.vector_store %arg14[%c32_186, %c0_187], %165 {strides = array<i32>} : memref<480x187xbf16, #tpu.memory_space<vmem>>, vector<32x187xbf16>,
      %c0_188 = arith.constant 0 : index
      %c2_189 = arith.constant 2 : index
      %167 = vector.load %arg13[%c0_188, %c2_189] : memref<32x201xbf16, #tpu.memory_space<vmem>>, vector<32x187xbf16>
      %c64_190 = arith.constant 64 : index
      %c0_191 = arith.constant 0 : index
      %168 = vector.load %arg14[%c64_190, %c0_191] : memref<480x187xbf16, #tpu.memory_space<vmem>>, vector<32x187xbf16>
      tpu.vector_store %arg14[%c64_190, %c0_191], %167 {strides = array<i32>} : memref<480x187xbf16, #tpu.memory_space<vmem>>, vector<32x187xbf16>,
      %c0_192 = arith.constant 0 : index
      %c3_193 = arith.constant 3 : index
      %169 = vector.load %arg13[%c0_192, %c3_193] : memref<32x201xbf16, #tpu.memory_space<vmem>>, vector<32x187xbf16>
      %c96_194 = arith.constant 96 : index
      %c0_195 = arith.constant 0 : index
      %170 = vector.load %arg14[%c96_194, %c0_195] : memref<480x187xbf16, #tpu.memory_space<vmem>>, vector<32x187xbf16>
      tpu.vector_store %arg14[%c96_194, %c0_195], %169 {strides = array<i32>} : memref<480x187xbf16, #tpu.memory_space<vmem>>, vector<32x187xbf16>,
      %c0_196 = arith.constant 0 : index
      %c4_197 = arith.constant 4 : index
      %171 = vector.load %arg13[%c0_196, %c4_197] : memref<32x201xbf16, #tpu.memory_space<vmem>>, vector<32x187xbf16>
      %c128 = arith.constant 128 : index
      %c0_198 = arith.constant 0 : index
      %172 = vector.load %arg14[%c128, %c0_198] : memref<480x187xbf16, #tpu.memory_space<vmem>>, vector<32x187xbf16>
      tpu.vector_store %arg14[%c128, %c0_198], %171 {strides = array<i32>} : memref<480x187xbf16, #tpu.memory_space<vmem>>, vector<32x187xbf16>,
      %c0_199 = arith.constant 0 : index
      %c5_200 = arith.constant 5 : index
      %173 = vector.load %arg13[%c0_199, %c5_200] : memref<32x201xbf16, #tpu.memory_space<vmem>>, vector<32x187xbf16>
      %c160 = arith.constant 160 : index
      %c0_201 = arith.constant 0 : index
      %174 = vector.load %arg14[%c160, %c0_201] : memref<480x187xbf16, #tpu.memory_space<vmem>>, vector<32x187xbf16>
      tpu.vector_store %arg14[%c160, %c0_201], %173 {strides = array<i32>} : memref<480x187xbf16, #tpu.memory_space<vmem>>, vector<32x187xbf16>,
      %c0_202 = arith.constant 0 : index
      %c6_203 = arith.constant 6 : index
      %175 = vector.load %arg13[%c0_202, %c6_203] : memref<32x201xbf16, #tpu.memory_space<vmem>>, vector<32x187xbf16>
      %c192 = arith.constant 192 : index
      %c0_204 = arith.constant 0 : index
      %176 = vector.load %arg14[%c192, %c0_204] : memref<480x187xbf16, #tpu.memory_space<vmem>>, vector<32x187xbf16>
      tpu.vector_store %arg14[%c192, %c0_204], %175 {strides = array<i32>} : memref<480x187xbf16, #tpu.memory_space<vmem>>, vector<32x187xbf16>,
      %c0_205 = arith.constant 0 : index
      %c7_206 = arith.constant 7 : index
      %177 = vector.load %arg13[%c0_205, %c7_206] : memref<32x201xbf16, #tpu.memory_space<vmem>>, vector<32x187xbf16>
      %c224 = arith.constant 224 : index
      %c0_207 = arith.constant 0 : index
      %178 = vector.load %arg14[%c224, %c0_207] : memref<480x187xbf16, #tpu.memory_space<vmem>>, vector<32x187xbf16>
      tpu.vector_store %arg14[%c224, %c0_207], %177 {strides = array<i32>} : memref<480x187xbf16, #tpu.memory_space<vmem>>, vector<32x187xbf16>,
      %c0_208 = arith.constant 0 : index
      %c8_209 = arith.constant 8 : index
      %179 = vector.load %arg13[%c0_208, %c8_209] : memref<32x201xbf16, #tpu.memory_space<vmem>>, vector<32x187xbf16>
      %c256 = arith.constant 256 : index
      %c0_210 = arith.constant 0 : index
      %180 = vector.load %arg14[%c256, %c0_210] : memref<480x187xbf16, #tpu.memory_space<vmem>>, vector<32x187xbf16>
      tpu.vector_store %arg14[%c256, %c0_210], %179 {strides = array<i32>} : memref<480x187xbf16, #tpu.memory_space<vmem>>, vector<32x187xbf16>,
      %c0_211 = arith.constant 0 : index
      %c9_212 = arith.constant 9 : index
      %181 = vector.load %arg13[%c0_211, %c9_212] : memref<32x201xbf16, #tpu.memory_space<vmem>>, vector<32x187xbf16>
      %c288 = arith.constant 288 : index
      %c0_213 = arith.constant 0 : index
      %182 = vector.load %arg14[%c288, %c0_213] : memref<480x187xbf16, #tpu.memory_space<vmem>>, vector<32x187xbf16>
      tpu.vector_store %arg14[%c288, %c0_213], %181 {strides = array<i32>} : memref<480x187xbf16, #tpu.memory_space<vmem>>, vector<32x187xbf16>,
      %c0_214 = arith.constant 0 : index
      %c10_215 = arith.constant 10 : index
      %183 = vector.load %arg13[%c0_214, %c10_215] : memref<32x201xbf16, #tpu.memory_space<vmem>>, vector<32x187xbf16>
      %c320 = arith.constant 320 : index
      %c0_216 = arith.constant 0 : index
      %184 = vector.load %arg14[%c320, %c0_216] : memref<480x187xbf16, #tpu.memory_space<vmem>>, vector<32x187xbf16>
      tpu.vector_store %arg14[%c320, %c0_216], %183 {strides = array<i32>} : memref<480x187xbf16, #tpu.memory_space<vmem>>, vector<32x187xbf16>,
      %c0_217 = arith.constant 0 : index
      %c11_218 = arith.constant 11 : index
      %185 = vector.load %arg13[%c0_217, %c11_218] : memref<32x201xbf16, #tpu.memory_space<vmem>>, vector<32x187xbf16>
      %c352 = arith.constant 352 : index
      %c0_219 = arith.constant 0 : index
      %186 = vector.load %arg14[%c352, %c0_219] : memref<480x187xbf16, #tpu.memory_space<vmem>>, vector<32x187xbf16>
      tpu.vector_store %arg14[%c352, %c0_219], %185 {strides = array<i32>} : memref<480x187xbf16, #tpu.memory_space<vmem>>, vector<32x187xbf16>,
      %c0_220 = arith.constant 0 : index
      %c12_221 = arith.constant 12 : index
      %187 = vector.load %arg13[%c0_220, %c12_221] : memref<32x201xbf16, #tpu.memory_space<vmem>>, vector<32x187xbf16>
      %c384 = arith.constant 384 : index
      %c0_222 = arith.constant 0 : index
      %188 = vector.load %arg14[%c384, %c0_222] : memref<480x187xbf16, #tpu.memory_space<vmem>>, vector<32x187xbf16>
      tpu.vector_store %arg14[%c384, %c0_222], %187 {strides = array<i32>} : memref<480x187xbf16, #tpu.memory_space<vmem>>, vector<32x187xbf16>,
      %c0_223 = arith.constant 0 : index
      %c13_224 = arith.constant 13 : index
      %189 = vector.load %arg13[%c0_223, %c13_224] : memref<32x201xbf16, #tpu.memory_space<vmem>>, vector<32x187xbf16>
      %c416 = arith.constant 416 : index
      %c0_225 = arith.constant 0 : index
      %190 = vector.load %arg14[%c416, %c0_225] : memref<480x187xbf16, #tpu.memory_space<vmem>>, vector<32x187xbf16>
      tpu.vector_store %arg14[%c416, %c0_225], %189 {strides = array<i32>} : memref<480x187xbf16, #tpu.memory_space<vmem>>, vector<32x187xbf16>,
      %c0_226 = arith.constant 0 : index
      %c14_227 = arith.constant 14 : index
      %191 = vector.load %arg13[%c0_226, %c14_227] : memref<32x201xbf16, #tpu.memory_space<vmem>>, vector<32x187xbf16>
      %c448 = arith.constant 448 : index
      %c0_228 = arith.constant 0 : index
      %192 = vector.load %arg14[%c448, %c0_228] : memref<480x187xbf16, #tpu.memory_space<vmem>>, vector<32x187xbf16>
      tpu.vector_store %arg14[%c448, %c0_228], %191 {strides = array<i32>} : memref<480x187xbf16, #tpu.memory_space<vmem>>, vector<32x187xbf16>,
      %c0_229 = arith.constant 0 : index
      %c0_230 = arith.constant 0 : index
      %193 = vector.load %arg4[%c0_229, %c0_230] : memref<32x480xbf16, #tpu.memory_space<vmem>>, vector<32x480xbf16>
      %c0_231 = arith.constant 0 : index
      %c0_232 = arith.constant 0 : index
      %194 = vector.load %arg14[%c0_231, %c0_232] : memref<480x187xbf16, #tpu.memory_space<vmem>>, vector<480x187xbf16>
      %cst_233 = arith.constant dense<0.000000e+00> : vector<32x187xf32>
      %195 = tpu.matmul %193, %194, %cst_233 {dimension_numbers = #tpu.dot_dimension_numbers<[1], [0], [0], [1], [0, 0, 1, 1], [], []>} : vector<32x480xbf16>, vector<480x187xbf16>, vector<32x187xf32> -> vector<32x187xf32>
      %c0_234 = arith.constant 0 : index
      %c0_235 = arith.constant 0 : index
      %196 = vector.load %arg5[%c0_234, %c0_235] : memref<32x1xf32, #tpu.memory_space<vmem>>, vector<32x1xf32>
      %197 = vector.broadcast %196 : vector<32x1xf32> to vector<32x187xf32>
      %198 = arith.addf %195, %197 : vector<32x187xf32>
      %cst_236 = arith.constant 0.000000e+00 : f32
      %199 = vector.broadcast %cst_236 : f32 to vector<32x187xf32>
      %200 = arith.cmpf ogt, %198, %199 : vector<32x187xf32>
      %cst_237 = arith.constant 0.000000e+00 : f32
      %201 = vector.broadcast %cst_237 : f32 to vector<32x187xf32>
      %202 = arith.minimumf %198, %201 : vector<32x187xf32>
      %203 = math.exp %202 : vector<32x187xf32>
      %cst_238 = arith.constant 1.000000e+00 : f32
      %204 = vector.broadcast %cst_238 : f32 to vector<32x187xf32>
      %205 = arith.subf %203, %204 : vector<32x187xf32>
      %206 = arith.select %200, %198, %205 : vector<32x187xi1>, vector<32x187xf32>
      %c0_239 = arith.constant 0 : index
      %c0_240 = arith.constant 0 : index
      %207 = vector.load %arg9[%c0_239, %c0_240] : memref<187x23xf32, #tpu.memory_space<vmem>>, vector<187x23xf32>
      %cst_241 = arith.constant dense<0.000000e+00> : vector<32x23xf32>
      %208 = tpu.matmul %206, %207, %cst_241 {dimension_numbers = #tpu.dot_dimension_numbers<[1], [0], [0], [1], [0, 0, 1, 1], [], []>} : vector<32x187xf32>, vector<187x23xf32>, vector<32x23xf32> -> vector<32x23xf32>
      %c0_242 = arith.constant 0 : index
      %c0_243 = arith.constant 0 : index
      %c0_244 = arith.constant 0 : index
      %209 = vector.load %arg6[%c0_242, %c0_243, %c0_244] : memref<2x32x23xf32, #tpu.memory_space<vmem>>, vector<2x32x23xf32>
      %210 = vector.shape_cast %208 : vector<32x23xf32> to vector<1x32x23xf32>
      %211 = vector.broadcast %210 : vector<1x32x23xf32> to vector<2x32x23xf32>
      %212 = arith.mulf %209, %211 : vector<2x32x23xf32>
      %cst_245 = arith.constant dense<0.000000e+00> : vector<2x32xf32>
      %213 = vector.multi_reduction <add>, %212, %cst_245 [2] : vector<2x32x23xf32> to vector<2x32xf32>
      %cst_246 = arith.constant dense<0.000000e+00> : vector<2xf32>
      %214 = vector.multi_reduction <add>, %213, %cst_246 [1] : vector<2x32xf32> to vector<2xf32>
      %215 = vector.shape_cast %214 : vector<2xf32> to vector<1x2xf32>
      %c0_247 = arith.constant 0 : index
      %c0_248 = arith.constant 0 : index
      %216 = vector.load %arg7[%c0_247, %c0_248] : memref<1x2xf32, #tpu.memory_space<vmem>>, vector<1x2xf32>
      %217 = arith.addf %215, %216 : vector<1x2xf32>
      %218 = arith.index_cast %10 : i32 to index
      %c0_249 = arith.constant 0 : index
      %219 = vector.load %arg10[%218, %c0_249] : memref<8x2xf32, #tpu.memory_space<vmem>>, vector<1x2xf32>
      tpu.vector_store %arg10[%218, %c0_249], %217 {strides = array<i32>} : memref<8x2xf32, #tpu.memory_space<vmem>>, vector<1x2xf32>,
    }
    %c8_i32_8 = arith.constant 8 : i32
    return
  }
  func.func @transform_0(%arg0: i32) -> (i32, i32, i32) {
    %c0_i32 = arith.constant 0 : i32
    %c0_i32_0 = arith.constant 0 : i32
    %c0_i32_1 = arith.constant 0 : i32
    return %arg0, %c0_i32, %c0_i32_0 : i32, i32, i32
  }
  func.func @transform_1(%arg0: i32) -> (i32, i32) {
    %c0_i32 = arith.constant 0 : i32
    %c0_i32_0 = arith.constant 0 : i32
    %c0_i32_1 = arith.constant 0 : i32
    return %c0_i32, %c0_i32_0 : i32, i32
  }
  func.func @transform_2(%arg0: i32) -> (i32, i32) {
    %c0_i32 = arith.constant 0 : i32
    %c0_i32_0 = arith.constant 0 : i32
    %c0_i32_1 = arith.constant 0 : i32
    return %c0_i32, %c0_i32_0 : i32, i32
  }
  func.func @transform_3(%arg0: i32) -> (i32, i32) {
    %c0_i32 = arith.constant 0 : i32
    %c0_i32_0 = arith.constant 0 : i32
    %c0_i32_1 = arith.constant 0 : i32
    return %c0_i32, %c0_i32_0 : i32, i32
  }
  func.func @transform_4(%arg0: i32) -> (i32, i32) {
    %c0_i32 = arith.constant 0 : i32
    %c0_i32_0 = arith.constant 0 : i32
    %c0_i32_1 = arith.constant 0 : i32
    return %c0_i32, %c0_i32_0 : i32, i32
  }
  func.func @transform_5(%arg0: i32) -> (i32, i32, i32) {
    %c0_i32 = arith.constant 0 : i32
    %c0_i32_0 = arith.constant 0 : i32
    %c0_i32_1 = arith.constant 0 : i32
    %c0_i32_2 = arith.constant 0 : i32
    return %c0_i32, %c0_i32_0, %c0_i32_1 : i32, i32, i32
  }
  func.func @transform_6(%arg0: i32) -> (i32, i32) {
    %c0_i32 = arith.constant 0 : i32
    %c0_i32_0 = arith.constant 0 : i32
    %c0_i32_1 = arith.constant 0 : i32
    return %c0_i32, %c0_i32_0 : i32, i32
  }
  func.func @transform_7(%arg0: i32) -> (i32, i32) {
    %c0_i32 = arith.constant 0 : i32
    %c0_i32_0 = arith.constant 0 : i32
    %c0_i32_1 = arith.constant 0 : i32
    return %c0_i32, %c0_i32_0 : i32, i32
  }
  func.func @transform_8(%arg0: i32) -> (i32, i32) {
    %c0_i32 = arith.constant 0 : i32
    %c0_i32_0 = arith.constant 0 : i32
    %c0_i32_1 = arith.constant 0 : i32
    return %c0_i32, %c0_i32_0 : i32, i32
  }
  func.func @transform_9(%arg0: i32) -> (i32, i32) {
    %c0_i32 = arith.constant 0 : i32
    %c0_i32_0 = arith.constant 0 : i32
    return %arg0, %c0_i32 : i32, i32
  }
}

</mosaic_0001>

<bundles_post_ra>
// kernel: tpu_custom_call.1
= control target key start
LH: loop header
LB: loop body
LE: loop exit
PB: predicated region body
PF: predicated region fallthrough
CT: control target
= control target key end

     0   :  { %s7822_s30 = smov 0   ;;  %s10779_s0 = inlined_call_operand.vmem [shape: f32[16,2,750], index: 0, kind: input, shape index: {}]   ;;  %s10780_s1 = inlined_call_operand.vmem [shape: bf16[32,102], index: 1, kind: input, shape index: {}]   ;;  %s10781_s2 = inlined_call_operand.vmem [shape: f32[32,1], index: 2, kind: input, shape index: {}]   ;;  %s10782_s3 = inlined_call_operand.vmem [shape: bf16[32,480], index: 3, kind: input, shape index: {}]   ;;  %s10783_s4 = inlined_call_operand.vmem [shape: f32[32,1], index: 4, kind: input, shape index: {}]   ;;  %s10784_s5 = inlined_call_operand.vmem [shape: f32[2,32,23], index: 5, kind: input, shape index: {}]   ;;  %s10785_s6 = inlined_call_operand.vmem [shape: f32[1,2], index: 6, kind: input, shape index: {}]   ;;  %s10786_s7 = inlined_call_operand.vmem [shape: f32[128,32], index: 7, kind: input, shape index: {}]   ;;  %s10787_s8 = inlined_call_operand.vmem [shape: f32[187,23], index: 8, kind: input, shape index: {}]   ;;  %s10788_s9 = inlined_call_operand.vmem [shape: f32[16,2], index: 9, kind: output, shape index: {}]  }
   0x1   :  { %11096 = sst [smem:[#allocation46_spill]] %s10779_s0 }
   0x2   :  { %11097 = sst [smem:[#allocation47_spill]] %s10781_s2 }
   0x3   :  { %11098 = sst [smem:[#allocation48_spill]] %s10782_s3 }
   0x4   :  { %11099 = sst [smem:[#allocation49_spill]] %s10783_s4 }
   0x5   :  { %11100 = sst [smem:[#allocation50_spill]] %s10784_s5 }
   0x6   :  { %11101 = sst [smem:[#allocation51_spill]] %s10785_s6 }
   0x7   :  { %11102 = sst [smem:[#allocation52_spill]] %s10786_s7 }
   0x8   :  { %11103 = sst [smem:[#allocation53_spill]] %s10787_s8 }
   0x9   :  { %11104 = sst [smem:[#allocation54_spill]] %s10788_s9 }
   0xa LB: > { %11105 = sst [smem:[#allocation6_spill]] %s7706_s30  ;;  %s6680_s10 = sadd.s32 4294967295, %s7706_s30   ;;  %s7706_s30 = sphi %s7822_s30, %s19_s30  }
   0xb   : > { %p6684_p0 = scmp.ge.s32.totalorder %s7706_s30, 1  ;;  %p289_p1 = scmp.lt.s32.totalorder %s7706_s30, 3 }
   0xd   : > { %p290_p2 = pnand %p6684_p0, %p289_p1 }
   0xe   : > { %s6685_s11 = sshll.u32 (!%p290_p2), %s6680_s10, 3  ;;  %p332_p3 = scmp.lt.s32.totalorder (!%p290_p2), %s6680_s10, 1 }
   0xf   : > { %293 = sbr.rel (%p290_p2) target bundleno = 2320 (0x910), region = 56  ;;  %p7830_p4 = scmp.lt.s32.totalorder (!%p290_p2), %s6685_s11, 15 }
  0x10   : > { %s11107_s9 = sld [smem:[#allocation54_spill]] (!%p290_p2)  ;;  %s7846_s21 = smov (!%p290_p2), 0  }
  0x11   : > { %s11109_s0 = sld [smem:[#allocation46_spill]] (!%p290_p2) }
  0x14   : > { %vm337_vm0 = vcmask 196608   ;;  %vm339_vm1 = vcmask 254008   ;;  %vm341_vm2 = vcmask 52224   ;;  %v7712_v0 = vmov 0   ;;  %s11520_s10 = smov (!%p332_p3, %s6680_s10), 1  ;;  %s11522_s11 = smov (!%p7830_p4, %s6685_s11), 15 }
  0x15   : > { %338 = vst.msk [vmem:[#allocation2] sm:$0x1] %vm337_vm0, %v7712_v0  ;;  %vm346_vm3 = vcmask 593424   ;;  %s6687_s13 = sshll.u32 %s11520_s10, 3  ;;  %s7254_s14 = smul.u32 12, %s11522_s11 }
  0x16   : > { %340 = vst.msk [vmem:[#allocation2 + $0x6] sm:$0x1] %vm339_vm1, %v7712_v0  ;;  %s7839_s17 = scalar_lea.vmem %s11107_s9, %s6687_s13 }
  0x17   : > { %342 = vst.msk [vmem:[#allocation4] sm:$0xf] %vm341_vm2, %v7712_v0  ;;  %343 = vst.msk [vmem:[#allocation4 + $0x8] sm:$0xf] %vm341_vm2, %v7712_v0  ;;  %11108 = sst [smem:[#allocation7_spill]] %s7839_s17  ;;  %s7844_s20 = scalar_lea.vmem %s11109_s0, %s7254_s14 }
  0x18   : > { %344 = vst.msk [vmem:[#allocation4 + $0x10] sm:$0xf] %vm341_vm2, %v7712_v0  ;;  %345 = vst.msk [vmem:[#allocation4 + $0x18] sm:$0xf] %vm341_vm2, %v7712_v0  ;;  %11110 = sst [smem:[#allocation8_spill]] %s7844_s20 }
  0x19   : > { %347 = vst.msk [vmem:[#allocation4 + $0x4] sm:$0xf] %vm346_vm3, %v7712_v0  ;;  %348 = vst.msk [vmem:[#allocation4 + $0xc] sm:$0xf] %vm346_vm3, %v7712_v0 }
  0x1a   : > { %349 = vst.msk [vmem:[#allocation4 + $0x14] sm:$0xf] %vm346_vm3, %v7712_v0  ;;  %350 = vst.msk [vmem:[#allocation4 + $0x1c] sm:$0xf] %vm346_vm3, %v7712_v0 }
  0x1b LB: >> { %s11111_s20 = sld [smem:[#allocation8_spill]]  ;;  %v10867_v1 = vlaneseq  ;;  %v7713_v2 = vmov 1983009808   ;;  %v7714_v4 = vmov 1966171168   ;;  %s6887_s22 = smul.u32 12, %s7710_s21  ;;  %s7710_s21 = sphi %s7846_s21, %s356_s21  }
  0x1c   : >> { %11112 = sst [smem:[#allocation9_spill]] %s7710_s21  ;;  %v366_v3 = vunpack.c.l.s4 %v7713_v2  ;;  %v411_v5 = vunpack.c.l.s4 %v7714_v4  ;;  %s7715_s24 = smov 25   ;;  %vm453_vm4 = vcmask 1040584   ;;  %vm10888_vm5 = vcmask 1041409  }
  0x1d   : >> { %v7853_v6 = vshrl.u32 %v10867_v1, 7  ;;  %vm455_vm6 = vmor %vm10888_vm5, %vm453_vm4  ;;  %vm10900_vm7 = vcmask 1042434   ;;  %vm10887_vm9 = vcmask 1043459   ;;  %vm460_vm11 = vcmask 1044484   ;;  %s10799_s25 = smov 80   ;;  %s10797_s26 = smov 88  }
  0x1e   : >> { %v367_v7 = vunpack.c.0.s8 %v366_v3  ;;  %v412_v11 = vunpack.c.0.s8 %v411_v5  ;;  %vm457_vm8 = vmor %vm10900_vm7, %vm455_vm6  ;;  %vm462_vm13 = vcmask 1045509   ;;  %vm464_vm15 = vcmask 55302   ;;  %s10805_s27 = smov 79   ;;  %s10801_s28 = smov 84  }
  0x1f   : >> { %11113 = vst [vmem:[#allocation10_spill] sm:$0xff] %v7853_v6  ;;  %vm459_vm10 = vmor %vm10887_vm9, %vm457_vm8  ;;  %v7716_v29 = vmov 1935823168   ;;  %vm450_vm0 = vcmask 203776   ;;  %s10803_s29 = smov 87   ;;  %s10807_s10 = smov 96  }
  0x20   : >> { %v370_v10 = vsub.s32 %v367_v7, %v7853_v6  ;;  %v415_v18 = vsub.s32 %v412_v11, %v7853_v6  ;;  %vm461_vm12 = vmor %vm460_vm11, %vm459_vm10  ;;  %v471_v30 = vunpack.c.l.s4 %v7716_v29  ;;  %s10809_s11 = smov 83   ;;  %s10811_s12 = smov 92   ;;  %vm511_vm2 = vcmask 1040384  }
  0x21   : >> { %s359_s23 = scalar_lea.vmem %s11111_s20, %s6887_s22  ;;  %vm463_vm14 = vmor %vm462_vm13, %vm461_vm12  ;;  %s10813_s13 = smov 95   ;;  %vm512_vm3 = vcmask 897028   ;;  %vm564_vm6 = vcmask 1043456   ;;  %vm3759_vm8 = vcmask 654336   ;;  %vm11078_vm10 = vcmask 719872  }
  0x22   : >> { %v360_v8 = vld [vmem:[%s359_s23] sm:$0xff]  ;;  %v6689_v9 = vld.sshfl [vmem:[%s359_s23 + $0x8] sm:$0x33 pattern:$0x76325410]  ;;  %vm465_vm1 = vmor %vm464_vm15, %vm463_vm14  ;;  %v472_v34 = vunpack.c.0.s8 %v471_v30  ;;  %s10815_s14 = smov 104  }
  0x23   : >> { %v364_v12 = vcombine.high %v360_v8, %v360_v8  ;;  %v388_v13 = vcombine.high %v6689_v9, %v6689_v9  ;;  %v371_v14 = vrot.slane %v360_v8, %v370_v10  ;;  %s10817_s15 = smov 91   ;;  %s10819_s16 = smov 100   ;;  %vm8195_vm4 = vmor %vm512_vm3, %vm511_vm2  ;;  %vm3831_vm11 = vcmask 646144  }
  0x24   : >> { %v7862_v35 = vsub.s32 %v472_v34, %v7853_v6  ;;  %s10821_s18 = smov 103   ;;  %s10789_s19 = smov 112   ;;  %vm11052_vm12 = vcmask 687104   ;;  %vm11077_vm13 = vcmask 711680   ;;  %vm10994_vm14 = vcmask 785408  }
  0x25   : >> { %v378_v15 = vrot.slane %v364_v12, %v370_v10  ;;  %v6692_v16 = vpack.c.bf16 %v388_v13, %v6689_v9  ;;  %v379_v17 = vcombine.high %v371_v14, %v371_v14  ;;  %s10827_s22 = smov 99   ;;  %s10791_s23 = smov 108   ;;  %vm10995_vm15 = vcmask 678912  }
  0x26   : >> { %vm10975_vm2 = vcmask 850944   ;;  %vm10982_vm3 = vcmask 744448   ;;  %vm10901_vm9 = vcmask 818176   ;;  %vm10971_vm5 = vcmask 842752   ;;  %s11152_s0 = smov 85   ;;  %s11156_s9 = smov 82  }
  0x27   : >> { %v380_v19 = vcombine.high %v378_v15, %v378_v15  ;;  %v6690_v20 = vpack.c.bf16 %v379_v17, %v371_v14  ;;  %v430_v22 = vrot.slane %v6692_v16, %v415_v18  ;;  %vm10914_vm7 = vcmask 916480   ;;  %s11157_s20 = smov 83   ;;  %s11159_s30 = smov 96  }
  0x28   : >> { %s11160_s17 = smov 81   ;;  %s11165_s21 = smov 94  }
  0x29   : >> { %v6691_v21 = vpack.c.bf16 %v380_v19, %v378_v15  ;;  %v416_v23 = vrot.slane %v6690_v20, %v415_v18  ;;  %v445_v26 = vrot.slane %v430_v22, %v415_v18  ;;  %s11166_s6 = smov 95   ;;  %s11170_s5 = smov 92  }
  0x2a   : >> { %s11171_s8 = smov 93   ;;  %s11174_s4 = smov 90  }
  0x2b   : >> { %v423_v24 = vrot.slane %v6691_v21, %v415_v18  ;;  %s11175_s3 = smov 91   ;;  %s11178_s7 = smov 104  }
  0x2c   : >> { %s11179_s2 = smov 89  }
  0x2d   : >> { %v431_v25 = vcombine.low %v416_v23, %v423_v24 }
  0x2f   : >> { %v438_v27 = vrot.slane %v431_v25, %v415_v18 }
  0x31   : >> { %v446_v28 = vcombine.low %v438_v27, %v445_v26 }
  0x33   : >> { %447 = vrot.lane.b32.xlu0 %v446_v28, %s7715_s24  ;;  %s10793_s24 = smov 111  }
  0xa5   : >> { %v448_v31 = vpop.permute.xlu0 %447 }
  0xa6   : >> { %v449_v32 = vrot.slane %v448_v31, 7 }
  0xa8   : >> { %v451_v33 = vsel %vm450_vm0, %v449_v32, %v448_v31  ;;  %vm10984_vm0 = vcmask 752640  }
  0xa9   : >> { %466 = vst.msk [vmem:[#allocation2] sm:$0x7f] %vm465_vm1, %v451_v33  ;;  %vm10985_vm1 = vcmask 777216  }
  0xb0   : >> { %v7864_v36 = vld.sshfl [vmem:[#allocation2] sm:$0x7f pattern:$0x73625140] }
  0xb1   : >> { %v7866_v37 = vld.sshfl [vmem:[#allocation2] sm:$0x7f pattern:$0x73625140]  ;;  %v3724_v40 = vrot.slane %v7864_v36, %v7862_v35  ;;  %v3716_v16 = vcombine.high %v7864_v36, %v7864_v36 }
  0xb2   : >> { %v7868_v38 = vld [vmem:[#allocation2] sm:$0x7f]  ;;  %v3148_v41 = vrot.slane %v7866_v37, %v7862_v35  ;;  %v3140_v19 = vcombine.high %v7866_v37, %v7866_v37 }
  0xb3   : >> { %v7870_v39 = vld.sshfl [vmem:[#allocation2] sm:$0x7f pattern:$0x73625140]  ;;  %v7878_v42 = vrot.slane %v7868_v38, %v7862_v35  ;;  %3746 = vrot.lane.b32.xlu0 %v3724_v40, %s10799_s25  ;;  %v3731_v22 = vrot.slane %v3716_v16, %v7862_v35 }
  0xb4   : >> { %v7880_v43 = vld.sshfl [vmem:[#allocation2] sm:$0x7f pattern:$0x73625140]  ;;  %3170 = vrot.lane.b32.xlu1 %v3148_v41, %s10797_s26  ;;  %v3436_v46 = vrot.slane %v7870_v39, %v7862_v35  ;;  %v3155_v25 = vrot.slane %v3140_v19, %v7862_v35  ;;  %v3428_v31 = vcombine.high %v7870_v39, %v7870_v39 }
  0xb5   : >> { %v7882_v44 = vld.sshfl [vmem:[#allocation2] sm:$0x7f pattern:$0x73625140]  ;;  %v3803_v45 = vrot.slane %v7878_v42, %v7862_v35  ;;  %v3227_v49 = vrot.slane %v7880_v43, %v7862_v35  ;;  %v3788_v20 = vcombine.low %v7878_v42, %v7878_v42  ;;  %v3212_v32 = vcombine.low %v7880_v43, %v7880_v43 }
  0xb6   : >> { %v7890_v47 = vld.sshfl [vmem:[#allocation2] sm:$0x7f pattern:$0x73625140]  ;;  %v2572_v50 = vrot.slane %v7882_v44, %v7862_v35  ;;  %v3443_v39 = vrot.slane %v3428_v31, %v7862_v35 }
  0xb7   : >> { %v7892_v48 = vld.sshfl [vmem:[#allocation2] sm:$0x7f pattern:$0x73625140]  ;;  %3820 = vrot.lane.b32.xlu0 %v3803_v45, %s10805_s27  ;;  %v3515_v53 = vrot.slane %v7890_v47, %v7862_v35  ;;  %v3796_v26 = vrot.slane %v3788_v20, %v7862_v35  ;;  %v3220_v40 = vrot.slane %v3212_v32, %v7862_v35 }
  0xb8   : >> { %3458 = vrot.lane.b32.xlu1 %v3436_v46, %s10801_s28  ;;  %v7900_v51 = vld.sshfl [vmem:[#allocation2] sm:$0x7f pattern:$0x73625140]  ;;  %v2860_v54 = vrot.slane %v7892_v48, %v7862_v35  ;;  %v2564_v46 = vcombine.high %v7882_v44, %v7882_v44 }
  0xb9   : >> { %v7902_v52 = vld.sshfl [vmem:[#allocation2] sm:$0x7f pattern:$0x73625140]  ;;  %v2651_v57 = vrot.slane %v7900_v51, %v7862_v35 }
  0xba   : >> { %v7910_v55 = vld.sshfl [vmem:[#allocation2] sm:$0x7f pattern:$0x73625140]  ;;  %v1996_v58 = vrot.slane %v7902_v52, %v7862_v35  ;;  %v2579_v44 = vrot.slane %v2564_v46, %v7862_v35 }
  0xbb   : >> { %3244 = vrot.lane.b32.xlu0 %v3227_v49, %s10803_s29  ;;  %v7912_v56 = vld.sshfl [vmem:[#allocation2] sm:$0x7f pattern:$0x73625140]  ;;  %v2939_v61 = vrot.slane %v7910_v55, %v7862_v35  ;;  %v3500_v49 = vcombine.low %v7890_v47, %v7890_v47 }
  0xbc   : >> { %2594 = vrot.lane.b32.xlu1 %v2572_v50, %s10807_s10  ;;  %v7920_v59 = vld.sshfl [vmem:[#allocation2] sm:$0x7f pattern:$0x73625140]  ;;  %v2284_v62 = vrot.slane %v7912_v56, %v7862_v35 }
  0xbd   : >> { %v7922_v60 = vld.sshfl [vmem:[#allocation2] sm:$0x5f pattern:$0x73625140]  ;;  %v2075_v2 = vrot.slane %v7920_v59, %v7862_v35  ;;  %v3508_v47 = vrot.slane %v3500_v49, %v7862_v35 }
  0xbe   : >> { %v7930_v63 = vld.sshfl [vmem:[#allocation2] sm:$0x7f pattern:$0x73625140]  ;;  %v1454_v3 = vrot.slane %v7922_v60, %v7862_v35 }
  0xbf   : >> { %3532 = vrot.lane.b32.xlu0 %v3515_v53, %s10809_s11  ;;  %v7932_v0 = vld.sshfl [vmem:[#allocation2] sm:$0x7f pattern:$0x73625140]  ;;  %v2363_v7 = vrot.slane %v7930_v63, %v7862_v35 }
  0xc0   : >> { %2882 = vrot.lane.b32.xlu1 %v2860_v54, %s10811_s12  ;;  %v7940_v4 = vld.sshfl [vmem:[#allocation2] sm:$0x5f pattern:$0x73625140]  ;;  %v1708_v8 = vrot.slane %v7932_v0, %v7862_v35 }
  0xc1   : >> { %v7942_v5 = vld.sshfl [vmem:[#allocation2] sm:$0x5f pattern:$0x73625140]  ;;  %v1522_v11 = vrot.slane %v7940_v4, %v7862_v35 }
  0xc2   : >> { %v7950_v9 = vld.sshfl [vmem:[#allocation2] sm:$0x7f pattern:$0x73625140]  ;;  %v970_v12 = vrot.slane %v7942_v5, %v7862_v35 }
  0xc3   : >> { %2668 = vrot.lane.b32.xlu0 %v2651_v57, %s10813_s13  ;;  %v7952_v10 = vld.sshfl [vmem:[#allocation2] sm:$0x5f pattern:$0x73625140]  ;;  %v1787_v14 = vrot.slane %v7950_v9, %v7862_v35 }
  0xc4   : >> { %2018 = vrot.lane.b32.xlu1 %v1996_v58, %s10815_s14  ;;  %v7960_v13 = vld.sshfl [vmem:[#allocation2] sm:$0x5f pattern:$0x73625140]  ;;  %v1212_v15 = vrot.slane %v7952_v10, %v7862_v35 }
  0xc5   : >> { %v7970_v17 = vld [vmem:[#allocation2] sm:$0x7f]  ;;  %v1038_v21 = vrot.slane %v7960_v13, %v7862_v35 }
  0xc6   : >> { %v7972_v18 = vld [vmem:[#allocation2] sm:$0x7f]  ;;  %v3341_v23 = vcombine.low %v7970_v17, %v7970_v17 }
  0xc7   : >> { %2956 = vrot.lane.b32.xlu0 %v2939_v61, %s10817_s15  ;;  %v3845_v24 = vcombine.low %v7972_v18, %v7972_v18  ;;  %v7997_v29 = vld [vmem:[#allocation2] sm:$0x7f] }
  0xc8   : >> { %2306 = vrot.lane.b32.xlu1 %v2284_v62, %s10819_s16  ;;  %v7992_v27 = vrot.slane %v3341_v23, %v7862_v35  ;;  %v7999_v30 = vld [vmem:[#allocation2] sm:$0x7f]  ;;  %v3629_v36 = vcombine.low %v7997_v29, %v7997_v29 }
  0xc9   : >> { %v7995_v28 = vrot.slane %v3845_v24, %v7862_v35  ;;  %v3269_v37 = vcombine.low %v7999_v30, %v7999_v30  ;;  %v8025_v43 = vld [vmem:[#allocation2] sm:$0x7f] }
  0xca   : >> { %v3371_v33 = vrot.slane %v7992_v27, %v7862_v35  ;;  %v8020_v41 = vrot.slane %v3629_v36, %v7862_v35  ;;  %v8027_v45 = vld [vmem:[#allocation2] sm:$0x7f]  ;;  %v2765_v54 = vcombine.low %v8025_v43, %v8025_v43  ;;  %v2276_v36 = vcombine.high %v7912_v56, %v7912_v56 }
  0xcb   : >> { %2092 = vrot.lane.b32.xlu0 %v2075_v2, %s10821_s18  ;;  %v3868_v34 = vrot.slane %v7995_v28, %v7862_v35  ;;  %v8023_v42 = vrot.slane %v3269_v37, %v7862_v35  ;;  %v3557_v57 = vcombine.low %v8027_v45, %v8027_v45  ;;  %v3051_v62 = vld [vmem:[#allocation2] sm:$0x7f]  ;;  %v2060_v37 = vcombine.low %v7920_v59, %v7920_v59 }
  0xcc   : >> { %1469 = vrot.lane.b32.xlu1 %v1454_v3, %s10789_s19  ;;  %s10795_s19 = smov 120   ;;  %v3659_v50 = vrot.slane %v8020_v41, %v7862_v35  ;;  %v8048_v58 = vrot.slane %v2765_v54, %v7862_v35  ;;  %v8053_v2 = vld [vmem:[#allocation2] sm:$0x7f]  ;;  %v2852_v3 = vcombine.high %v7892_v48, %v7892_v48 }
  0xcd   : >> { %v3292_v53 = vrot.slane %v8023_v42, %v7862_v35  ;;  %v8051_v61 = vrot.slane %v3557_v57, %v7862_v35  ;;  %v2187_v19 = vld [vmem:[#allocation2] sm:$0x7f]  ;;  %v2068_v56 = vrot.slane %v2060_v37, %v7862_v35 }
  0xce   : >> { %v2867_v48 = vrot.slane %v2852_v3, %v7862_v35  ;;  %v8077_v20 = vld [vmem:[#allocation2] sm:$0x7f] }
  0xcf   : >> { %2380 = vrot.lane.b32.xlu0 %v2363_v7, %s10827_s22  ;;  %v2636_v7 = vcombine.low %v7900_v51, %v7900_v51  ;;  %v1611_v54 = vld [vmem:[#allocation2] sm:$0x7f] }
  0xd0   : >> { %1730 = vrot.lane.b32.xlu1 %v1708_v8, %s10791_s23  ;;  %s10837_s23 = smov 107   ;;  %v2795_v8 = vrot.slane %v8048_v58, %v7862_v35  ;;  %v2403_v57 = vld [vmem:[#allocation2] sm:$0x7f] }
  0xd1   : >> { %v2644_v51 = vrot.slane %v2636_v7, %v7862_v35  ;;  %v1613_v7 = vcombine.low %v1611_v54, %v1611_v54  ;;  %v1067_v54 = vld [vmem:[#allocation2] sm:$0x3f] }
  0xd3   : >> { %1532 = vrot.lane.b32.xlu0 %v1522_v11, %s10793_s24  ;;  %s10823_s24 = smov 116   ;;  %v3580_v11 = vrot.slane %v8051_v61, %v7862_v35 }
  0xd4   : >> { %985 = vrot.lane.b32.xlu1 %v970_v12, %s10795_s19  ;;  %s10843_s19 = smov 119   ;;  %v3053_v12 = vcombine.low %v3051_v62, %v3051_v62 }
  0xd7   : >> { %1804 = vrot.lane.b32.xlu0 %v1787_v14, %s10837_s23  ;;  %v2693_v14 = vcombine.low %v8053_v2, %v8053_v2 }
  0xd8   : >> { %1227 = vrot.lane.b32.xlu1 %v1212_v15, %s10823_s24  ;;  %v8072_v15 = vrot.slane %v3053_v12, %v7862_v35  ;;  %s10831_s24 = smov 109  }
  0xd9   : >> { %v8075_v16 = vrot.slane %v2693_v14, %v7862_v35  ;;  %v1899_v14 = vld [vmem:[#allocation2] sm:$0x7f] }
  0xda   : >> { %v3083_v23 = vrot.slane %v8072_v15, %v7862_v35 }
  0xdb   : >> { %1048 = vrot.lane.b32.xlu0 %v1038_v21, %s10843_s19  ;;  %v1988_v21 = vcombine.high %v7902_v52, %v7902_v52  ;;  %v2716_v24 = vrot.slane %v8075_v16, %v7862_v35 }
  0xdc   : >> { %3748 = vrot.lane.b32.xlu1 %v3731_v22, %s10799_s25  ;;  %s10907_s25 = smov 78   ;;  %v2924_v22 = vcombine.low %v7910_v55, %v7910_v55 }
  0xdd   : >> { %v2003_v52 = vrot.slane %v1988_v21, %v7862_v35 }
  0xde   : >> { %v2932_v55 = vrot.slane %v2924_v22, %v7862_v35 }
  0xdf   : >> { %3172 = vrot.lane.b32.xlu0 %v3155_v25, %s10797_s26  ;;  %s10898_s26 = smov 85   ;;  %v2189_v25 = vcombine.low %v2187_v19, %v2187_v19  ;;  %v1507_v19 = vcombine.low %v7940_v4, %v7940_v4 }
  0xe0   : >> { %3818 = vrot.lane.b32.xlu1 %v3796_v26, %s10805_s27  ;;  %s10847_s27 = smov 93   ;;  %v2981_v26 = vcombine.low %v8077_v20, %v8077_v20 }
  0xe1   : >> { %v8096_v31 = vrot.slane %v2189_v25, %v7862_v35 }
  0xe2   : >> { %v8099_v32 = vrot.slane %v2981_v26, %v7862_v35 }
  0xe3   : >> { %3388 = vrot.lane.b32.xlu0 %v3371_v33, %s10898_s26  ;;  %v2475_v33 = vld [vmem:[#allocation2] sm:$0x7f] }
  0xe4   : >> { %3890 = vrot.lane.b32.xlu1 %v3868_v34, %s10907_s25  ;;  %v2115_v34 = vld [vmem:[#allocation2] sm:$0x7f]  ;;  %v2477_v46 = vcombine.low %v2475_v33, %v2475_v33 }
  0xe5   : >> { %v2117_v49 = vcombine.low %v2115_v34, %v2115_v34  ;;  %v467_v33 = vld [vmem:[#allocation2] sm:$0x3f]  ;;  %v1772_v34 = vcombine.low %v7950_v9, %v7950_v9 }
  0xe6   : >> { %v8116_v59 = vrot.slane %v2477_v46, %v7862_v35 }
  0xe7   : >> { %3460 = vrot.lane.b32.xlu0 %v3443_v39, %s10801_s28  ;;  %s10858_s28 = smov 81   ;;  %v2219_v39 = vrot.slane %v8096_v31, %v7862_v35  ;;  %v1780_v9 = vrot.slane %v1772_v34, %v7862_v35 }
  0xe8   : >> { %3242 = vrot.lane.b32.xlu1 %v3220_v40, %s10803_s29  ;;  %s10913_s29 = smov 86   ;;  %v3004_v40 = vrot.slane %v8099_v32, %v7862_v35  ;;  %v2507_v62 = vrot.slane %v8116_v59, %v7862_v35 }
  0xeb   : >> { %3676 = vrot.lane.b32.xlu0 %v3659_v50, %s10858_s28  ;;  %v2291_v50 = vrot.slane %v2276_v36, %v7862_v35  ;;  %v963_v36 = vcombine.high %v7942_v5, %v7942_v5 }
  0xec   : >> { %3314 = vrot.lane.b32.xlu1 %v3292_v53, %s10913_s29  ;;  %v8119_v53 = vrot.slane %v2117_v49, %v7862_v35  ;;  %v476_v49 = vrot.slane %v467_v33, %v7862_v35 }
  0xed   : >> { %v977_v5 = vrot.slane %v963_v36, %v7862_v35  ;;  %v3644_v36 = vcombine.low %v8020_v41, %v8020_v41  ;;  %v2996_v41 = vcombine.high %v8099_v32, %v8099_v32 }
  0xee   : >> { %v2140_v3 = vrot.slane %v8119_v53, %v7862_v35  ;;  %6693 = vst.sshfl [vmem:[#allocation3] sm:$0x5 pattern:$0x75316420] %v476_v49 }
  0xef   : >> { %2596 = vrot.lane.b32.xlu0 %v2579_v44, %s10807_s10  ;;  %s10892_s10 = smov 82   ;;  %v1447_v44 = vcombine.high %v7922_v60, %v7922_v60 }
  0xf0   : >> { %3530 = vrot.lane.b32.xlu1 %v3508_v47, %s10809_s11  ;;  %s10849_s11 = smov 89   ;;  %v2348_v47 = vcombine.low %v7930_v63, %v7930_v63  ;;  %v8136_v63 = vrot.slane %v1613_v7, %v7862_v35  ;;  %v1069_v7 = vcombine.low %v1067_v54, %v1067_v54  ;;  %v3068_v54 = vcombine.low %v8072_v15, %v8072_v15 }
  0xf2   : >> { %v2356_v60 = vrot.slane %v2348_v47, %v7862_v35  ;;  %v1643_v21 = vrot.slane %v8136_v63, %v7862_v35  ;;  %v3860_v47 = vcombine.high %v7995_v28, %v7995_v28 }
  0xf3   : >> { %2812 = vrot.lane.b32.xlu0 %v2795_v8, %s10847_s27  ;;  %v2405_v8 = vcombine.low %v2403_v57, %v2403_v57  ;;  %v469_v57 = vcombine.high %v467_v33, %v467_v33 }
  0xf4   : >> { %3602 = vrot.lane.b32.xlu1 %v3580_v11, %s10892_s10  ;;  %v1461_v11 = vrot.slane %v1447_v44, %v7862_v35  ;;  %v1023_v44 = vcombine.low %v7960_v13, %v7960_v13  ;;  %v11118_v13 = vmov 0 }
  0xf5   : >> { %v8139_v12 = vrot.slane %v2405_v8, %v7862_v35  ;;  %v484_v8 = vcombine.high %v476_v49, %v476_v49  ;;  %v11119_v13 = vsel %vm8195_vm4, 4294967295, %v11118_v13 }
  0xf6   : >> { %11120 = vst [vmem:[#allocation11_spill] sm:$0xff] %v11119_v13  ;;  %v7618_v13 = vld [vmem:[#allocation2] sm:$0x7f] }
  0xf7   : >> { %2884 = vrot.lane.b32.xlu0 %v2867_v48, %s10811_s12  ;;  %s10851_s12 = smov 94   ;;  %v1551_v48 = vld [vmem:[#allocation2] sm:$0x3f]  ;;  %v2428_v22 = vrot.slane %v8139_v12, %v7862_v35  ;;  %v2420_v15 = vcombine.high %v8139_v12, %v8139_v12 }
  0xf8   : >> { %2666 = vrot.lane.b32.xlu1 %v2644_v51, %s10813_s13  ;;  %s10829_s13 = smov 101   ;;  %v1700_v51 = vcombine.high %v7932_v0, %v7932_v0  ;;  %v1515_v0 = vrot.slane %v1507_v19, %v7862_v35  ;;  %6694 = vst.sshfl [vmem:[#allocation3 + $0x8] sm:$0x5 pattern:$0x75316420] %v484_v8  ;;  %v8207_v19 = vrot.slane %v1069_v7, %v7862_v35 }
  0xf9   : >> { %v2435_v8 = vrot.slane %v2420_v15, %v7862_v35 }
  0xfa   : >> { %v1715_v25 = vrot.slane %v1700_v51, %v7862_v35  ;;  %v3875_v51 = vrot.slane %v3860_v47, %v7862_v35 }
  0xfb   : >> { %3100 = vrot.lane.b32.xlu0 %v3083_v23, %s10849_s11  ;;  %v1901_v23 = vcombine.low %v1899_v14, %v1899_v14 }
  0xfc   : >> { %2738 = vrot.lane.b32.xlu1 %v2716_v24, %s10851_s12  ;;  %v1553_v24 = vcombine.low %v1551_v48, %v1551_v48  ;;  %v1031_v48 = vrot.slane %v1023_v44, %v7862_v35  ;;  %v3076_v44 = vrot.slane %v3068_v54, %v7862_v35 }
  0xfd   : >> { %v8156_v4 = vrot.slane %v1901_v23, %v7862_v35 }
  0xfe   : >> { %v8159_v26 = vrot.slane %v1553_v24, %v7862_v35  ;;  %v1091_v24 = vrot.slane %v8207_v19, %v7862_v35 }
  0xff   : >> { %2020 = vrot.lane.b32.xlu0 %v2003_v52, %s10815_s14  ;;  %s10845_s14 = smov 90   ;;  %v1827_v52 = vld [vmem:[#allocation2] sm:$0x7f]  ;;  %v1931_v37 = vrot.slane %v8156_v4, %v7862_v35 }
 0x100   : >> { %2954 = vrot.lane.b32.xlu1 %v2932_v55, %s10817_s15  ;;  %s10825_s15 = smov 97   ;;  %v1127_v55 = vld [vmem:[#allocation2] sm:$0x3f] }
 0x101   : >> { %v1129_v46 = vcombine.low %v1127_v55, %v1127_v55 }
 0x103   : >> { %2236 = vrot.lane.b32.xlu0 %v2219_v39, %s10829_s13  ;;  %s11116_s13 = smov 111   ;;  %v1575_v39 = vrot.slane %v8159_v26, %v7862_v35 }
 0x104   : >> { %3026 = vrot.lane.b32.xlu1 %v3004_v40, %s10845_s14  ;;  %v1829_v40 = vcombine.low %v1827_v52, %v1827_v52 }
 0x107   : >> { %2308 = vrot.lane.b32.xlu0 %v2291_v50, %s10819_s16  ;;  %s10835_s16 = smov 102   ;;  %v8177_v50 = vrot.slane %v1829_v40, %v7862_v35 }
 0x108   : >> { %2090 = vrot.lane.b32.xlu1 %v2068_v56, %s10821_s18  ;;  %s11114_s18 = smov 112   ;;  %v8180_v56 = vrot.slane %v1129_v46, %v7862_v35  ;;  %v2780_v46 = vcombine.low %v8048_v58, %v8048_v58  ;;  %v2132_v58 = vcombine.high %v8119_v53, %v8119_v53 }
 0x10a   : >> { %v2147_v47 = vrot.slane %v2132_v58, %v7862_v35 }
 0x10b   : >> { %2524 = vrot.lane.b32.xlu0 %v2507_v62, %s10825_s15  ;;  %s10833_s15 = smov 98   ;;  %v1852_v62 = vrot.slane %v8177_v50, %v7862_v35 }
 0x10c   : >> { %2162 = vrot.lane.b32.xlu1 %v2140_v3, %s10835_s16  ;;  %s11117_s16 = smov 120   ;;  %v1159_v3 = vrot.slane %v8180_v56, %v7862_v35 }
 0x10f   : >> { %1471 = vrot.lane.b32.xlu0 %v1461_v11, %s11114_s18  ;;  %v483_v11 = vrot.slane %v469_v57, %v7862_v35 }
 0x110   : >> { %2378 = vrot.lane.b32.xlu1 %v2356_v60, %s10827_s22  ;;  %s11115_s22 = smov 108  }
 0x111   : >> { %v505_v28 = vrot.slane %v483_v11, %v7862_v35  ;;  %v2492_v11 = vcombine.low %v8116_v59, %v8116_v59  ;;  %v1844_v59 = vcombine.high %v8177_v50, %v8177_v50  ;;  %v1309_v50 = vld [vmem:[#allocation2] sm:$0x3f] }
 0x113   : >> { %1660 = vrot.lane.b32.xlu0 %v1643_v21, %s10831_s24  ;;  %s10839_s24 = smov 105   ;;  %v3284_v21 = vcombine.high %v8023_v42, %v8023_v42  ;;  %514 = vst.msk [vmem:[#allocation3 + $0x10] sm:$0x11] %vm8195_vm4, %v505_v28  ;;  %v3572_v42 = vcombine.high %v8051_v61, %v8051_v61 }
 0x114   : >> { %2450 = vrot.lane.b32.xlu1 %v2428_v22, %s10833_s15  ;;  %s10855_s15 = smov 110  }
 0x115   : >> { %v3587_v34 = vrot.slane %v3572_v42, %v7862_v35  ;;  %v1916_v42 = vcombine.low %v8156_v4, %v8156_v4 }
 0x117   : >> { %1732 = vrot.lane.b32.xlu0 %v1715_v25, %s11115_s22  ;;  %v3299_v25 = vrot.slane %v3284_v21, %v7862_v35  ;;  %v1628_v21 = vcombine.low %v8136_v63, %v8136_v63  ;;  %v1084_v63 = vcombine.high %v8207_v19, %v8207_v19  ;;  %v1924_v4 = vrot.slane %v1916_v42, %v7862_v35 }
 0x118   : >> { %1530 = vrot.lane.b32.xlu1 %v1515_v0, %s11116_s13  ;;  %v3356_v0 = vcombine.low %v7992_v27, %v7992_v27  ;;  %v2708_v27 = vcombine.high %v8075_v16, %v8075_v16 }
 0x119   : >> { %v1098_v19 = vrot.slane %v1084_v63, %v7862_v35 }
 0x11a   : >> { %v3364_v33 = vrot.slane %v3356_v0, %v7862_v35  ;;  %v2723_v40 = vrot.slane %v2708_v27, %v7862_v35  ;;  %v1859_v0 = vrot.slane %v1844_v59, %v7862_v35 }
 0x11b   : >> { %1948 = vrot.lane.b32.xlu0 %v1931_v37, %s10839_s24  ;;  %s10841_s24 = smov 117  }
 0x11c   : >> { %1590 = vrot.lane.b32.xlu1 %v1575_v39, %s10855_s15  ;;  %v3652_v39 = vrot.slane %v3644_v36, %v7862_v35  ;;  %v1205_v36 = vcombine.high %v7952_v10, %v7952_v10 }
 0x11f   : >> { %987 = vrot.lane.b32.xlu0 %v977_v5, %s11117_s16  ;;  %v3011_v5 = vrot.slane %v2996_v41, %v7862_v35  ;;  %v1369_v41 = vld [vmem:[#allocation2] sm:$0x3f] }
 0x120   : >> { %1802 = vrot.lane.b32.xlu1 %v1780_v9, %s10837_s23  ;;  %s10853_s23 = smov 106   ;;  %v2788_v9 = vrot.slane %v2780_v46, %v7862_v35  ;;  %v1311_v46 = vcombine.low %v1309_v50, %v1309_v50 }
 0x122   : >> { %v1318_v58 = vrot.slane %v1311_v46, %v7862_v35 }
 0x123   : >> { %1169 = vrot.lane.b32.xlu0 %v1159_v3, %s10841_s24  ;;  %s10856_s24 = smov 118  }
 0x124   : >> { %1874 = vrot.lane.b32.xlu1 %v1852_v62, %s10853_s23  ;;  %v2204_v62 = vcombine.low %v8096_v31, %v8096_v31  ;;  %v1568_v31 = vcombine.high %v8159_v26, %v8159_v26 }
 0x125   : >> { %v8200_v60 = vpop.permute.xlu0 %3746 }
 0x126   : >> { %v8202_v14 = vpop.permute.xlu1 %3170  ;;  %v2212_v7 = vrot.slane %v2204_v62, %v7862_v35 }
 0x127   : >> { %3892 = vrot.lane.b32.xlu0 %v3875_v51, %s10907_s25  ;;  %v1582_v51 = vrot.slane %v1568_v31, %v7862_v35 }
 0x128   : >> { %1046 = vrot.lane.b32.xlu1 %v1031_v48, %s10843_s19  ;;  %s11125_s19 = smov 102   ;;  %v2500_v48 = vrot.slane %v2492_v11, %v7862_v35 }
 0x129   : >> { %v8215_v22 = vpop.permute.xlu0 %3820 }
 0x12a   : >> { %v8217_v23 = vpop.permute.xlu1 %3458  ;;  %v10894_v42 = vrot.slane %v8215_v22, 4 }
 0x12b   : >> { %3316 = vrot.lane.b32.xlu0 %v3299_v25, %s10913_s29  ;;  %v1636_v25 = vrot.slane %v1628_v21, %v7862_v35  ;;  %v1326_v21 = vcombine.high %v1318_v58, %v1318_v58 }
 0x12c   : >> { %1106 = vrot.lane.b32.xlu1 %v1091_v24, %s10856_s24 }
 0x12d   : >> { %v8228_v52 = vpop.permute.xlu0 %3244 }
 0x12e   : >> { %11121 = vst [vmem:[#allocation12_spill] sm:$0xff] %v8228_v52  ;;  %v8230_v55 = vpop.permute.xlu1 %2594 }
 0x12f   : >> { %3604 = vrot.lane.b32.xlu0 %v3587_v34, %s10892_s10  ;;  %v1144_v34 = vcombine.low %v8180_v56, %v8180_v56  ;;  %s11146_s10 = smov 80  }
 0x130   : >> { %3386 = vrot.lane.b32.xlu1 %v3364_v33, %s10898_s26  ;;  %v8310_v33 = vld [vmem:[#allocation2] sm:$0x3f]  ;;  %s11147_s26 = smov 88  }
 0x131   : >> { %v8240_v61 = vpop.permute.xlu0 %3532  ;;  %v1152_v10 = vrot.slane %v1144_v34, %v7862_v35 }
 0x132   : >> { %11122 = vst [vmem:[#allocation13_spill] sm:$0xff] %v8240_v61  ;;  %v8242_v37 = vpop.permute.xlu1 %2882 }
 0x133   : >> { %2740 = vrot.lane.b32.xlu0 %v2723_v40, %s10851_s12  ;;  %s11132_s12 = smov 109   ;;  %v1257_v40 = vrot.slane %v8310_v33, %v7862_v35 }
 0x134   : >> { %3674 = vrot.lane.b32.xlu1 %v3652_v39, %s10858_s28  ;;  %s10860_s28 = smov 115  }
 0x135   : >> { %v8252_v16 = vpop.permute.xlu0 %2668  ;;  %v1265_v54 = vcombine.low %v1257_v40, %v1257_v40 }
 0x136   : >> { %11123 = vst [vmem:[#allocation14_spill] sm:$0xff] %v8252_v16  ;;  %v8254_v49 = vpop.permute.xlu1 %2018 }
 0x137   : >> { %3028 = vrot.lane.b32.xlu0 %v3011_v5, %s10845_s14  ;;  %s11127_s14 = smov 101   ;;  %v1219_v5 = vrot.slane %v1205_v36, %v7862_v35 }
 0x138   : >> { %2810 = vrot.lane.b32.xlu1 %v2788_v9, %s10847_s27  ;;  %s11128_s27 = smov 98  }
 0x139   : >> { %v8264_v32 = vpop.permute.xlu0 %2956 }
 0x13a   : >> { %11124 = vst [vmem:[#allocation15_spill] sm:$0xff] %v8264_v32  ;;  %v8266_v57 = vpop.permute.xlu1 %2306 }
 0x13b   : >> { %2164 = vrot.lane.b32.xlu0 %v2147_v47, %s11125_s19  ;;  %v3754_v47 = vrot.slane %v8200_v60, 4 }
 0x13c   : >> { %3098 = vrot.lane.b32.xlu1 %v3076_v44, %s10849_s11  ;;  %s11130_s11 = smov 97   ;;  %v1371_v44 = vcombine.low %v1369_v41, %v1369_v41 }
 0x13d   : >> { %v8276_v53 = vpop.permute.xlu0 %2092 }
 0x13e   : >> { %11126 = vst [vmem:[#allocation16_spill] sm:$0xff] %v8276_v53  ;;  %v8278_v3 = vpop.permute.xlu1 %1469  ;;  %v1378_v59 = vrot.slane %v1371_v44, %v7862_v35  ;;  %v641_v44 = vld [vmem:[#allocation2] sm:$0x3f] }
 0x13f   : >> { %2452 = vrot.lane.b32.xlu0 %v2435_v8, %s11128_s27  ;;  %v8343_v8 = vld [vmem:[#allocation2] sm:$0x3f] }
 0x140   : >> { %2234 = vrot.lane.b32.xlu1 %v2212_v7, %s11127_s14  ;;  %v1280_v7 = vrot.slane %v1257_v40, %v7862_v35 }
 0x141   : >> { %v8288_v12 = vpop.permute.xlu0 %2380 }
 0x142   : >> { %11129 = vst [vmem:[#allocation17_spill] sm:$0xff] %v8288_v12  ;;  %v8290_v28 = vpop.permute.xlu1 %1730 }
 0x143   : >> { %1592 = vrot.lane.b32.xlu0 %v1582_v51, %s10855_s15  ;;  %s11136_s15 = smov 117   ;;  %v1273_v51 = vrot.slane %v1265_v54, %v7862_v35  ;;  %v1386_v54 = vcombine.low %v1378_v59, %v1378_v59 }
 0x144   : >> { %2522 = vrot.lane.b32.xlu1 %v2500_v48, %s11130_s11 }
 0x145   : >> { %v8300_v26 = vpop.permute.xlu0 %1532 }
 0x146   : >> { %11131 = vst [vmem:[#allocation18_spill] sm:$0xff] %v8300_v26  ;;  %v8302_v24 = vpop.permute.xlu1 %985 }
 0x147   : >> { %1876 = vrot.lane.b32.xlu0 %v1859_v0, %s10853_s23  ;;  %s11134_s23 = smov 105   ;;  %v3178_v0 = vrot.slane %v8202_v14, 4 }
 0x148   : >> { %1658 = vrot.lane.b32.xlu1 %v1636_v25, %s11132_s12  ;;  %v579_v25 = vld [vmem:[#allocation2] sm:$0x3f] }
 0x149   : >> { %v8318_v27 = vpop.permute.xlu0 %1804 }
 0x14a   : >> { %11133 = vst [vmem:[#allocation19_spill] sm:$0xff] %v8318_v27  ;;  %v8320_v39 = vpop.permute.xlu1 %1227 }
 0x14b   : >> { %1108 = vrot.lane.b32.xlu0 %v1098_v19, %s10856_s24  ;;  %s11137_s24 = smov 116   ;;  %v581_v19 = vcombine.low %v579_v25, %v579_v25 }
 0x14c   : >> { %1946 = vrot.lane.b32.xlu1 %v1924_v4, %s11134_s23  ;;  %v1333_v4 = vrot.slane %v1318_v58, %v7862_v35 }
 0x14d   : >> { %v8329_v56 = vpop.permute.xlu0 %1048 }
 0x14e   : >> { %11135 = vst [vmem:[#allocation20_spill] sm:$0xff] %v8329_v56  ;;  %v8331_v9 = vpop.permute.xlu1 %3748 }
 0x14f   : >> { %v10883_v62 = vrot.slane %v8331_v9, 4  ;;  %1229 = vrot.lane.b32.xlu0 %v1219_v5, %s11137_s24  ;;  %v1340_v5 = vrot.slane %v1326_v21, %v7862_v35  ;;  %v10875_v21 = vrot.slane %v8228_v52, 4  ;;  %v8723_v52 = vld [vmem:[#allocation2] sm:$0x3f] }
 0x150   : >> { %1167 = vrot.lane.b32.xlu1 %v1152_v10, %s11136_s15 }
 0x151   : >> { %v3758_v15 = vsel %vm564_vm6, %v3754_v47, %v10883_v62  ;;  %v8347_v31 = vpop.permute.xlu0 %3172 }
 0x152   : >> { %v3760_v11 = vsel %vm3759_vm8, %v8200_v60, %v3758_v15  ;;  %11138 = vst [vmem:[#allocation21_spill] sm:$0xff] %v8347_v31  ;;  %v3819_v48 = vpop.permute.xlu1 %3818  ;;  %v10882_v63 = vrot.slane %v8347_v31, 4  ;;  %v524_v60 = vrot.slane %v8343_v8, %v7862_v35  ;;  %v1394_v15 = vrot.slane %v1386_v54, %v7862_v35 }
 0x153   : >> { %3768 = vst [vmem:[#allocation3 + $0x120] sm:$0x11] %v3760_v11  ;;  %v3826_v50 = vrot.slane %v3819_v48, 4  ;;  %1290 = vrot.lane.b32.xlu0 %v1280_v7, %s10860_s28  ;;  %v1401_v7 = vrot.slane %v1378_v59, %v7862_v35 }
 0x154   : >> { %1288 = vrot.lane.b32.xlu1 %v1273_v51, %s10860_s28  ;;  %v3182_v34 = vsel %vm564_vm6, %v3178_v0, %v10882_v63  ;;  %s10862_s28 = smov 114   ;;  %v532_v11 = vcombine.low %v524_v60, %v524_v60  ;;  %v3466_v51 = vrot.slane %v8217_v23, 4 }
 0x155   : >> { %v3830_v36 = vsel %vm564_vm6, %v3826_v50, %v10894_v42  ;;  %v3184_v40 = vsel %vm11078_vm10, %v8202_v14, %v3182_v34  ;;  %v8368_v41 = vpop.permute.xlu0 %3388  ;;  %v643_v14 = vcombine.low %v641_v44, %v641_v44  ;;  %v547_v34 = vrot.slane %v524_v60, %v7862_v35  ;;  %v7678_v44 = vld.sshfl [vmem:[#allocation2] sm:$0x5f pattern:$0x73625140] }
 0x156   : >> { %v3832_v46 = vsel %vm3831_vm11, %v3819_v48, %v3830_v36  ;;  %11139 = vst [vmem:[#allocation22_spill] sm:$0xff] %v8368_v41  ;;  %v8370_v10 = vpop.permute.xlu1 %3890  ;;  %3192 = vst [vmem:[#allocation3 + $0xf0] sm:$0x11] %v3184_v40  ;;  %v588_v48 = vrot.slane %v581_v19, %v7862_v35  ;;  %v721_v1 = vcombine.high %v7678_v44, %v7678_v44 }
 0x157   : >> { %3840 = vst [vmem:[#allocation3 + $0x120] sm:$0x22] %v3832_v46  ;;  %1350 = vrot.lane.b32.xlu0 %v1340_v5, %s10862_s28  ;;  %v650_v36 = vrot.slane %v643_v14, %v7862_v35  ;;  %v540_v5 = vrot.slane %v532_v11, %v7862_v35  ;;  %v2602_v11 = vrot.slane %v8230_v55, 4 }
 0x158   : >> { %1348 = vrot.lane.b32.xlu1 %v1333_v4, %s10862_s28  ;;  %s10864_s28 = smov 113   ;;  %v596_v54 = vcombine.high %v588_v48, %v588_v48 }
 0x159   : >> { %v8375_v58 = vpop.permute.xlu0 %3460  ;;  %v658_v60 = vcombine.low %v650_v36, %v650_v36 }
 0x15a   : >> { %11140 = vst [vmem:[#allocation23_spill] sm:$0xff] %v8375_v58  ;;  %v3243_v47 = vpop.permute.xlu1 %3242  ;;  %v10874_v25 = vrot.slane %v8375_v58, 4 }
 0x15b   : >> { %v3250_v0 = vrot.slane %v3243_v47, 4  ;;  %1411 = vrot.lane.b32.xlu0 %v1401_v7, %s10864_s28  ;;  %v8407_v7 = vld [vmem:[#allocation2] sm:$0x3f] }
 0x15c   : >> { %1409 = vrot.lane.b32.xlu1 %v1394_v15, %s10864_s28  ;;  %v3470_v50 = vsel %vm564_vm6, %v3466_v51, %v10874_v25  ;;  %s10865_s28 = smov 127   ;;  %v603_v15 = vrot.slane %v588_v48, %v7862_v35  ;;  %v10873_v51 = vrot.slane %v8240_v61, 4  ;;  %v8657_v61 = vld.sshfl [vmem:[#allocation2] sm:$0x7f pattern:$0x73625140] }
 0x15d   : >> { %v3254_v59 = vsel %vm564_vm6, %v3250_v0, %v10875_v21  ;;  %v3472_v4 = vsel %vm11052_vm12, %v8217_v23, %v3470_v50  ;;  %v8396_v40 = vpop.permute.xlu0 %3676  ;;  %11164 = vst [vmem:[#allocation37_spill] sm:$0xff] %v8657_v61 }
 0x15e   : >> { %v3256_v19 = vsel %vm11077_vm13, %v3243_v47, %v3254_v59  ;;  %v8398_v46 = vpop.permute.xlu1 %3314  ;;  %3480 = vst [vmem:[#allocation3 + $0x108] sm:$0x11] %v3472_v4  ;;  %v610_v47 = vrot.slane %v596_v54, %v7862_v35  ;;  %v825_v59 = vld [vmem:[#allocation2] sm:$0x3f] }
 0x15f   : >> { %3264 = vst [vmem:[#allocation3 + $0xf0] sm:$0x22] %v3256_v19  ;;  %557 = vrot.lane.b32.xlu0 %v547_v34, %s10865_s28  ;;  %v673_v34 = vrot.slane %v650_v36, %v7862_v35  ;;  %v666_v19 = vrot.slane %v658_v60, %v7862_v35 }
 0x160   : >> { %555 = vrot.lane.b32.xlu1 %v540_v5, %s10865_s28  ;;  %s10869_s28 = smov 126   ;;  %v773_v5 = vrot.slane %v8407_v7, %v7862_v35 }
 0x161   : >> { %v8403_v23 = vpop.permute.xlu0 %2596 }
 0x162   : >> { %11141 = vst [vmem:[#allocation24_spill] sm:$0xff] %v8403_v23  ;;  %v3531_v14 = vpop.permute.xlu1 %3530  ;;  %v10868_v0 = vrot.slane %v8403_v23, 4 }
 0x163   : >> { %v3538_v50 = vrot.slane %v3531_v14, 4  ;;  %620 = vrot.lane.b32.xlu0 %v610_v47, %s10869_s28 }
 0x164   : >> { %618 = vrot.lane.b32.xlu1 %v603_v15, %s10869_s28  ;;  %v2606_v48 = vsel %vm564_vm6, %v2602_v11, %v10868_v0  ;;  %v827_v11 = vcombine.low %v825_v59, %v825_v59  ;;  %v885_v0 = vld [vmem:[#allocation2] sm:$0x3f]  ;;  %s10871_s28 = smov 125  }
 0x165   : >> { %v3542_v4 = vsel %vm564_vm6, %v3538_v50, %v10873_v51  ;;  %v2608_v54 = vsel %vm10994_vm14, %v8230_v55, %v2606_v48  ;;  %v8427_v15 = vpop.permute.xlu0 %2812  ;;  %v887_v60 = vcombine.low %v885_v0, %v885_v0  ;;  %v735_v50 = vrot.slane %v721_v1, %v7862_v35 }
 0x166   : >> { %v3544_v47 = vsel %vm10995_vm15, %v3531_v14, %v3542_v4  ;;  %v8429_v36 = vpop.permute.xlu1 %3602  ;;  %2616 = vst [vmem:[#allocation3 + $0xc0] sm:$0x11] %v2608_v54  ;;  %v728_v48 = vrot.slane %v7678_v44, %v7862_v35  ;;  %v781_v4 = vcombine.low %v773_v5, %v773_v5  ;;  %v834_v59 = vrot.slane %v827_v11, %v7862_v35 }
 0x167   : >> { %3552 = vst [vmem:[#allocation3 + $0x108] sm:$0x22] %v3544_v47  ;;  %683 = vrot.lane.b32.xlu0 %v673_v34, %s10871_s28  ;;  %v2890_v54 = vrot.slane %v8242_v37, 4  ;;  %v10879_v47 = vrot.slane %v8252_v16, 4  ;;  %v3773_v0 = vcombine.high %v7868_v38, %v7868_v38  ;;  %v796_v11 = vrot.slane %v773_v5, %v7862_v35  ;;  %v7612_v5 = vld [vmem:[#allocation2] sm:$0x7f] }
 0x168   : >> { %681 = vrot.lane.b32.xlu1 %v666_v19, %s10871_s28  ;;  %s10876_s28 = smov 124   ;;  %v894_v51 = vrot.slane %v887_v60, %v7862_v35  ;;  %v789_v21 = vrot.slane %v781_v4, %v7862_v35  ;;  %v3701_v60 = vcombine.high %v7612_v5, %v7612_v5  ;;  %v7613_v5 = vld [vmem:[#allocation2] sm:$0x7f]  ;;  %vm11000_vm14 = vcmask 760832  }
 0x169   : >> { %v8433_v55 = vpop.permute.xlu0 %2884  ;;  %v7624_v16 = vld [vmem:[#allocation2] sm:$0x7f]  ;;  %vm10999_vm15 = vcmask 736256  }
 0x16a   : >> { %11142 = vst [vmem:[#allocation25_spill] sm:$0xff] %v8433_v55  ;;  %v2667_v14 = vpop.permute.xlu1 %2666  ;;  %v10878_v34 = vrot.slane %v8433_v55, 4  ;;  %v1757_v23 = vcombine.high %v7624_v16, %v7624_v16 }
 0x16b   : >> { %v2674_v19 = vrot.slane %v2667_v14, 4  ;;  %745 = vrot.lane.b32.xlu0 %v735_v50, %s10876_s28 }
 0x16c   : >> { %743 = vrot.lane.b32.xlu1 %v728_v48, %s10876_s28  ;;  %v2894_v1 = vsel %vm564_vm6, %v2890_v54, %v10878_v34  ;;  %v842_v54 = vcombine.high %v834_v59, %v834_v59  ;;  %s10880_s28 = smov 123   ;;  %v7614_v34 = vld [vmem:[#allocation2] sm:$0x7f] }
 0x16d   : >> { %v2678_v44 = vsel %vm564_vm6, %v2674_v19, %v10879_v47  ;;  %v2896_v38 = vsel %vm10984_vm0, %v8242_v37, %v2894_v1  ;;  %v8456_v50 = vpop.permute.xlu0 %3100  ;;  %v8464_v37 = vrot.slane %v3773_v0, %v7862_v35  ;;  %v849_v1 = vrot.slane %v834_v59, %v7862_v35 }
 0x16e   : >> { %v2680_v25 = vsel %vm10985_vm1, %v2667_v14, %v2678_v44  ;;  %v8458_v48 = vpop.permute.xlu1 %2738  ;;  %2904 = vst [vmem:[#allocation3 + $0xd8] sm:$0x11] %v2896_v38  ;;  %v856_v4 = vrot.slane %v842_v54, %v7862_v35  ;;  %v2026_v44 = vrot.slane %v8254_v49, 4  ;;  %v3125_v0 = vcombine.high %v7613_v5, %v7613_v5 }
 0x16f   : >> { %2688 = vst [vmem:[#allocation3 + $0xc0] sm:$0x22] %v2680_v25  ;;  %806 = vrot.lane.b32.xlu0 %v796_v11, %s10880_s28  ;;  %v902_v25 = vcombine.low %v894_v51, %v894_v51  ;;  %v10889_v11 = vrot.slane %v8264_v32, 4  ;;  %v3197_v47 = vcombine.high %v7614_v34, %v7614_v34  ;;  %v3789_v63 = vcombine.low %v8464_v37, %v8464_v37 }
 0x170   : >> { %804 = vrot.lane.b32.xlu1 %v789_v21, %s10880_s28  ;;  %s10885_s28 = smov 122   ;;  %v8484_v5 = vrot.slane %v3701_v60, %v7862_v35  ;;  %v8498_v60 = vrot.slane %v3125_v0, %v7862_v35  ;;  %v10902_v0 = vrot.slane %v8276_v53, 4  ;;  %v8570_v53 = vrot.slane %v8027_v45, %v7862_v35 }
 0x171   : >> { %v8466_v14 = vpop.permute.xlu0 %2020  ;;  %v8613_v32 = vrot.slane %v8025_v43, %v7862_v35  ;;  %vm10996_vm0 = vcmask 769024   ;;  %vm11072_vm1 = vcmask 1042432  }
 0x172   : >> { %11143 = vst [vmem:[#allocation26_spill] sm:$0xff] %v8466_v14  ;;  %v2955_v19 = vpop.permute.xlu1 %2954  ;;  %v10884_v21 = vrot.slane %v8466_v14, 4  ;;  %v10917_v14 = vmov 0  }
 0x173   : >> { %v2962_v38 = vrot.slane %v2955_v19, 4  ;;  %866 = vrot.lane.b32.xlu0 %v856_v4, %s10885_s28  ;;  %4245 = vmatprep.mubr.bf16.mxu0 %v10917_v14  ;;  %11155 = vst [vmem:[#allocation32_spill] sm:$0xff] %v8613_v32 }
 0x174   : >> { %864 = vrot.lane.b32.xlu1 %v849_v1, %s10885_s28  ;;  %v2030_v59 = vsel %vm564_vm6, %v2026_v44, %v10884_v21  ;;  %v917_v44 = vrot.slane %v894_v51, %v7862_v35  ;;  %v910_v21 = vrot.slane %v902_v25, %v7862_v35  ;;  %s10890_s28 = smov 121   ;;  %v3738_v25 = vrot.slane %v8484_v5, %v7862_v35 }
 0x175   : >> { %v2966_v54 = vsel %vm564_vm6, %v2962_v38, %v10889_v11  ;;  %v2032_v34 = vsel %vm10975_vm2, %v8254_v49, %v2030_v59  ;;  %v8489_v1 = vpop.permute.xlu0 %2236  ;;  %v8501_v49 = vrot.slane %v3197_v47, %v7862_v35  ;;  %v8510_v59 = vrot.slane %v7972_v18, %v7862_v35  ;;  %7331 = vset.pattern.permute.xlu1 %v10917_v14 }
 0x176   : >> { %v2968_v4 = vsel %vm10982_vm3, %v2955_v19, %v2966_v54  ;;  %v8491_v62 = vpop.permute.xlu1 %3026  ;;  %2040 = vst [vmem:[#allocation3 + $0x90] sm:$0x11] %v2032_v34  ;;  %v3810_v19 = vrot.slane %v3789_v63, %v7862_v35  ;;  %v7615_v63 = vld [vmem:[#allocation2] sm:$0x7f]  ;;  %v8517_v11 = vrot.slane %v7970_v17, %v7862_v35  ;;  %7332 = vset.pattern.permute.xlu0 %v10917_v14  ;;  %vm11007_vm2 = vcmask 670720  }
 0x177   : >> { %2976 = vst [vmem:[#allocation3 + $0xd8] sm:$0x22] %v2968_v4  ;;  %927 = vrot.lane.b32.xlu0 %v917_v44, %s10890_s28  ;;  %v3413_v34 = vcombine.high %v7615_v63, %v7615_v63  ;;  %v7616_v4 = vld [vmem:[#allocation2] sm:$0x7f]  ;;  %v3162_v63 = vrot.slane %v8498_v60, %v7862_v35  ;;  %vm10997_vm3 = vcmask 662528  }
 0x178   : >> { %925 = vrot.lane.b32.xlu1 %v910_v21, %s10890_s28  ;;  %v2314_v21 = vrot.slane %v8266_v57, 4  ;;  %v3485_v44 = vcombine.high %v7616_v4, %v7616_v4  ;;  %s11145_s28 = smov 79   ;;  %v8531_v4 = vrot.slane %v7999_v30, %v7862_v35  ;;  %v7619_v14 = vld [vmem:[#allocation2] sm:$0x7f] }
 0x179   : >> { %v8504_v38 = vpop.permute.xlu0 %2308 }
 0x17a   : >> { %11144 = vst [vmem:[#allocation27_spill] sm:$0xff] %v8504_v38  ;;  %v2091_v51 = vpop.permute.xlu1 %2090  ;;  %v10897_v47 = vrot.slane %v8504_v38, 4  ;;  %v8564_v38 = vrot.slane %v7997_v29, %v7862_v35 }
 0x17b   : >> { %v2098_v54 = vrot.slane %v2091_v51, 4  ;;  %3822 = vrot.lane.b32.xlu0 %v3810_v19, %s11145_s28 }
 0x17c   : >> { %3750 = vrot.lane.b32.xlu1 %v3738_v25, %s11146_s10  ;;  %v2318_v18 = vsel %vm564_vm6, %v2314_v21, %v10897_v47  ;;  %v3882_v21 = vrot.slane %v8510_v59, %v7862_v35  ;;  %v7617_v47 = vld [vmem:[#allocation2] sm:$0x7f]  ;;  %11149 = vst [vmem:[#allocation29_spill] sm:$0xff] %v8564_v38 }
 0x17d   : >> { %v2102_v42 = vsel %vm564_vm6, %v2098_v54, %v10902_v0  ;;  %v2320_v17 = vsel %vm10901_vm9, %v8266_v57, %v2318_v18  ;;  %v8536_v25 = vpop.permute.xlu0 %2524  ;;  %v3213_v54 = vcombine.low %v8501_v49, %v8501_v49  ;;  %v2549_v30 = vcombine.high %v7617_v47, %v7617_v47 }
 0x17e   : >> { %v2104_v19 = vsel %vm10971_vm5, %v2091_v51, %v2102_v42  ;;  %v8538_v6 = vpop.permute.xlu1 %2162  ;;  %2328 = vst [vmem:[#allocation3 + $0xa8] sm:$0x11] %v2320_v17  ;;  %v8547_v57 = vrot.slane %v3485_v44, %v7862_v35  ;;  %v3306_v42 = vrot.slane %v8531_v4, %v7862_v35  ;;  %v8552_v51 = vrot.slane %v3413_v34, %v7862_v35 }
 0x17f   : >> { %2112 = vst [vmem:[#allocation3 + $0x90] sm:$0x22] %v2104_v19  ;;  %3174 = vrot.lane.b32.xlu0 %v3162_v63, %s11147_s26  ;;  %v3357_v18 = vcombine.low %v8517_v11, %v8517_v11  ;;  %v1475_v17 = vrot.slane %v8278_v3, 4  ;;  %vm10915_vm9 = vcmask 809984   ;;  %v3234_v19 = vrot.slane %v3213_v54, %v7862_v35 }
 0x180   : >> { %3894 = vrot.lane.b32.xlu1 %v3882_v21, %s10907_s25  ;;  %v10916_v44 = vrot.slane %v8288_v12, 4  ;;  %v2621_v34 = vcombine.high %v7618_v13, %v7618_v13  ;;  %s11150_s25 = smov 87   ;;  %v3501_v29 = vcombine.low %v8547_v57, %v8547_v57  ;;  %vm11076_vm5 = vcmask 703488  }
 0x181   : >> { %v8557_v47 = vpop.permute.xlu0 %1471 }
 0x182   : >> { %11148 = vst [vmem:[#allocation28_spill] sm:$0xff] %v8557_v47  ;;  %v2379_v63 = vpop.permute.xlu1 %2378  ;;  %v10912_v21 = vrot.slane %v8557_v47, 4  ;;  %v7620_v47 = vld [vmem:[#allocation2] sm:$0x7f] }
 0x183   : >> { %v2386_v0 = vrot.slane %v2379_v63, 4  ;;  %3318 = vrot.lane.b32.xlu0 %v3306_v42, %s10913_s29  ;;  %s11151_s29 = smov 84   ;;  %v2909_v12 = vcombine.high %v7620_v47, %v7620_v47  ;;  %v8627_v47 = vrot.slane %v8053_v2, %v7862_v35 }
 0x184   : >> { %3246 = vrot.lane.b32.xlu1 %v3234_v19, %s11150_s25  ;;  %v1478_v54 = vsel %vm564_vm6, %v1475_v17, %v10912_v21  ;;  %v3378_v21 = vrot.slane %v3357_v18, %v7862_v35 }
 0x185   : >> { %v2390_v13 = vsel %vm564_vm6, %v2386_v0, %v10916_v44  ;;  %v1480_v45 = vsel %vm10914_vm7, %v8278_v3, %v1478_v54  ;;  %v8585_v19 = vpop.permute.xlu0 %1660  ;;  %v3450_v0 = vrot.slane %v8552_v51, %v7862_v35  ;;  %v8596_v3 = vrot.slane %v2621_v34, %v7862_v35  ;;  %11158 = vst [vmem:[#allocation33_spill] sm:$0xff] %v8627_v47 }
 0x186   : >> { %v2392_v42 = vsel %vm10915_vm9, %v2379_v63, %v2390_v13  ;;  %v8587_v17 = vpop.permute.xlu1 %2450  ;;  %1487 = vst [vmem:[#allocation3 + $0x60] sm:$0x11] %v1480_v45  ;;  %v3594_v63 = vrot.slane %v8570_v53, %v7862_v35  ;;  %v8601_v54 = vrot.slane %v2549_v30, %v7862_v35  ;;  %vm10932_vm7 = vcmask 883712  }
 0x187   : >> { %2400 = vst [vmem:[#allocation3 + $0xa8] sm:$0x22] %v2392_v42  ;;  %3462 = vrot.lane.b32.xlu0 %v3450_v0, %s11151_s29  ;;  %11153 = vst [vmem:[#allocation30_spill] sm:$0xff] %v8596_v3  ;;  %vm10933_vm9 = vcmask 908288   ;;  %v3522_v45 = vrot.slane %v3501_v29, %v7862_v35  ;;  %v3645_v42 = vcombine.low %v8564_v38, %v8564_v38  ;;  %v10930_v34 = vrot.slane %v8300_v26, 4 }
 0x188   : >> { %3390 = vrot.lane.b32.xlu1 %v3378_v21, %s11152_s0  ;;  %v1738_v21 = vrot.slane %v8290_v28, 4  ;;  %v2837_v30 = vcombine.high %v7619_v14, %v7619_v14  ;;  %v2586_v14 = vrot.slane %v8601_v54, %v7862_v35  ;;  %v8642_v2 = vrot.slane %v2909_v12, %v7862_v35 }
 0x189   : >> { %v8603_v13 = vpop.permute.xlu0 %1732  ;;  %v991_v12 = vrot.slane %v8302_v24, 4 }
 0x18a   : >> { %11154 = vst [vmem:[#allocation31_spill] sm:$0xff] %v8603_v13  ;;  %v1531_v18 = vpop.permute.xlu1 %1530  ;;  %v10929_v0 = vrot.slane %v8603_v13, 4  ;;  %11161 = vst [vmem:[#allocation34_spill] sm:$0xff] %v8642_v2  ;;  %v2925_v16 = vcombine.low %v8642_v2, %v8642_v2 }
 0x18b   : >> { %v1536_v44 = vrot.slane %v1531_v18, 4  ;;  %3606 = vrot.lane.b32.xlu0 %v3594_v63, %s11156_s9 }
 0x18c   : >> { %3534 = vrot.lane.b32.xlu1 %v3522_v45, %s11157_s20  ;;  %v1742_v29 = vsel %vm564_vm6, %v1738_v21, %v10929_v0  ;;  %v3666_v21 = vrot.slane %v3645_v42, %v7862_v35  ;;  %v7621_v0 = vld [vmem:[#allocation2] sm:$0x7f]  ;;  %v2781_v42 = vcombine.low %v8613_v32, %v8613_v32  ;;  %v8669_v32 = vrot.slane %v8077_v20, %v7862_v35 }
 0x18d   : >> { %v1539_v55 = vsel %vm564_vm6, %v1536_v44, %v10930_v34  ;;  %v1744_v43 = vsel %vm10932_vm7, %v8290_v28, %v1742_v29  ;;  %v8632_v45 = vpop.permute.xlu0 %1948  ;;  %v2637_v44 = vcombine.low %v8596_v3, %v8596_v3  ;;  %v1973_v34 = vcombine.high %v7621_v0, %v7621_v0  ;;  %v7622_v28 = vld [vmem:[#allocation2] sm:$0x7f] }
 0x18e   : >> { %v1541_v63 = vsel %vm10933_vm9, %v1531_v18, %v1539_v55  ;;  %v8634_v13 = vpop.permute.xlu1 %1590  ;;  %1752 = vst [vmem:[#allocation3 + $0x78] sm:$0x11] %v1744_v43  ;;  %v2045_v55 = vcombine.high %v7622_v28, %v7622_v28  ;;  %v8645_v18 = vrot.slane %v2837_v30, %v7862_v35  ;;  %vm10956_vm7 = vcmask 875520   ;;  %v7623_v28 = vld [vmem:[#allocation2] sm:$0x7f]  ;;  %11167 = vst [vmem:[#allocation38_spill] sm:$0xff] %v8669_v32 }
 0x18f   : >> { %1548 = vst [vmem:[#allocation3 + $0x60] sm:$0x22] %v1541_v63  ;;  %2598 = vrot.lane.b32.xlu0 %v2586_v14, %s11159_s30  ;;  %vm10955_vm9 = vcmask 982016   ;;  %v2730_v0 = vrot.slane %v8627_v47, %v7862_v35  ;;  %v2658_v14 = vrot.slane %v2637_v44, %v7862_v35  ;;  %v10950_v63 = vrot.slane %v8318_v27, 4 }
 0x190   : >> { %3678 = vrot.lane.b32.xlu1 %v3666_v21, %s11160_s17  ;;  %11162 = vst [vmem:[#allocation35_spill] sm:$0xff] %v8645_v18  ;;  %v2333_v26 = vcombine.high %v7623_v28, %v7623_v28  ;;  %v8731_v3 = vld.sshfl [vmem:[#allocation2] sm:$0x7f pattern:$0x73625140] }
 0x191   : >> { %v8649_v43 = vpop.permute.xlu0 %987  ;;  %11173 = vst [vmem:[#allocation42_spill] sm:$0xff] %v8731_v3 }
 0x192   : >> { %v1803_v29 = vpop.permute.xlu1 %1802  ;;  %11163 = vst [vmem:[#allocation36_spill] sm:$0xff] %v8649_v43  ;;  %v10949_v30 = vrot.slane %v8649_v43, 4  ;;  %v8686_v43 = vld [vmem:[#allocation2] sm:$0x3f] }
 0x193   : >> { %v1810_v21 = vrot.slane %v1803_v29, 4  ;;  %2742 = vrot.lane.b32.xlu0 %v2730_v0, %s11165_s21 }
 0x194   : >> { %2670 = vrot.lane.b32.xlu1 %v2658_v14, %s11166_s6  ;;  %v994_v58 = vsel %vm564_vm6, %v991_v12, %v10949_v30  ;;  %v2802_v12 = vrot.slane %v2781_v42, %v7862_v35  ;;  %v7626_v30 = vld [vmem:[#allocation2] sm:$0x7f]  ;;  %v2946_v42 = vrot.slane %v2925_v16, %v7862_v35 }
 0x195   : >> { %v1814_v44 = vsel %vm564_vm6, %v1810_v21, %v10950_v63  ;;  %v996_v0 = vsel %vm10955_vm9, %v8302_v24, %v994_v58  ;;  %v8678_v27 = vpop.permute.xlu0 %1169  ;;  %v2874_v21 = vrot.slane %v8645_v18, %v7862_v35  ;;  %v2261_v20 = vcombine.high %v7626_v30, %v7626_v30  ;;  %v8693_v58 = vld [vmem:[#allocation2] sm:$0x7f] }
 0x196   : >> { %v1816_v28 = vsel %vm10956_vm7, %v1803_v29, %v1814_v44  ;;  %v8676_v14 = vpop.permute.xlu1 %1874  ;;  %v8684_v63 = vrot.slane %v2045_v55, %v7862_v35  ;;  %1003 = vst [vmem:[#allocation3 + $0x30] sm:$0x11] %v996_v0  ;;  %v8691_v24 = vrot.slane %v2333_v26, %v7862_v35  ;;  %v8697_v44 = vld [vmem:[#allocation2] sm:$0x3f]  ;;  %v3018_v0 = vrot.slane %v8669_v32, %v7862_v35 }
 0x197   : >> { %1824 = vst [vmem:[#allocation3 + $0x78] sm:$0x22] %v1816_v28  ;;  %2886 = vrot.lane.b32.xlu0 %v2874_v21, %s11170_s5  ;;  %v8703_v30 = vld [vmem:[#allocation2] sm:$0x3f]  ;;  %v8708_v28 = vrot.slane %v1757_v23, %v7862_v35  ;;  %vm10974_vm9 = vcmask 973824   ;;  %vm3903_vm7 = vcmask 637952   ;;  %v8716_v21 = vrot.slane %v1973_v34, %v7862_v35 }
 0x198   : >> { %11168 = vst [vmem:[#allocation39_spill] sm:$0xff] %v8684_v63  ;;  %11169 = vst [vmem:[#allocation40_spill] sm:$0xff] %v8691_v24  ;;  %2814 = vrot.lane.b32.xlu1 %v2802_v12, %s11171_s8  ;;  %v3069_v12 = vcombine.low %v8657_v61, %v8657_v61  ;;  %v10970_v26 = vrot.slane %v8329_v56, 4  ;;  %v3898_v23 = vrot.slane %v8370_v10, 4  ;;  %v8727_v18 = vld [vmem:[#allocation2] sm:$0x3f]  ;;  %v2061_v47 = vcombine.low %v8684_v63, %v8684_v63 }
 0x199   : >> { %v8713_v55 = vpop.permute.xlu0 %3892  ;;  %11172 = vst [vmem:[#allocation41_spill] sm:$0xff] %v8716_v21  ;;  %v8741_v16 = vld.sshfl [vmem:[#allocation2] sm:$0x7f pattern:$0x73625140]  ;;  %v10992_v63 = vrot.slane %v8368_v41, 4 }
 0x19a   : >> { %v1047_v29 = vpop.permute.xlu1 %1046  ;;  %v11176_v61 = vrot.slane %v8713_v55, 4  ;;  %11177 = vst [vmem:[#allocation43_spill] sm:$0xff] %v8741_v16 }
 0x19b   : >> { %v1052_v2 = vrot.slane %v1047_v29, 4  ;;  %3030 = vrot.lane.b32.xlu0 %v3018_v0, %s11174_s4 }
 0x19c   : >> { %2958 = vrot.lane.b32.xlu1 %v2946_v42, %s11175_s3  ;;  %v3902_v31 = vsel %vm564_vm6, %v3898_v23, %v11176_v61  ;;  %v8755_v61 = vld.sshfl [vmem:[#allocation2] sm:$0x7f pattern:$0x73625140]  ;;  %v3322_v23 = vrot.slane %v8398_v46, 4 }
 0x19d   : >> { %v1055_v32 = vsel %vm564_vm6, %v1052_v2, %v10970_v26  ;;  %v3904_v0 = vsel %vm3903_vm7, %v8370_v10, %v3902_v31  ;;  %v8750_v42 = vpop.permute.xlu0 %3316  ;;  %v2010_v2 = vrot.slane %v8716_v21, %v7862_v35  ;;  %v3090_v26 = vrot.slane %v3069_v12, %v7862_v35  ;;  %v8768_v12 = vld.sshfl [vmem:[#allocation2] sm:$0x7f pattern:$0x73625140] }
 0x19e   : >> { %v1057_v34 = vsel %vm10974_vm9, %v1047_v29, %v1055_v32  ;;  %v8748_v38 = vpop.permute.xlu1 %1106  ;;  %3912 = vst [vmem:[#allocation3 + $0x120] sm:$0x44] %v3904_v0  ;;  %v10980_v32 = vrot.slane %v8750_v42, 4  ;;  %v8762_v31 = vrot.slane %v2261_v20, %v7862_v35  ;;  %v2205_v10 = vcombine.low %v8731_v3, %v8731_v3 }
 0x19f   : >> { %1064 = vst [vmem:[#allocation3 + $0x30] sm:$0x22] %v1057_v34  ;;  %2022 = vrot.lane.b32.xlu0 %v2010_v2, %s11178_s7  ;;  %v8766_v29 = vld.sshfl [vmem:[#allocation2] sm:$0x7f pattern:$0x73625140]  ;;  %v2154_v0 = vrot.slane %v8741_v16, %v7862_v35  ;;  %v2082_v3 = vrot.slane %v2061_v47, %v7862_v35 }
 0x1a0   : >> { %3102 = vrot.lane.b32.xlu1 %v3090_v26, %s11179_s2  ;;  %11180 = vst [vmem:[#allocation44_spill] sm:$0xff] %v8762_v31  ;;  %11181 = vst [vmem:[#allocation45_spill] sm:$0xff] %v8766_v29  ;;  %v3326_v34 = vsel %vm564_vm6, %v3322_v23, %v10980_v32  ;;  %v2349_v26 = vcombine.low %v8691_v24, %v8691_v24  ;;  %vm11053_vm9 = vcmask 695296   ;;  %v3610_v23 = vrot.slane %v8429_v36, 4  ;;  %s11182_s7 = smov 103  }
 0x1a1   : >> { %v3328_v20 = vsel %vm11076_vm5, %v8398_v46, %v3326_v34  ;;  %v8779_v56 = vpop.permute.xlu0 %3604  ;;  %v2298_v46 = vrot.slane %v8762_v31, %v7862_v35  ;;  %v2226_v34 = vrot.slane %v2205_v10, %v7862_v35  ;;  %v2442_v47 = vrot.slane %v8766_v29, %v7862_v35 }
 0x1a2   : >> { %v3387_v2 = vpop.permute.xlu1 %3386  ;;  %3336 = vst [vmem:[#allocation3 + $0xf0] sm:$0x44] %v3328_v20  ;;  %v10991_v16 = vrot.slane %v8779_v56, 4 }
 0x1a3   : >> { %v3394_v32 = vrot.slane %v3387_v2, 4  ;;  %2166 = vrot.lane.b32.xlu0 %v2154_v0, %s11125_s19  ;;  %v2746_v0 = vrot.slane %v8458_v48, 4  ;;  %s11183_s19 = smov 100  }
 0x1a4   : >> { %2094 = vrot.lane.b32.xlu1 %v2082_v3, %s11182_s7  ;;  %v3614_v24 = vsel %vm564_vm6, %v3610_v23, %v10991_v16  ;;  %v11006_v3 = vrot.slane %v8396_v40, 4 }
 0x1a5   : >> { %v3398_v20 = vsel %vm564_vm6, %v3394_v32, %v10992_v63  ;;  %v3616_v10 = vsel %vm11007_vm2, %v8429_v36, %v3614_v24  ;;  %v8803_v21 = vpop.permute.xlu0 %2740  ;;  %v3955_v41 = vld [vmem:[#allocation3 + $0x120] sm:$0x77]  ;;  %v11184_v36 = vcombine.high %v8686_v43, %v8686_v43  ;;  %v11185_v43 = vcombine.high %v8697_v44, %v8697_v44 }
 0x1a6   : >> { %v3400_v31 = vsel %vm11053_vm9, %v3387_v2, %v3398_v20  ;;  %v3675_v29 = vpop.permute.xlu1 %3674  ;;  %3624 = vst [vmem:[#allocation3 + $0x108] sm:$0x44] %v3616_v10  ;;  %v10998_v23 = vrot.slane %v8803_v21, 4  ;;  %v6734_v16 = vcombine.high %v3955_v41, %v3955_v41  ;;  %v6733_v63 = vcombine.low %v3955_v41, %v3955_v41 }
 0x1a7   : >> { %3408 = vst [vmem:[#allocation3 + $0xf0] sm:$0x88] %v3400_v31  ;;  %v3682_v32 = vrot.slane %v3675_v29, 4  ;;  %2310 = vrot.lane.b32.xlu0 %v2298_v46, %s11183_s19  ;;  %v2370_v2 = vrot.slane %v2349_v26, %v7862_v35  ;;  %v1446_v24 = vrot.slane %v11184_v36, %v7862_v35  ;;  %v2493_v31 = vcombine.low %v8755_v61, %v8755_v61  ;;  %s11186_s19 = smov 99  }
 0x1a8   : >> { %2238 = vrot.lane.b32.xlu1 %v2226_v34, %s11127_s14  ;;  %v2750_v41 = vsel %vm564_vm6, %v2746_v0, %v10998_v23  ;;  %6739 = vmatprep.subr.msk.bf16.mxu0 %vm11072_vm1, %v6734_v16  ;;  %v4196_v26 = vsel %vm11072_vm1, %v6733_v63, 0  ;;  %v1506_v46 = vrot.slane %v11185_v43, %v7862_v35  ;;  %v11002_v16 = vrot.slane %v8427_v15, 4  ;;  %v8835_v43 = vld.sshfl [vmem:[#allocation2] sm:$0x7f pattern:$0x73625140] }
 0x1a9   : >> { %v3686_v20 = vsel %vm564_vm6, %v3682_v32, %v11006_v3  ;;  %v2752_v10 = vsel %vm10996_vm0, %v8458_v48, %v2750_v41  ;;  %4216 = vmatpush1.bf16.msra.mxu0 %v4196_v26  ;;  %v8830_v36 = vpop.permute.xlu0 %3028  ;;  %v3034_v63 = vrot.slane %v8491_v62, 4  ;;  %v1468_v48 = vrot.slane %v1446_v24, %v7862_v35 }
 0x1aa   : >> { %v3688_v34 = vsel %vm10997_vm3, %v3675_v29, %v3686_v20  ;;  %v2811_v32 = vpop.permute.xlu1 %2810  ;;  %2760 = vst [vmem:[#allocation3 + $0xc0] sm:$0x44] %v2752_v10  ;;  %v11001_v44 = vrot.slane %v8830_v36, 4  ;;  %v2514_v26 = vrot.slane %v2493_v31, %v7862_v35  ;;  %vm11005_vm0 = vcmask 728064  }
 0x1ab   : >> { %3696 = vst [vmem:[#allocation3 + $0x108] sm:$0x88] %v3688_v34  ;;  %v2818_v0 = vrot.slane %v2811_v32, 4  ;;  %2454 = vrot.lane.b32.xlu0 %v2442_v47, %s11128_s27  ;;  %v1508_v34 = vcombine.low %v1506_v46, %v1506_v46  ;;  %vm11074_vm3 = vcmask 834560   ;;  %v11003_v23 = vrot.slane %v8456_v50, 4 }
 0x1ac   : >> { %2382 = vrot.lane.b32.xlu1 %v2370_v2, %s11186_s19  ;;  %v7686_v29 = vld.sshfl [vmem:[#allocation2] sm:$0x5f pattern:$0x73625140]  ;;  %v3038_v41 = vsel %vm564_vm6, %v3034_v63, %v11001_v44  ;;  %vm11014_vm2 = vcmask 900096  }
 0x1ad   : >> { %v2822_v20 = vsel %vm564_vm6, %v2818_v0, %v11002_v16  ;;  %v3040_v47 = vsel %vm10999_vm15, %v8491_v62, %v3038_v41  ;;  %v8850_v24 = vpop.permute.xlu0 %2164  ;;  %v2170_v0 = vrot.slane %v8538_v6, 4  ;;  %v11187_v62 = vcombine.high %v8693_v58, %v8693_v58 }
 0x1ae   : >> { %v2824_v10 = vsel %vm11000_vm14, %v2811_v32, %v2822_v20  ;;  %v3099_v2 = vpop.permute.xlu1 %3098  ;;  %3048 = vst [vmem:[#allocation3 + $0xd8] sm:$0x44] %v3040_v47  ;;  %v11004_v31 = vrot.slane %v8850_v24, 4  ;;  %v1629_v20 = vcombine.low %v8768_v12, %v8768_v12  ;;  %vm11010_vm15 = vcmask 826368  }
 0x1af   : >> { %2832 = vst [vmem:[#allocation3 + $0xc0] sm:$0x88] %v2824_v10  ;;  %v3106_v63 = vrot.slane %v3099_v2, 4  ;;  %1473 = vrot.lane.b32.xlu0 %v1468_v48, %s11114_s18  ;;  %v8863_v32 = vrot.slane %v11187_v62, %v7862_v35  ;;  %v1589_v48 = vrot.slane %v7686_v29, %v7862_v35  ;;  %vm11009_vm14 = vcmask 801792   ;;  %s11188_s18 = smov 110  }
 0x1b0   : >> { %2526 = vrot.lane.b32.xlu1 %v2514_v26, %s11130_s11  ;;  %v2174_v10 = vsel %vm564_vm6, %v2170_v0, %v11004_v31  ;;  %v1529_v44 = vrot.slane %v1508_v34, %v7862_v35  ;;  %v2458_v0 = vrot.slane %v8587_v17, 4 }
 0x1b1   : >> { %v3110_v41 = vsel %vm564_vm6, %v3106_v63, %v11003_v23  ;;  %v2176_v58 = vsel %vm11074_vm3, %v8538_v6, %v2174_v10  ;;  %v8877_v62 = vpop.permute.xlu0 %2452  ;;  %v11008_v23 = vrot.slane %v8489_v1, 4  ;;  %v1722_v34 = vrot.slane %v8863_v32, %v7862_v35 }
 0x1b2   : >> { %v3112_v26 = vsel %vm11005_vm0, %v3099_v2, %v3110_v41  ;;  %v2235_v47 = vpop.permute.xlu1 %2234  ;;  %v7386_v16 = vld [vmem:[#allocation3 + $0xf4] ss:$24 sps:$4 sm:$0xff]   ;;  %v7388_v63 = vld [vmem:[#allocation3 + $0xf0] ss:$24 sps:$4 sm:$0xff]   ;;  %2184 = vst [vmem:[#allocation3 + $0x90] sm:$0x44] %v2176_v58  ;;  %v1650_v58 = vrot.slane %v1629_v20, %v7862_v35 }
 0x1b3   : >> { %3120 = vst [vmem:[#allocation3 + $0xd8] sm:$0x88] %v3112_v26  ;;  %v2242_v29 = vrot.slane %v2235_v47, 4  ;;  %v11011_v2 = vrot.slane %v8877_v62, 4  ;;  %1594 = vrot.lane.b32.xlu0 %v1589_v48, %s11188_s18  ;;  %4217 = vmatprep.subr.bf16.mxu0 %v7386_v16  ;;  %v1773_v48 = vcombine.low %v8708_v28, %v8708_v28  ;;  %vm11015_vm0 = vcmask 793600   ;;  %s11192_s18 = smov 107  }
 0x1b4   : >> { %1534 = vrot.lane.b32.xlu1 %v1529_v44, %s11116_s13  ;;  %v8889_v41 = vld.sshfl [vmem:[#allocation2] sm:$0x7f pattern:$0x73625140]  ;;  %4218 = vmatpush1.bf16.msra.mxu0 %v7388_v63  ;;  %v1596_v16 = vrot.slane %v8634_v13, 4  ;;  %s11191_s13 = smov 106  }
 0x1b5   : >> { %v2246_v10 = vsel %vm564_vm6, %v2242_v29, %v11008_v23  ;;  %v2462_v26 = vsel %vm564_vm6, %v2458_v0, %v11011_v2  ;;  %v8903_v29 = vpop.permute.xlu0 %1592  ;;  %v11012_v23 = vrot.slane %v8536_v25, 4 }
 0x1b6   : >> { %v2248_v44 = vsel %vm11010_vm15, %v2235_v47, %v2246_v10  ;;  %v2464_v31 = vsel %vm11009_vm14, %v8587_v17, %v2462_v26  ;;  %v2523_v3 = vpop.permute.xlu1 %2522  ;;  %v11013_v0 = vrot.slane %v8903_v29, 4  ;;  %v1866_v17 = vrot.slane %v8889_v41, %v7862_v35 }
 0x1b7   : >> { %2256 = vst [vmem:[#allocation3 + $0x90] sm:$0x88] %v2248_v44  ;;  %2472 = vst [vmem:[#allocation3 + $0xa8] sm:$0x44] %v2464_v31  ;;  %v2530_v20 = vrot.slane %v2523_v3, 4  ;;  %1734 = vrot.lane.b32.xlu0 %v1722_v34, %s11115_s22  ;;  %v11189_v47 = vcombine.high %v8703_v30, %v8703_v30  ;;  %v1917_v10 = vcombine.low %v8835_v43, %v8835_v43  ;;  %vm11018_vm14 = vcmask 891904  }
 0x1b8   : >> { %1662 = vrot.lane.b32.xlu1 %v1650_v58, %s11132_s12  ;;  %v1599_v34 = vsel %vm564_vm6, %v1596_v16, %v11013_v0  ;;  %v11190_v26 = vcombine.high %v8727_v18, %v8727_v18  ;;  %vm11017_vm15 = vcmask 867328   ;;  %v11016_v16 = vrot.slane %v8585_v19, 4 }
 0x1b9   : >> { %v962_v63 = vrot.slane %v11189_v47, %v7862_v35  ;;  %v2534_v31 = vsel %vm564_vm6, %v2530_v20, %v11012_v23  ;;  %v1601_v44 = vsel %vm11014_vm2, %v8634_v13, %v1599_v34  ;;  %v8931_v2 = vpop.permute.xlu0 %1876  ;;  %v1794_v20 = vrot.slane %v1773_v48, %v7862_v35  ;;  %v7689_v34 = vld.sshfl [vmem:[#allocation2] sm:$0x5f pattern:$0x73625140] }
 0x1ba   : >> { %v1022_v58 = vrot.slane %v11190_v26, %v7862_v35  ;;  %v2536_v30 = vsel %vm11015_vm0, %v2523_v3, %v2534_v31  ;;  %v1659_v47 = vpop.permute.xlu1 %1658  ;;  %v7389_v23 = vld [vmem:[#allocation3 + $0xc4] ss:$24 sps:$4 sm:$0xff]   ;;  %v7391_v6 = vld [vmem:[#allocation3 + $0xc0] ss:$24 sps:$4 sm:$0xff]   ;;  %v1882_v0 = vrot.slane %v8676_v14, 4  ;;  %v11062_v3 = vrot.slane %v8931_v2, 4 }
 0x1bb   : >> { %2544 = vst [vmem:[#allocation3 + $0xa8] sm:$0x88] %v2536_v30  ;;  %1608 = vst [vmem:[#allocation3 + $0x60] sm:$0x44] %v1601_v44  ;;  %v1666_v18 = vrot.slane %v1659_v47, 4  ;;  %1878 = vrot.lane.b32.xlu0 %v1866_v17, %s11191_s13  ;;  %v984_v13 = vrot.slane %v962_v63, %v7862_v35  ;;  %4219 = vmatprep.subr.bf16.mxu0 %v7389_v23  ;;  %v1938_v30 = vrot.slane %v1917_v10, %v7862_v35  ;;  %vm11095_vm2 = vcmask 859136  }
 0x1bc   : >> { %1806 = vrot.lane.b32.xlu1 %v1794_v20, %s11192_s18  ;;  %v7688_v31 = vld.sshfl [vmem:[#allocation2] sm:$0x5f pattern:$0x73625140]  ;;  %v1886_v26 = vsel %vm564_vm6, %v1882_v0, %v11062_v3  ;;  %v1024_v44 = vcombine.low %v1022_v58, %v1022_v58  ;;  %4220 = vmatpush1.bf16.msra.mxu0 %v7391_v6  ;;  %vm11023_vm0 = vcmask 965632   ;;  %v11193_v6 = vcombine.high %v8723_v52, %v8723_v52 }
 0x1bd   : >> { %v1670_v48 = vsel %vm564_vm6, %v1666_v18, %v11016_v16  ;;  %v1888_v20 = vsel %vm11017_vm15, %v8676_v14, %v1886_v26  ;;  %v8950_v46 = vpop.permute.xlu0 %1108  ;;  %v11060_v18 = vrot.slane %v8632_v45, 4  ;;  %v1112_v16 = vrot.slane %v8748_v38, 4 }
 0x1be   : >> { %v1672_v17 = vsel %vm11018_vm14, %v1659_v47, %v1670_v48  ;;  %v1947_v63 = vpop.permute.xlu1 %1946  ;;  %1896 = vst [vmem:[#allocation3 + $0x78] sm:$0x44] %v1888_v20  ;;  %v11021_v0 = vrot.slane %v8950_v46, 4  ;;  %v1105_v14 = vrot.slane %v7688_v31, %v7862_v35  ;;  %v1204_v10 = vrot.slane %v11193_v6, %v7862_v35 }
 0x1bf   : >> { %1680 = vst [vmem:[#allocation3 + $0x60] sm:$0x88] %v1672_v17  ;;  %v1954_v23 = vrot.slane %v1947_v63, 4  ;;  %989 = vrot.lane.b32.xlu0 %v984_v13, %s11117_s16  ;;  %v1145_v58 = vcombine.low %v7689_v34, %v7689_v34  ;;  %vm11024_vm15 = vcmask 957440   ;;  %v11194_v13 = vcombine.high %v8310_v33, %v8310_v33  ;;  %s11195_s16 = smov 118  }
 0x1c0   : >> { %1950 = vrot.lane.b32.xlu1 %v1938_v30, %s11134_s23  ;;  %v1115_v48 = vsel %vm564_vm6, %v1112_v16, %v11021_v0  ;;  %vm1237_vm14 = vcmask 949248   ;;  %v1045_v17 = vrot.slane %v1024_v44, %v7862_v35  ;;  %v1233_v16 = vrot.slane %v8320_v39, 4  ;;  %s11196_s23 = smov 119  }
 0x1c1   : >> { %v1958_v47 = vsel %vm564_vm6, %v1954_v23, %v11060_v18  ;;  %v1264_v31 = vrot.slane %v11194_v13, %v7862_v35  ;;  %v1117_v52 = vsel %vm11023_vm0, %v8748_v38, %v1115_v48  ;;  %v8975_v30 = vpop.permute.xlu0 %1229  ;;  %v11022_v6 = vrot.slane %v8678_v27, 4  ;;  %v7691_v13 = vld.sshfl [vmem:[#allocation2] sm:$0x5f pattern:$0x73625140] }
 0x1c2   : >> { %v1960_v26 = vsel %vm11095_vm2, %v1947_v63, %v1958_v47  ;;  %v1168_v34 = vpop.permute.xlu1 %1167  ;;  %v7392_v20 = vld [vmem:[#allocation3 + $0x94] ss:$24 sps:$4 sm:$0xff]   ;;  %v7394_v23 = vld [vmem:[#allocation3 + $0x90] ss:$24 sps:$4 sm:$0xff]   ;;  %1124 = vst [vmem:[#allocation3 + $0x30] sm:$0x44] %v1117_v52  ;;  %v1226_v38 = vrot.slane %v1204_v10, %v7862_v35 }
 0x1c3   : >> { %1968 = vst [vmem:[#allocation3 + $0x78] sm:$0x88] %v1960_v26  ;;  %v1173_v33 = vrot.slane %v1168_v34, 4  ;;  %v11057_v63 = vrot.slane %v8975_v30, 4  ;;  %1110 = vrot.lane.b32.xlu0 %v1105_v14, %s11195_s16  ;;  %4221 = vmatprep.subr.bf16.mxu0 %v7392_v20  ;;  %v11197_v26 = vcombine.high %v8343_v8, %v8343_v8  ;;  %vm11027_vm0 = vcmask 941056   ;;  %s11203_s16 = smov 125  }
 0x1c4   : >> { %1050 = vrot.lane.b32.xlu1 %v1045_v17, %s11196_s23  ;;  %v7690_v47 = vld.sshfl [vmem:[#allocation2] sm:$0x5f pattern:$0x73625140]  ;;  %4222 = vmatpush1.bf16.msra.mxu0 %v7394_v23  ;;  %s11199_s23 = smov 115  }
 0x1c5   : >> { %v1176_v44 = vsel %vm564_vm6, %v1173_v33, %v11022_v6  ;;  %v1236_v48 = vsel %vm564_vm6, %v1233_v16, %v11057_v63  ;;  %v531_v14 = vrot.slane %v11197_v26, %v7862_v35  ;;  %v8997_v0 = vpop.permute.xlu0 %1290  ;;  %v1166_v33 = vrot.slane %v1145_v58, %v7862_v35 }
 0x1c6   : >> { %v1178_v52 = vsel %vm11024_vm15, %v1168_v34, %v1176_v44  ;;  %v1238_v10 = vsel %vm1237_vm14, %v8320_v39, %v1236_v48  ;;  %v1289_v17 = vpop.permute.xlu1 %1288  ;;  %v1266_v6 = vcombine.low %v1264_v31, %v1264_v31  ;;  %v11026_v16 = vrot.slane %v8997_v0, 4 }
 0x1c7   : >> { %1185 = vst [vmem:[#allocation3 + $0x30] sm:$0x88] %v1178_v52  ;;  %1245 = vst [vmem:[#allocation3 + $0x48] sm:$0x11] %v1238_v10  ;;  %v1294_v20 = vrot.slane %v1289_v17, 4  ;;  %1231 = vrot.lane.b32.xlu0 %v1226_v38, %s11137_s24  ;;  %v766_v39 = vcombine.high %v8407_v7, %v8407_v7  ;;  %v1347_v58 = vrot.slane %v7690_v47, %v7862_v35  ;;  %vm11028_vm15 = vcmask 932864  }
 0x1c8   : >> { %1171 = vrot.lane.b32.xlu1 %v1166_v33, %s11136_s15  ;;  %v1387_v31 = vcombine.low %v7691_v13, %v7691_v13  ;;  %v1287_v48 = vrot.slane %v1266_v6, %v7862_v35  ;;  %v533_v52 = vcombine.low %v531_v14, %v531_v14  ;;  %v7692_v10 = vld.sshfl [vmem:[#allocation2] sm:$0x5f pattern:$0x73625140]  ;;  %s11198_s24 = smov 114   ;;  %s11205_s15 = smov 123  }
 0x1c9   : >> { %v1297_v8 = vsel %vm564_vm6, %v1294_v20, %v11026_v16  ;;  %v9010_v44 = vpop.permute.xlu0 %1350  ;;  %v7646_v47 = vld [vmem:[#allocation2] sm:$0x3f]  ;;  %v780_v14 = vrot.slane %v766_v39, %v7862_v35  ;;  %v659_v16 = vcombine.low %v7692_v10, %v7692_v10 }
 0x1ca   : >> { %v1299_v34 = vsel %vm11027_vm0, %v1289_v17, %v1297_v8  ;;  %v1349_v23 = vpop.permute.xlu1 %1348  ;;  %v7395_v38 = vld [vmem:[#allocation3 + $0x64] ss:$24 sps:$4 sm:$0xff]   ;;  %v7397_v26 = vld [vmem:[#allocation3 + $0x60] ss:$24 sps:$4 sm:$0xff]   ;;  %v11055_v33 = vrot.slane %v9010_v44, 4  ;;  %v706_v13 = vcombine.high %v7646_v47, %v7646_v47  ;;  %vm11029_vm0 = vcmask 924672  }
 0x1cb   : >> { %1306 = vst [vmem:[#allocation3 + $0x48] sm:$0x22] %v1299_v34  ;;  %v1354_v7 = vrot.slane %v1349_v23, 4  ;;  %1352 = vrot.lane.b32.xlu0 %v1347_v58, %s11198_s24  ;;  %4223 = vmatprep.subr.bf16.mxu0 %v7395_v38  ;;  %v1408_v58 = vrot.slane %v1387_v31, %v7862_v35  ;;  %s11201_s24 = smov 127   ;;  %v680_v10 = vrot.slane %v659_v16, %v7862_v35 }
 0x1cc   : >> { %1292 = vrot.lane.b32.xlu1 %v1287_v48, %s11199_s23  ;;  %v7693_v6 = vld.sshfl [vmem:[#allocation2] sm:$0x5f pattern:$0x73625140]  ;;  %4224 = vmatpush1.bf16.msra.mxu0 %v7397_v26  ;;  %v554_v48 = vrot.slane %v533_v52, %v7862_v35  ;;  %s11200_s23 = smov 113   ;;  %v720_v31 = vrot.slane %v706_v13, %v7862_v35 }
 0x1cd   : >> { %v1357_v17 = vsel %vm564_vm6, %v1354_v7, %v11055_v33  ;;  %v9021_v34 = vpop.permute.xlu0 %1411 }
 0x1ce   : >> { %v1359_v20 = vsel %vm11028_vm15, %v1349_v23, %v1357_v17  ;;  %v1410_v8 = vpop.permute.xlu1 %1409  ;;  %v11033_v7 = vrot.slane %v9021_v34, 4  ;;  %v617_v23 = vrot.slane %v7693_v6, %v7862_v35  ;;  %v782_v17 = vcombine.low %v780_v14, %v780_v14  ;;  %v7695_v6 = vld.sshfl [vmem:[#allocation2] sm:$0x5f pattern:$0x73625140] }
 0x1cf   : >> { %1366 = vst [vmem:[#allocation3 + $0x48] sm:$0x44] %v1359_v20  ;;  %v1415_v47 = vrot.slane %v1410_v8, 4  ;;  %559 = vrot.lane.b32.xlu0 %v554_v48, %s11201_s24  ;;  %vm11032_vm15 = vcmask 1039360   ;;  %v742_v14 = vrot.slane %v720_v31, %v7862_v35  ;;  %s11204_s24 = smov 124  }
 0x1d0   : >> { %1413 = vrot.lane.b32.xlu1 %v1408_v58, %s11200_s23  ;;  %v7694_v20 = vld.sshfl [vmem:[#allocation2] sm:$0x5f pattern:$0x73625140]  ;;  %s11202_s23 = smov 126  }
 0x1d1   : >> { %v1418_v39 = vsel %vm564_vm6, %v1415_v47, %v11033_v7  ;;  %v9034_v26 = vpop.permute.xlu0 %557 }
 0x1d2   : >> { %v1420_v38 = vsel %vm11029_vm0, %v1410_v8, %v1418_v39  ;;  %v556_v52 = vpop.permute.xlu1 %555  ;;  %v11031_v58 = vrot.slane %v9034_v26, 4  ;;  %v803_v39 = vrot.slane %v782_v17, %v7862_v35  ;;  %vm11034_vm0 = vcmask 1031168  }
 0x1d3   : >> { %1427 = vst [vmem:[#allocation3 + $0x48] sm:$0x88] %v1420_v38  ;;  %v561_v48 = vrot.slane %v556_v52, 4  ;;  %685 = vrot.lane.b32.xlu0 %v680_v10, %s11203_s16  ;;  %v903_v38 = vcombine.low %v7694_v20, %v7694_v20  ;;  %v863_v17 = vrot.slane %v7695_v6, %v7862_v35 }
 0x1d4   : >> { %622 = vrot.lane.b32.xlu1 %v617_v23, %s11202_s23 }
 0x1d5   : >> { %v565_v13 = vsel %vm564_vm6, %v561_v48, %v11031_v58  ;;  %v9044_v47 = vpop.permute.xlu0 %620  ;;  %v924_v20 = vrot.slane %v903_v38, %v7862_v35 }
 0x1d6   : >> { %v567_v8 = vsel %vm11032_vm15, %v556_v52, %v565_v13  ;;  %v619_v16 = vpop.permute.xlu1 %618  ;;  %v11051_v23 = vrot.slane %v9044_v47, 4  ;;  %vm11035_vm15 = vcmask 1022976  }
 0x1d7   : >> { %574 = vst [vmem:[#allocation3] sm:$0x22] %v567_v8  ;;  %v624_v10 = vrot.slane %v619_v16, 4  ;;  %808 = vrot.lane.b32.xlu0 %v803_v39, %s11205_s15  ;;  %s11207_s15 = smov 121  }
 0x1d8   : >> { %747 = vrot.lane.b32.xlu1 %v742_v14, %s11204_s24  ;;  %v3717_v14 = vcombine.high %v8484_v5, %v8484_v5  ;;  %s11206_s24 = smov 122  }
 0x1d9   : >> { %v627_v52 = vsel %vm564_vm6, %v624_v10, %v11051_v23  ;;  %v9055_v13 = vpop.permute.xlu0 %683 }
 0x1da   : >> { %v629_v48 = vsel %vm11034_vm0, %v619_v16, %v627_v52  ;;  %v682_v31 = vpop.permute.xlu1 %681  ;;  %v7398_v8 = vld [vmem:[#allocation3 + $0x34] ss:$24 sps:$4 sm:$0xff]   ;;  %v7400_v58 = vld [vmem:[#allocation3 + $0x30] ss:$24 sps:$4 sm:$0xff]   ;;  %v11050_v39 = vrot.slane %v9055_v13, 4  ;;  %v3817_v16 = vrot.slane %v8464_v37, %v7862_v35  ;;  %v3745_v52 = vrot.slane %v3717_v14, %v7862_v35 }
 0x1db   : >> { %636 = vst [vmem:[#allocation3] sm:$0x44] %v629_v48  ;;  %v687_v7 = vrot.slane %v682_v31, 4  ;;  %929 = vrot.lane.b32.xlu0 %v924_v20, %s11207_s15  ;;  %4225 = vmatprep.subr.bf16.mxu0 %v7398_v8  ;;  %v3861_v48 = vcombine.high %v8510_v59, %v8510_v59  ;;  %vm11036_vm0 = vcmask 1014784   ;;  %v3285_v14 = vcombine.high %v8531_v4, %v8531_v4 }
 0x1dc   : >> { %868 = vrot.lane.b32.xlu1 %v863_v17, %s11206_s24  ;;  %4226 = vmatpush1.bf16.msra.mxu0 %v7400_v58  ;;  %v3141_v17 = vcombine.high %v8498_v60, %v8498_v60  ;;  %v3241_v4 = vrot.slane %v8501_v49, %v7862_v35 }
 0x1dd   : >> { %v690_v6 = vsel %vm564_vm6, %v687_v7, %v11050_v39  ;;  %v9070_v5 = vpop.permute.xlu0 %745  ;;  %v3889_v60 = vrot.slane %v3861_v48, %v7862_v35 }
 0x1de   : >> { %v692_v38 = vsel %vm11035_vm15, %v682_v31, %v690_v6  ;;  %v744_v10 = vpop.permute.xlu1 %743  ;;  %v11048_v7 = vrot.slane %v9070_v5, 4  ;;  %v3169_v8 = vrot.slane %v3141_v17, %v7862_v35  ;;  %vm11037_vm15 = vcmask 1006592  }
 0x1df   : >> { %699 = vst [vmem:[#allocation3] sm:$0x88] %v692_v38  ;;  %v749_v20 = vrot.slane %v744_v10, 4  ;;  %3824 = vrot.lane.b32.xlu0 %v3817_v16, %s11145_s28  ;;  %s11208_s28 = smov 78   ;;  %v3313_v17 = vrot.slane %v3285_v14, %v7862_v35 }
 0x1e0   : >> { %3752 = vrot.lane.b32.xlu1 %v3745_v52, %s11146_s10 }
 0x1e1   : >> { %v752_v37 = vsel %vm564_vm6, %v749_v20, %v11048_v7  ;;  %v9084_v31 = vpop.permute.xlu0 %806  ;;  %v3429_v20 = vcombine.high %v8552_v51, %v8552_v51  ;;  %v3385_v51 = vrot.slane %v8517_v11, %v7862_v35 }
 0x1e2   : >> { %v754_v58 = vsel %vm11036_vm0, %v744_v10, %v752_v37  ;;  %v805_v59 = vpop.permute.xlu1 %804  ;;  %v11046_v6 = vrot.slane %v9084_v31, 4  ;;  %vm874_vm0 = vcmask 998400  }
 0x1e3   : >> { %761 = vst [vmem:[#allocation3 + $0x18] sm:$0x11] %v754_v58  ;;  %v810_v16 = vrot.slane %v805_v59, 4  ;;  %3176 = vrot.lane.b32.xlu0 %v3169_v8, %s11147_s26  ;;  %s11209_s26 = smov 86   ;;  %v3457_v14 = vrot.slane %v3429_v20, %v7862_v35 }
 0x1e4   : >> { %3896 = vrot.lane.b32.xlu1 %v3889_v60, %s11208_s28  ;;  %s7769_s28 = smov 39  }
 0x1e5   : >> { %v813_v38 = vsel %vm564_vm6, %v810_v16, %v11046_v6  ;;  %v9097_v52 = vpop.permute.xlu0 %866  ;;  %v3573_v16 = vcombine.high %v8570_v53, %v8570_v53  ;;  %v3529_v53 = vrot.slane %v8547_v57, %v7862_v35 }
 0x1e6   : >> { %v815_v10 = vsel %vm11037_vm15, %v805_v59, %v813_v38  ;;  %v865_v48 = vpop.permute.xlu1 %864  ;;  %v11042_v37 = vrot.slane %v9097_v52, 4  ;;  %vm935_vm15 = vcmask 990208  }
 0x1e7   : >> { %822 = vst [vmem:[#allocation3 + $0x18] sm:$0x22] %v815_v10  ;;  %v870_v58 = vrot.slane %v865_v48, 4  ;;  %3320 = vrot.lane.b32.xlu0 %v3313_v17, %s11209_s26  ;;  %v3601_v20 = vrot.slane %v3573_v16, %v7862_v35  ;;  %s7770_s26 = smov 71  }
 0x1e8   : >> { %3248 = vrot.lane.b32.xlu1 %v3241_v4, %s11150_s25 }
 0x1e9   : >> { %v873_v59 = vsel %vm564_vm6, %v870_v58, %v11042_v37  ;;  %v9111_v60 = vpop.permute.xlu0 %927  ;;  %v2565_v58 = vcombine.high %v8601_v54, %v8601_v54  ;;  %v11218_v37 = vld [vmem:[#allocation35_spill] sm:$0xff] }
 0x1ea   : >> { %v875_v49 = vsel %vm874_vm0, %v865_v48, %v873_v59  ;;  %v926_v8 = vpop.permute.xlu1 %925  ;;  %v11041_v38 = vrot.slane %v9111_v60, 4 }
 0x1eb   : >> { %882 = vst [vmem:[#allocation3 + $0x18] sm:$0x44] %v875_v49  ;;  %v931_v10 = vrot.slane %v926_v8, 4  ;;  %3464 = vrot.lane.b32.xlu0 %v3457_v14, %s11151_s29  ;;  %v11212_v14 = vld [vmem:[#allocation29_spill] sm:$0xff] }
 0x1ec   : >> { %3392 = vrot.lane.b32.xlu1 %v3385_v51, %s11152_s0  ;;  %v11211_v51 = vrot.slane %v8331_v9, 4  ;;  %v3673_v16 = vrot.slane %v11212_v14, %v7862_v35  ;;  %s11451_s0 = smov 127  }
 0x1ed   : >> { %v934_v48 = vsel %vm564_vm6, %v931_v10, %v11041_v38  ;;  %v9125_v4 = vpop.permute.xlu0 %3822 }
 0x1ee   : >> { %v936_v11 = vsel %vm935_vm15, %v926_v8, %v934_v48  ;;  %v9127_v17 = vpop.permute.xlu1 %3750  ;;  %v11038_v59 = vrot.slane %v9125_v4, 4  ;;  %v11210_v8 = vrot.slane %v8215_v22, 4 }
 0x1ef   : >> { %943 = vst [vmem:[#allocation3 + $0x18] sm:$0x88] %v936_v11  ;;  %v11039_v49 = vrot.slane %v9127_v17, 4  ;;  %3608 = vrot.lane.b32.xlu0 %v3601_v20, %s11156_s9  ;;  %v2593_v20 = vrot.slane %v2565_v58, %v7862_v35  ;;  %v11216_v58 = vrot.slane %v8713_v55, 4  ;;  %s11276_s9 = smov 105  }
 0x1f0   : >> { %3536 = vrot.lane.b32.xlu1 %v3529_v53, %s11157_s20  ;;  %v3833_v57 = vsel %vm564_vm6, %v11210_v8, %v11038_v59  ;;  %v11213_v8 = vld [vmem:[#allocation33_spill] sm:$0xff]  ;;  %s11280_s20 = sld [smem:[#allocation47_spill]] }
 0x1f1   : >> { %v3761_v54 = vsel %vm564_vm6, %v11211_v51, %v11039_v49  ;;  %v3834_v10 = vsel %vm3831_vm11, %v8215_v22, %v3833_v57  ;;  %v9154_v11 = vpop.permute.xlu0 %3174  ;;  %v2709_v59 = vcombine.high %v11213_v8, %v11213_v8  ;;  %v11214_v22 = vld [vmem:[#allocation21_spill] sm:$0xff] }
 0x1f2   : >> { %v3762_v48 = vsel %vm3759_vm8, %v8331_v9, %v3761_v54  ;;  %v9156_v53 = vpop.permute.xlu1 %3894  ;;  %3841 = vst [vmem:[#allocation3 + $0x128] sm:$0x22] %v3834_v10  ;;  %v11040_v51 = vrot.slane %v9154_v11, 4  ;;  %v11215_v9 = vrot.slane %v11214_v22, 4  ;;  %v11217_v10 = vld [vmem:[#allocation30_spill] sm:$0xff] }
 0x1f3   : >> { %3769 = vst [vmem:[#allocation3 + $0x128] sm:$0x11] %v3762_v48  ;;  %v11044_v14 = vrot.slane %v9156_v53, 4  ;;  %2600 = vrot.lane.b32.xlu0 %v2593_v20, %s11159_s30  ;;  %v2665_v48 = vrot.slane %v11217_v10, %v7862_v35 }
 0x1f4   : >> { %3680 = vrot.lane.b32.xlu1 %v3673_v16, %s11160_s17  ;;  %v3185_v57 = vsel %vm564_vm6, %v11215_v9, %v11040_v51  ;;  %v2737_v9 = vrot.slane %v2709_v59, %v7862_v35 }
 0x1f5   : >> { %v3905_v54 = vsel %vm564_vm6, %v11216_v58, %v11044_v14  ;;  %v3186_v16 = vsel %vm11078_vm10, %v11214_v22, %v3185_v57  ;;  %v9181_v8 = vpop.permute.xlu0 %3318  ;;  %v2853_v58 = vcombine.high %v11218_v37, %v11218_v37  ;;  %v11220_v57 = vld [vmem:[#allocation12_spill] sm:$0xff]  ;;  %vm11298_vm10 = vcmask 1041409  }
 0x1f6   : >> { %v3906_v20 = vsel %vm3903_vm7, %v8713_v55, %v3905_v54  ;;  %v9183_v49 = vpop.permute.xlu1 %3246  ;;  %v7402_v51 = vld [vmem:[#allocation3 + $0x4] ss:$24 sps:$4 sm:$0xff]   ;;  %v7404_v38 = vld [vmem:[#allocation3] ss:$24 sps:$4 sm:$0xff]   ;;  %3193 = vst [vmem:[#allocation3 + $0xf8] sm:$0x11] %v3186_v16 }
 0x1f7   : >> { %3913 = vst [vmem:[#allocation3 + $0x128] sm:$0x44] %v3906_v20  ;;  %v11043_v10 = vrot.slane %v9181_v8, 4  ;;  %v11045_v22 = vrot.slane %v9183_v49, 4  ;;  %2744 = vrot.lane.b32.xlu0 %v2737_v9, %s11165_s21  ;;  %v11219_v55 = vrot.slane %v8750_v42, 4  ;;  %v11221_v37 = vrot.slane %v11220_v57, 4  ;;  %4227 = vmatprep.subr.bf16.mxu0 %v7402_v51 }
 0x1f8   : >> { %2672 = vrot.lane.b32.xlu1 %v2665_v48, %s11166_s6  ;;  %v11222_v16 = vld [vmem:[#allocation32_spill] sm:$0xff]  ;;  %v9207_v48 = vld [vmem:[%s10780_s1] sm:$0xff]   ;;  %4228 = vmatpush1.bf16.msra.mxu0 %v7404_v38  ;;  %v2881_v51 = vrot.slane %v2853_v58, %v7862_v35  ;;  %s11452_s6 = smov 118   ;;  %s11461_s21 = sld [smem:[#allocation49_spill]] }
 0x1f9   : >> { %v3329_v59 = vsel %vm564_vm6, %v11219_v55, %v11043_v10  ;;  %v3257_v54 = vsel %vm564_vm6, %v11221_v37, %v11045_v22  ;;  %v2809_v20 = vrot.slane %v11222_v16, %v7862_v35  ;;  %v9213_v10 = vpop.permute.xlu0 %3462  ;;  %v11223_v37 = vld [vmem:[#allocation38_spill] sm:$0xff] }
 0x1fa   : >> { %v3330_v9 = vsel %vm11076_vm5, %v8750_v42, %v3329_v59  ;;  %v3258_v55 = vsel %vm11077_vm13, %v11220_v57, %v3257_v54  ;;  %v9215_v14 = vpop.permute.xlu1 %3390  ;;  %v2997_v16 = vcombine.high %v11223_v37, %v11223_v37  ;;  %v11047_v22 = vrot.slane %v9213_v10, 4  ;;  %v11224_v42 = vld [vmem:[#allocation23_spill] sm:$0xff]  ;;  %v11226_v58 = vld [vmem:[#allocation22_spill] sm:$0xff] }
 0x1fb   : >> { %3337 = vst [vmem:[#allocation3 + $0xf8] sm:$0x44] %v3330_v9  ;;  %3265 = vst [vmem:[#allocation3 + $0xf8] sm:$0x22] %v3258_v55  ;;  %v11049_v6 = vrot.slane %v9215_v14, 4  ;;  %2888 = vrot.lane.b32.xlu0 %v2881_v51, %s11170_s5  ;;  %v11225_v59 = vrot.slane %v11224_v42, 4  ;;  %6740 = vmatmul.mubr.msk.bf16.vlgmr.msra.gmra.mxu0 %vm11074_vm3, %v9207_v48 }
 0x1fc   : >> { %2816 = vrot.lane.b32.xlu1 %v2809_v20, %s11171_s8  ;;  %v11227_v57 = vrot.slane %v11226_v58, 4  ;;  %v11228_v9 = vld [vmem:[#allocation34_spill] sm:$0xff]  ;;  %s11238_s5 = smov 104   ;;  %s11255_s8 = smov 100   ;;  %vm11290_vm5 = vcmask 916480  }
 0x1fd   : >> { %v3473_v38 = vsel %vm564_vm6, %v11225_v59, %v11047_v22  ;;  %v2953_v55 = vrot.slane %v11228_v9, %v7862_v35  ;;  %v9242_v37 = vpop.permute.xlu0 %3606  ;;  %v3025_v22 = vrot.slane %v2997_v16, %v7862_v35  ;;  %v11230_v9 = vmov 0   ;;  %vm11295_vm13 = vmmov %vm11290_vm5 }
 0x1fe   : >> { %v3401_v54 = vsel %vm564_vm6, %v11227_v57, %v11049_v6  ;;  %v3474_v20 = vsel %vm11052_vm12, %v11224_v42, %v3473_v38  ;;  %v9244_v59 = vpop.permute.xlu1 %3534  ;;  %v3956_v7 = vld [vmem:[#allocation3 + $0x128] sm:$0x77]  ;;  %v11229_v57 = vld [vmem:[#allocation41_spill] sm:$0xff]  ;;  %4255 = vmatprep.mubr.bf16.mxu0 %v11230_v9  ;;  %v11054_v39 = vrot.slane %v9242_v37, 4  ;;  %v11231_v16 = vrot.slane %v8779_v56, 4  ;;  %s11462_s25 = smov %s11461_s21 }
 0x1ff   : >> { %v3402_v51 = vsel %vm11053_vm9, %v11226_v58, %v3401_v54  ;;  %v1989_v6 = vcombine.high %v11229_v57, %v11229_v57  ;;  %3481 = vst [vmem:[#allocation3 + $0x110] sm:$0x11] %v3474_v20  ;;  %v11056_v42 = vrot.slane %v9244_v59, 4  ;;  %v6736_v38 = vcombine.high %v3956_v7, %v3956_v7  ;;  %3032 = vrot.lane.b32.xlu0 %v3025_v22, %s11174_s4  ;;  %v11232_v20 = vld [vmem:[#allocation13_spill] sm:$0xff]  ;;  %v9271_v22 = vld [vmem:[%s10780_s1 + $0x8] sm:$0xff]   ;;  %s11454_s4 = smov 120  }
 0x200   : >> { %3409 = vst [vmem:[#allocation3 + $0xf8] sm:$0x88] %v3402_v51  ;;  %v6735_v58 = vcombine.low %v3956_v7, %v3956_v7  ;;  %2960 = vrot.lane.b32.xlu1 %v2953_v55, %s11175_s3  ;;  %v3617_v54 = vsel %vm564_vm6, %v11231_v16, %v11054_v39  ;;  %v11233_v51 = vrot.slane %v11232_v20, 4  ;;  %v11234_v55 = vld [vmem:[#allocation37_spill] sm:$0xff]  ;;  %vm11235_vm12 = vcmask 670720   ;;  %s11453_s3 = smov 119  }
 0x201   : >> { %6742 = vmatprep.subr.msk.bf16.mxu0 %vm11072_vm1, %v6736_v38  ;;  %v3097_v23 = vrot.slane %v11234_v55, %v7862_v35  ;;  %v3618_v16 = vsel %vm11235_vm12, %v8779_v56, %v3617_v54  ;;  %vm11236_vm9 = vcmask 678912   ;;  %v9277_v33 = vpop.permute.xlu0 %2598  ;;  %v2017_v38 = vrot.slane %v1989_v6, %v7862_v35  ;;  %v11239_v56 = vld [vmem:[#allocation24_spill] sm:$0xff] }
 0x202   : >> { %v3545_v57 = vsel %vm564_vm6, %v11233_v51, %v11056_v42  ;;  %v4202_v7 = vsel %vm11072_vm1, %v6735_v58, 0  ;;  %v9279_v51 = vpop.permute.xlu1 %3678  ;;  %v11237_v58 = vld [vmem:[#allocation43_spill] sm:$0xff]  ;;  %3625 = vst [vmem:[#allocation3 + $0x110] sm:$0x44] %v3618_v16  ;;  %v11058_v42 = vrot.slane %v9277_v33, 4  ;;  %v11240_v54 = vrot.slane %v11239_v56, 4 }
 0x203   : >> { %v3546_v39 = vsel %vm11236_vm9, %v11232_v20, %v3545_v57  ;;  %4269 = vmatpush1.bf16.msra.mxu0 %v4202_v7  ;;  %v2133_v55 = vcombine.high %v11237_v58, %v11237_v58  ;;  %v11059_v63 = vrot.slane %v9279_v51, 4  ;;  %2024 = vrot.lane.b32.xlu0 %v2017_v38, %s11238_s5  ;;  %v11241_v6 = vrot.slane %v8396_v40, 4  ;;  %v11242_v57 = vld [vmem:[#allocation39_spill] sm:$0xff]  ;;  %s11455_s5 = smov 114  }
 0x204   : >> { %3553 = vst [vmem:[#allocation3 + $0x110] sm:$0x22] %v3546_v39  ;;  %3104 = vrot.lane.b32.xlu1 %v3097_v23, %s11179_s2  ;;  %v2609_v20 = vsel %vm564_vm6, %v11240_v54, %v11058_v42  ;;  %v2089_v7 = vrot.slane %v11242_v57, %v7862_v35  ;;  %6741 = vmatmul.mubr.msk.bf16.gmra.mxu0 %vm11074_vm3, %v9271_v22  ;;  %vm11243_vm9 = vcmask 785408   ;;  %vm11244_vm12 = vcmask 662528   ;;  %v11245_v42 = vld [vmem:[#allocation44_spill] sm:$0xff]  ;;  %s11246_s2 = smov 102  }
 0x205   : >> { %v3689_v39 = vsel %vm564_vm6, %v11241_v6, %v11059_v63  ;;  %v2610_v23 = vsel %vm11243_vm9, %v11239_v56, %v2609_v20  ;;  %v9306_v38 = vpop.permute.xlu0 %2742  ;;  %v2161_v54 = vrot.slane %v2133_v55, %v7862_v35  ;;  %v2277_v6 = vcombine.high %v11245_v42, %v11245_v42  ;;  %4298 = vmatprep.mubr.bf16.mxu0 %v11230_v9  ;;  %v11248_v42 = vld [vmem:[#allocation14_spill] sm:$0xff] }
 0x206   : >> { %v3690_v16 = vsel %vm11244_vm12, %v8396_v40, %v3689_v39  ;;  %v9308_v58 = vpop.permute.xlu1 %2670  ;;  %2617 = vst [vmem:[#allocation3 + $0xc8] sm:$0x11] %v2610_v23  ;;  %v11061_v57 = vrot.slane %v9306_v38, 4  ;;  %v11247_v40 = vrot.slane %v8803_v21, 4  ;;  %v11249_v20 = vrot.slane %v11248_v42, 4  ;;  %v11250_v23 = vld [vmem:[#allocation42_spill] sm:$0xff] }
 0x207   : >> { %3697 = vst [vmem:[#allocation3 + $0x110] sm:$0x88] %v3690_v16  ;;  %v11063_v56 = vrot.slane %v9308_v58, 4  ;;  %2168 = vrot.lane.b32.xlu0 %v2161_v54, %s11246_s2  ;;  %v2233_v16 = vrot.slane %v11250_v23, %v7862_v35  ;;  %vm11251_vm9 = vcmask 769024   ;;  %vm11252_vm12 = vcmask 777216   ;;  %s11456_s2 = smov 123  }
 0x208   : >> { %2096 = vrot.lane.b32.xlu1 %v2089_v7, %s11182_s7  ;;  %v2753_v55 = vsel %vm564_vm6, %v11247_v40, %v11061_v57  ;;  %v2305_v40 = vrot.slane %v2277_v6, %v7862_v35  ;;  %v11254_v57 = vld [vmem:[#allocation45_spill] sm:$0xff]  ;;  %v11258_v6 = vrot.slane %v8427_v15, 4  ;;  %vm638_vm1 = vcmask 899078  }
 0x209   : >> { %v2681_v39 = vsel %vm564_vm6, %v11249_v20, %v11063_v56  ;;  %v2754_v7 = vsel %vm11251_vm9, %v8803_v21, %v2753_v55  ;;  %v9334_v63 = vpop.permute.xlu0 %2886  ;;  %v2421_v3 = vcombine.high %v11254_v57, %v11254_v57  ;;  %v11256_v21 = vld [vmem:[#allocation25_spill] sm:$0xff]  ;;  %vm11259_vm9 = vcmask 752640  }
 0x20a   : >> { %v2682_v54 = vsel %vm11252_vm12, %v11248_v42, %v2681_v39  ;;  %11253 = vst [vmem:[#allocation29_spill] sm:$0xff] %v9334_v63  ;;  %v9336_v18 = vpop.permute.xlu1 %2814  ;;  %2761 = vst [vmem:[#allocation3 + $0xc8] sm:$0x44] %v2754_v7  ;;  %v11064_v20 = vrot.slane %v9334_v63, 4  ;;  %v11257_v55 = vrot.slane %v11256_v21, 4  ;;  %vm11260_vm12 = vcmask 760832  }
 0x20b   : >> { %2689 = vst [vmem:[#allocation3 + $0xc8] sm:$0x22] %v2682_v54  ;;  %v11067_v23 = vrot.slane %v9336_v18, 4  ;;  %2312 = vrot.lane.b32.xlu0 %v2305_v40, %s11255_s8  ;;  %v11261_v40 = vld [vmem:[#allocation40_spill] sm:$0xff]  ;;  %s11457_s8 = smov 115  }
 0x20c   : >> { %2240 = vrot.lane.b32.xlu1 %v2233_v16, %s11127_s14  ;;  %v2897_v42 = vsel %vm564_vm6, %v11257_v55, %v11064_v20  ;;  %v2377_v56 = vrot.slane %v11261_v40, %v7862_v35  ;;  %v2449_v55 = vrot.slane %v2421_v3, %v7862_v35  ;;  %v11263_v3 = vld [vmem:[#allocation15_spill] sm:$0xff] }
 0x20d   : >> { %v2825_v57 = vsel %vm564_vm6, %v11258_v6, %v11067_v23  ;;  %v2898_v39 = vsel %vm11259_vm9, %v11256_v21, %v2897_v42  ;;  %v9359_v7 = vpop.permute.xlu0 %3030  ;;  %vm11265_vm9 = vcmask 736256  }
 0x20e   : >> { %v2826_v16 = vsel %vm11260_vm12, %v8427_v15, %v2825_v57  ;;  %v9361_v54 = vpop.permute.xlu1 %2958  ;;  %v7408_v20 = vld [vmem:[#allocation3 + $0xf8] ss:$24 sps:$4 sm:$0xff]   ;;  %v7410_v63 = vld [vmem:[#allocation3 + $0xfc] ss:$24 sps:$4 sm:$0xff]   ;;  %2905 = vst [vmem:[#allocation3 + $0xe0] sm:$0x11] %v2898_v39 }
 0x20f   : >> { %2833 = vst [vmem:[#allocation3 + $0xc8] sm:$0x88] %v2826_v16  ;;  %v11082_v6 = vrot.slane %v9359_v7, 4  ;;  %v11085_v21 = vrot.slane %v9361_v54, 4  ;;  %2456 = vrot.lane.b32.xlu0 %v2449_v55, %s11128_s27  ;;  %v11262_v15 = vrot.slane %v8830_v36, 4  ;;  %v11264_v57 = vrot.slane %v11263_v3, 4  ;;  %4270 = vmatprep.subr.bf16.mxu0 %v7410_v63 }
 0x210   : >> { %2384 = vrot.lane.b32.xlu1 %v2377_v56, %s11186_s19  ;;  %v2521_v16 = vrot.slane %v8755_v61, %v7862_v35  ;;  %vm11266_vm12 = vcmask 744448   ;;  %4271 = vmatpush1.bf16.msra.mxu0 %v7408_v20  ;;  %v1701_v63 = vcombine.high %v8863_v32, %v8863_v32  ;;  %s11314_s19 = sld [smem:[#allocation52_spill]] }
 0x211   : >> { %v3041_v42 = vsel %vm564_vm6, %v11262_v15, %v11082_v6  ;;  %v2969_v39 = vsel %vm564_vm6, %v11264_v57, %v11085_v21  ;;  %v9386_v55 = vpop.permute.xlu0 %2022  ;;  %v1657_v15 = vrot.slane %v8768_v12, %v7862_v35  ;;  %v11269_v12 = vrot.slane %v8456_v50, 4 }
 0x212   : >> { %v3042_v56 = vsel %vm11265_vm9, %v8830_v36, %v3041_v42  ;;  %v2970_v40 = vsel %vm11266_vm12, %v11263_v3, %v2969_v39  ;;  %v9388_v23 = vpop.permute.xlu1 %3102  ;;  %v11080_v61 = vrot.slane %v9386_v55, 4  ;;  %v11267_v42 = vld [vmem:[#allocation26_spill] sm:$0xff]  ;;  %v1801_v57 = vrot.slane %v8708_v28, %v7862_v35 }
 0x213   : >> { %3049 = vst [vmem:[#allocation3 + $0xe0] sm:$0x44] %v3042_v56  ;;  %2977 = vst [vmem:[#allocation3 + $0xe0] sm:$0x22] %v2970_v40  ;;  %v11081_v36 = vrot.slane %v9388_v23, 4  ;;  %1664 = vrot.lane.b32.xlu0 %v1657_v15, %s11132_s12  ;;  %v11268_v20 = vrot.slane %v11267_v42, 4  ;;  %v1729_v15 = vrot.slane %v1701_v63, %v7862_v35 }
 0x214   : >> { %2528 = vrot.lane.b32.xlu1 %v2521_v16, %s11130_s11  ;;  %vm11270_vm9 = vcmask 850944   ;;  %vm11271_vm12 = vcmask 728064   ;;  %v11273_v63 = vld [vmem:[#allocation16_spill] sm:$0xff] }
 0x215   : >> { %v2033_v3 = vsel %vm564_vm6, %v11268_v20, %v11080_v61  ;;  %v3113_v32 = vsel %vm564_vm6, %v11269_v12, %v11081_v36  ;;  %v9414_v56 = vpop.permute.xlu0 %2166  ;;  %v1845_v20 = vcombine.high %v8889_v41, %v8889_v41  ;;  %v11274_v41 = vrot.slane %v11273_v63, 4 }
 0x216   : >> { %v2034_v39 = vsel %vm11270_vm9, %v11267_v42, %v2033_v3  ;;  %v3114_v16 = vsel %vm11271_vm12, %v8456_v50, %v3113_v32  ;;  %v9416_v40 = vpop.permute.xlu1 %2094  ;;  %v11068_v12 = vrot.slane %v9414_v56, 4  ;;  %v11272_v50 = vrot.slane %v8850_v24, 4 }
 0x217   : >> { %2041 = vst [vmem:[#allocation3 + $0x98] sm:$0x11] %v2034_v39  ;;  %3121 = vst [vmem:[#allocation3 + $0xe0] sm:$0x88] %v3114_v16  ;;  %v11071_v28 = vrot.slane %v9416_v40, 4  ;;  %1808 = vrot.lane.b32.xlu0 %v1801_v57, %s11192_s18  ;;  %vm11275_vm9 = vcmask 842752  }
 0x218   : >> { %1736 = vrot.lane.b32.xlu1 %v1729_v15, %s11115_s22  ;;  %v2177_v42 = vsel %vm564_vm6, %v11272_v50, %v11068_v12  ;;  %v1873_v15 = vrot.slane %v1845_v20, %v7862_v35  ;;  %v1945_v50 = vrot.slane %v8835_v43, %v7862_v35  ;;  %v11279_v35 = vrot.slane %v8489_v1, 4  ;;  %v3958_v20 = vld [vmem:[%s11280_s20] sm:$0xff]  ;;  %s7768_s18 = smov 7  }
 0x219   : >> { %v2105_v3 = vsel %vm564_vm6, %v11274_v41, %v11071_v28  ;;  %v2178_v32 = vsel %vm11074_vm3, %v8850_v24, %v2177_v42  ;;  %v9439_v16 = vpop.permute.xlu0 %2310  ;;  %v11277_v24 = vld [vmem:[#allocation27_spill] sm:$0xff]  ;;  %vm11281_vm12 = vcmask 818176   ;;  %vm576_vm3 = vcmask 898053  }
 0x21a   : >> { %v2106_v39 = vsel %vm11275_vm9, %v11273_v63, %v2105_v3  ;;  %v9441_v57 = vpop.permute.xlu1 %2238  ;;  %2185 = vst [vmem:[#allocation3 + $0x98] sm:$0x44] %v2178_v32  ;;  %v11069_v12 = vrot.slane %v9439_v16, 4  ;;  %v11278_v42 = vrot.slane %v11277_v24, 4  ;;  %v3959_v3 = vld [vmem:[%s11280_s20 + $0x8] sm:$0xff]  ;;  %vm11282_vm9 = vcmask 826368  }
 0x21b   : >> { %2113 = vst [vmem:[#allocation3 + $0x98] sm:$0x22] %v2106_v39  ;;  %v11070_v41 = vrot.slane %v9441_v57, 4  ;;  %1952 = vrot.lane.b32.xlu0 %v1945_v50, %s11276_s9  ;;  %s11460_s9 = sld [smem:[#allocation48_spill]] }
 0x21c   : >> { %1880 = vrot.lane.b32.xlu1 %v1873_v15, %s11191_s13  ;;  %v2321_v63 = vsel %vm564_vm6, %v11278_v42, %v11069_v12 }
 0x21d   : >> { %v2249_v43 = vsel %vm564_vm6, %v11279_v35, %v11070_v41  ;;  %v2322_v32 = vsel %vm11281_vm12, %v11277_v24, %v2321_v63  ;;  %v9470_v15 = vpop.permute.xlu0 %2454  ;;  %v11283_v24 = vrot.slane %v8877_v62, 4  ;;  %v11284_v63 = vld [vmem:[#allocation17_spill] sm:$0xff]  ;;  %vm11286_vm12 = vcmask 801792  }
 0x21e   : >> { %v2250_v39 = vsel %vm11282_vm9, %v8489_v1, %v2249_v43  ;;  %v9472_v50 = vpop.permute.xlu1 %2382  ;;  %v7411_v42 = vld [vmem:[#allocation3 + $0xc8] ss:$24 sps:$4 sm:$0xff]   ;;  %v7413_v35 = vld [vmem:[#allocation3 + $0xcc] ss:$24 sps:$4 sm:$0xff]   ;;  %2329 = vst [vmem:[#allocation3 + $0xb0] sm:$0x11] %v2322_v32 }
 0x21f   : >> { %2257 = vst [vmem:[#allocation3 + $0x98] sm:$0x88] %v2250_v39  ;;  %v11073_v12 = vrot.slane %v9470_v15, 4  ;;  %v11075_v41 = vrot.slane %v9472_v50, 4  ;;  %4272 = vmatprep.subr.bf16.mxu0 %v7413_v35  ;;  %v11285_v43 = vrot.slane %v11284_v63, 4  ;;  %3969 = vperm.xlu0 %7332, %v3959_v3   ;;  %v3960_v32 = vld [vmem:[%s11280_s20 + $0x10] sm:$0xff] }
 0x220   : >> { %3964 = vperm.xlu1 %7331, %v3958_v20   ;;  %4273 = vmatpush1.bf16.msra.mxu0 %v7411_v42  ;;  %vm11287_vm9 = vcmask 809984   ;;  %v11288_v3 = vld [vmem:[#allocation28_spill] sm:$0xff] }
 0x221   : >> { %v2465_v1 = vsel %vm564_vm6, %v11283_v24, %v11073_v12  ;;  %v2393_v28 = vsel %vm564_vm6, %v11285_v43, %v11075_v41  ;;  %v1474_v35 = vpop.permute.xlu0 %1473  ;;  %v11289_v43 = vrot.slane %v11288_v3, 4 }
 0x222   : >> { %v2466_v20 = vsel %vm11286_vm12, %v8877_v62, %v2465_v1  ;;  %v2394_v39 = vsel %vm11287_vm9, %v11284_v63, %v2393_v28  ;;  %v9493_v24 = vpop.permute.xlu1 %2526  ;;  %v1477_v12 = vrot.slane %v1474_v35, 4  ;;  %v11291_v28 = vrot.slane %v8536_v25, 4  ;;  %v3961_v63 = vld [vmem:[%s11280_s20 + $0x18] sm:$0xff] }
 0x223   : >> { %2473 = vst [vmem:[#allocation3 + $0xb0] sm:$0x44] %v2466_v20  ;;  %2401 = vst [vmem:[#allocation3 + $0xb0] sm:$0x22] %v2394_v39  ;;  %v11079_v42 = vrot.slane %v9493_v24, 4  ;;  %vm11292_vm12 = vcmask 1042434  }
 0x224   : >> { %3974 = vperm.xlu1 %7331, %v3960_v32   ;;  %v1481_v41 = vsel %vm564_vm6, %v11289_v43, %v1477_v12  ;;  %v1483_v62 = vsel %vm11290_vm5, %v1474_v35, %v1477_v12  ;;  %vm9509_vm9 = vmor %vm638_vm1, %vm11292_vm12  ;;  %vm11297_vm5 = vcmask 793600   ;;  %vm11305_vm12 = vcmask 908288   ;;  %v7650_v20 = vld [vmem:[%s10780_s1] sm:$0xff]  }
 0x225   : >> { %v2537_v1 = vsel %vm564_vm6, %v11291_v28, %v11079_v42  ;;  %v1482_v32 = vsel %vm11295_vm13, %v11288_v3, %v1481_v41  ;;  %1489 = vst.msk [vmem:[#allocation3 + $0x70] sm:$0x11] %vm8195_vm4, %v1483_v62  ;;  %v1595_v35 = vpop.permute.xlu0 %1594  ;;  %vm9521_vm1 = vmor %vm576_vm3, %vm11298_vm10  ;;  %v11301_v41 = vrot.slane %v8903_v29, 4  ;;  %vm11302_vm13 = vcmask 900096  }
 0x226   : >> { %v2538_v12 = vsel %vm11297_vm5, %v8536_v25, %v2537_v1  ;;  %v1535_v43 = vpop.permute.xlu1 %1534  ;;  %1488 = vst [vmem:[#allocation3 + $0x68] sm:$0x11] %v1482_v32  ;;  %v1598_v28 = vrot.slane %v1595_v35, 4  ;;  %v11303_v25 = vld [vmem:[#allocation18_spill] sm:$0xff]  ;;  %vm11306_vm5 = vmmov %vm11302_vm13  ;;  %vm11311_vm3 = vcmask 883712  }
 0x227   : >> { %2545 = vst [vmem:[#allocation3 + $0xb0] sm:$0x88] %v2538_v12  ;;  %v1538_v61 = vrot.slane %v1535_v43, 4  ;;  %v11304_v1 = vrot.slane %v11303_v25, 4  ;;  %vm11307_vm10 = vmmov %vm11305_vm12 }
 0x228   : >> { %3979 = vperm.xlu1 %7331, %v3961_v63   ;;  %v1602_v3 = vsel %vm564_vm6, %v11301_v41, %v1598_v28  ;;  %v1604_v62 = vsel %vm11302_vm13, %v1595_v35, %v1598_v28  ;;  %vm11312_vm13 = vcmask 891904  }
 0x229   : >> { %v1542_v32 = vsel %vm564_vm6, %v11304_v1, %v1538_v61  ;;  %v1544_v12 = vsel %vm11305_vm12, %v1535_v43, %v1538_v61  ;;  %v1603_v36 = vsel %vm11306_vm5, %v8903_v29, %v1602_v3  ;;  %1610 = vst.msk [vmem:[#allocation3 + $0x70] sm:$0x44] %vm9509_vm9, %v1604_v62  ;;  %v9541_v41 = vpop.permute.xlu0 %1734  ;;  %v11308_v29 = vld [vmem:[#allocation31_spill] sm:$0xff]  ;;  %v11310_v62 = vrot.slane %v8585_v19, 4 }
 0x22a   : >> { %v1543_v63 = vsel %vm11307_vm10, %v11303_v25, %v1542_v32  ;;  %1550 = vst.msk [vmem:[#allocation3 + $0x70] sm:$0x22] %vm9521_vm1, %v1544_v12  ;;  %v9543_v35 = vpop.permute.xlu1 %1662  ;;  %1609 = vst [vmem:[#allocation3 + $0x68] sm:$0x44] %v1603_v36  ;;  %v11083_v61 = vrot.slane %v9541_v41, 4  ;;  %v11309_v28 = vrot.slane %v11308_v29, 4 }
 0x22b   : >> { %1549 = vst [vmem:[#allocation3 + $0x68] sm:$0x22] %v1543_v63  ;;  %v11084_v43 = vrot.slane %v9543_v35, 4  ;;  %vm11319_vm12 = vcmask 867328   ;;  %vm11320_vm5 = vcmask 875520   ;;  %vm11324_vm10 = vcmask 982016  }
 0x22c   : >> { %v1745_v3 = vsel %vm564_vm6, %v11309_v28, %v11083_v61 }
 0x22d   : >> { %v1673_v25 = vsel %vm564_vm6, %v11310_v62, %v11084_v43  ;;  %v1746_v36 = vsel %vm11311_vm3, %v11308_v29, %v1745_v3  ;;  %v9561_v32 = vpop.permute.xlu0 %1878  ;;  %v9570_v29 = vld [vmem:[%s11314_s19 + $0x78] sm:$0xff]  ;;  %v11316_v3 = vrot.slane %v8931_v2, 4  ;;  %vm11326_vm3 = vmmov %vm11324_vm10 }
 0x22e   : >> { %v1674_v1 = vsel %vm11312_vm13, %v8585_v19, %v1673_v25  ;;  %11313 = vst [vmem:[#allocation33_spill] sm:$0xff] %v9561_v32  ;;  %v9563_v12 = vpop.permute.xlu1 %1806  ;;  %v7414_v63 = vld [vmem:[#allocation3 + $0x98] ss:$24 sps:$4 sm:$0xff]   ;;  %v7416_v6 = vld [vmem:[#allocation3 + $0x9c] ss:$24 sps:$4 sm:$0xff]   ;;  %v11088_v28 = vrot.slane %v9561_v32, 4  ;;  %7030 = vmatprep.subr.mxu1 %v9570_v29 }
 0x22f   : >> { %1753 = vst [vmem:[#allocation3 + $0x80] sm:$0x11] %v1746_v36  ;;  %1681 = vst [vmem:[#allocation3 + $0x68] sm:$0x88] %v1674_v1  ;;  %v11089_v61 = vrot.slane %v9563_v12, 4  ;;  %4274 = vmatprep.subr.bf16.mxu0 %v7416_v6  ;;  %v9575_v19 = vld [vmem:[%s11314_s19 + $0x70] sm:$0xff]  ;;  %7031 = vmatpush3.msra.mxu1 %v9570_v29 }
 0x230   : >> { %11315 = vst [vmem:[#allocation21_spill] sm:$0xff] %v9575_v19  ;;  %v1889_v62 = vsel %vm564_vm6, %v11316_v3, %v11088_v28  ;;  %v11317_v25 = vld [vmem:[#allocation19_spill] sm:$0xff]  ;;  %4275 = vmatpush1.bf16.msra.mxu0 %v7414_v63  ;;  %7032 = vmatprep.subr.mxu1 %v9575_v19  ;;  %v11325_v28 = vrot.slane %v8632_v45, 4  ;;  %vm701_vm13 = vcmask 900103  }
 0x231   : >> { %v11318_v6 = vrot.slane %v11317_v25, 4  ;;  %v1890_v1 = vsel %vm11319_vm12, %v8931_v2, %v1889_v62  ;;  %v990_v21 = vpop.permute.xlu0 %989  ;;  %v9598_v3 = vld [vmem:[%s11314_s19 + $0x68] sm:$0xff]  ;;  %7033 = vmatpush3.msra.mxu1 %v9575_v19  ;;  %vm11328_vm12 = vcmask 965632  }
 0x232   : >> { %v9592_v32 = vpop.permute.xlu1 %1950  ;;  %1897 = vst [vmem:[#allocation3 + $0x80] sm:$0x44] %v1890_v1  ;;  %v993_v63 = vrot.slane %v990_v21, 4  ;;  %v11322_v2 = vld [vmem:[#allocation36_spill] sm:$0xff]  ;;  %7034 = vmatprep.subr.mxu1 %v9598_v3 }
 0x233   : >> { %v1817_v36 = vsel %vm564_vm6, %v11318_v6, %v11089_v61  ;;  %11321 = vst [vmem:[#allocation30_spill] sm:$0xff] %v9592_v32  ;;  %v11092_v6 = vrot.slane %v9592_v32, 4  ;;  %v11323_v62 = vrot.slane %v11322_v2, 4  ;;  %7035 = vmatpush3.msra.mxu1 %v9598_v3 }
 0x234   : >> { %v1818_v43 = vsel %vm11320_vm5, %v11317_v25, %v1817_v36  ;;  %v999_v36 = vsel %vm11324_vm10, %v990_v21, %v993_v63  ;;  %vm11331_vm5 = vcmask 973824   ;;  %vm11332_vm10 = vmmov %vm11328_vm12 }
 0x235   : >> { %1825 = vst [vmem:[#allocation3 + $0x80] sm:$0x22] %v1818_v43  ;;  %v997_v25 = vsel %vm564_vm6, %v11323_v62, %v993_v63  ;;  %v1961_v1 = vsel %vm564_vm6, %v11325_v28, %v11092_v6  ;;  %1005 = vst.msk [vmem:[#allocation3 + $0x40] sm:$0x11] %vm8195_vm4, %v999_v36  ;;  %v1111_v62 = vpop.permute.xlu0 %1110  ;;  %v11327_v28 = vrot.slane %v8950_v46, 4 }
 0x236   : >> { %v998_v43 = vsel %vm11326_vm3, %v11322_v2, %v997_v25  ;;  %v1962_v61 = vsel %vm11095_vm2, %v8632_v45, %v1961_v1  ;;  %v1051_v19 = vpop.permute.xlu1 %1050  ;;  %v1114_v21 = vrot.slane %v1111_v62, 4  ;;  %v11329_v25 = vld [vmem:[#allocation20_spill] sm:$0xff]  ;;  %vm11333_vm3 = vmmov %vm11331_vm5 }
 0x237   : >> { %1004 = vst [vmem:[#allocation3 + $0x38] sm:$0x11] %v998_v43  ;;  %1969 = vst [vmem:[#allocation3 + $0x80] sm:$0x88] %v1962_v61  ;;  %v1054_v63 = vrot.slane %v1051_v19, 4  ;;  %v11330_v36 = vrot.slane %v11329_v25, 4 }
 0x238   : >> { %v1118_v6 = vsel %vm564_vm6, %v11327_v28, %v1114_v21  ;;  %v1120_v2 = vsel %vm11328_vm12, %v1111_v62, %v1114_v21  ;;  %vm11334_vm12 = vcmask 1043459   ;;  %v11338_v28 = vrot.slane %v8678_v27, 4 }
 0x239   : >> { %v1058_v32 = vsel %vm564_vm6, %v11330_v36, %v1054_v63  ;;  %v1060_v45 = vsel %vm11331_vm5, %v1051_v19, %v1054_v63  ;;  %v1119_v1 = vsel %vm11332_vm10, %v8950_v46, %v1118_v6  ;;  %1126 = vst.msk [vmem:[#allocation3 + $0x40] sm:$0x44] %vm9509_vm9, %v1120_v2  ;;  %v1232_v43 = vpop.permute.xlu0 %1231  ;;  %vm9637_vm2 = vmor %vm701_vm13, %vm11334_vm12  ;;  %v11337_v6 = vrot.slane %v8975_v30, 4  ;;  %v9652_v36 = vld [vmem:[%s11314_s19 + $0x60] sm:$0xff]  ;;  %v11436_v19 = vld [vmem:[#allocation21_spill] sm:$0xff] }
 0x23a   : >> { %v1059_v61 = vsel %vm11333_vm3, %v11329_v25, %v1058_v32  ;;  %1066 = vst.msk [vmem:[#allocation3 + $0x40] sm:$0x22] %vm9521_vm1, %v1060_v45  ;;  %v1172_v62 = vpop.permute.xlu1 %1171  ;;  %1125 = vst [vmem:[#allocation3 + $0x38] sm:$0x44] %v1119_v1  ;;  %v1235_v21 = vrot.slane %v1232_v43, 4  ;;  %vm11339_vm5 = vcmask 957440   ;;  %7036 = vmatprep.subr.mxu1 %v9652_v36 }
 0x23b   : >> { %1065 = vst [vmem:[#allocation3 + $0x38] sm:$0x22] %v1059_v61  ;;  %v1175_v46 = vrot.slane %v1172_v62, 4  ;;  %vm11340_vm13 = vmmov %vm11339_vm5  ;;  %7037 = vmatpush3.msra.mxu1 %v9652_v36  ;;  %vm11342_vm10 = vcmask 932864   ;;  %vm11344_vm3 = vcmask 941056  }
 0x23c   : >> { %v1239_v63 = vsel %vm564_vm6, %v11337_v6, %v1235_v21  ;;  %v1241_v32 = vsel %vm1237_vm14, %v1232_v43, %v1235_v21  ;;  %vm11345_vm12 = vmmov %vm11342_vm10 }
 0x23d   : >> { %v1179_v2 = vsel %vm564_vm6, %v11338_v28, %v1175_v46  ;;  %v1181_v25 = vsel %vm11339_vm5, %v1172_v62, %v1175_v46  ;;  %v1240_v45 = vsel %vm1237_vm14, %v8975_v30, %v1239_v63  ;;  %1247 = vst.msk [vmem:[#allocation3 + $0x58] sm:$0x11] %vm8195_vm4, %v1241_v32  ;;  %v1353_v61 = vpop.permute.xlu0 %1352  ;;  %v9667_v30 = vld [vmem:[%s11314_s19 + $0x58] sm:$0xff]  ;;  %v11343_v28 = vrot.slane %v8997_v0, 4  ;;  %vm11346_vm5 = vmmov %vm11344_vm3 }
 0x23e   : >> { %v1180_v1 = vsel %vm11340_vm13, %v8678_v27, %v1179_v2  ;;  %1187 = vst.msk [vmem:[#allocation3 + $0x40] sm:$0x88] %vm9637_vm2, %v1181_v25  ;;  %v1293_v43 = vpop.permute.xlu1 %1292  ;;  %v7417_v62 = vld [vmem:[#allocation3 + $0x68] ss:$24 sps:$4 sm:$0xff]   ;;  %v7419_v21 = vld [vmem:[#allocation3 + $0x6c] ss:$24 sps:$4 sm:$0xff]   ;;  %7038 = vmatprep.subr.mxu1 %v9667_v30 }
 0x23f   : >> { %1246 = vst [vmem:[#allocation3 + $0x50] sm:$0x11] %v1240_v45  ;;  %1186 = vst [vmem:[#allocation3 + $0x38] sm:$0x88] %v1180_v1  ;;  %v1356_v46 = vrot.slane %v1353_v61, 4  ;;  %v1296_v6 = vrot.slane %v1293_v43, 4  ;;  %4276 = vmatprep.subr.bf16.mxu0 %v7419_v21  ;;  %7039 = vmatpush3.msra.mxu1 %v9667_v30 }
 0x240   : >> { %v11341_v27 = vrot.slane %v9010_v44, 4  ;;  %4277 = vmatpush1.bf16.msra.mxu0 %v7417_v62  ;;  %vm11348_vm13 = vcmask 924672  }
 0x241   : >> { %v1362_v32 = vsel %vm11342_vm10, %v1353_v61, %v1356_v46  ;;  %v1300_v2 = vsel %vm564_vm6, %v11343_v28, %v1296_v6  ;;  %v1302_v25 = vsel %vm11344_vm3, %v1293_v43, %v1296_v6  ;;  %v560_v21 = vpop.permute.xlu0 %559  ;;  %vm11350_vm10 = vcmask 1039360   ;;  %vm11351_vm3 = vmmov %vm11348_vm13 }
 0x242   : >> { %v1360_v63 = vsel %vm564_vm6, %v11341_v27, %v1356_v46  ;;  %1368 = vst.msk [vmem:[#allocation3 + $0x58] sm:$0x44] %vm9509_vm9, %v1362_v32  ;;  %v1301_v1 = vsel %vm11346_vm5, %v8997_v0, %v1300_v2  ;;  %v1414_v61 = vpop.permute.xlu1 %1413  ;;  %v563_v62 = vrot.slane %v560_v21, 4  ;;  %v11347_v46 = vrot.slane %v9021_v34, 4 }
 0x243   : >> { %v1361_v45 = vsel %vm11345_vm12, %v9010_v44, %v1360_v63  ;;  %1308 = vst.msk [vmem:[#allocation3 + $0x58] sm:$0x22] %vm9521_vm1, %v1302_v25  ;;  %1307 = vst [vmem:[#allocation3 + $0x50] sm:$0x22] %v1301_v1  ;;  %v1417_v43 = vrot.slane %v1414_v61, 4  ;;  %v11349_v27 = vrot.slane %v9034_v26, 4 }
 0x244   : >> { %1367 = vst [vmem:[#allocation3 + $0x50] sm:$0x44] %v1361_v45  ;;  %v570_v63 = vsel %vm11350_vm10, %v560_v21, %v563_v62  ;;  %vm11352_vm12 = vmmov %vm11350_vm10  ;;  %vm11354_vm5 = vcmask 1031168  }
 0x245   : >> { %v1421_v44 = vsel %vm564_vm6, %v11347_v46, %v1417_v43  ;;  %v1423_v6 = vsel %vm11348_vm13, %v1414_v61, %v1417_v43  ;;  %v568_v0 = vsel %vm564_vm6, %v11349_v27, %v563_v62  ;;  %578 = vst.msk [vmem:[#allocation3 + $0x10] sm:$0x22] %vm9521_vm1, %v570_v63  ;;  %v686_v25 = vpop.permute.xlu0 %685  ;;  %v9706_v61 = vld [vmem:[%s11314_s19 + $0x50] sm:$0xff]  ;;  %v11355_v43 = vrot.slane %v9055_v13, 4  ;;  %vm11357_vm10 = vmmov %vm11354_vm5 }
 0x246   : >> { %v1422_v32 = vsel %vm11351_vm3, %v9021_v34, %v1421_v44  ;;  %1429 = vst.msk [vmem:[#allocation3 + $0x58] sm:$0x88] %vm9637_vm2, %v1423_v6  ;;  %v569_v28 = vsel %vm11352_vm12, %v9034_v26, %v568_v0  ;;  %v623_v2 = vpop.permute.xlu1 %622  ;;  %v689_v1 = vrot.slane %v686_v25, 4  ;;  %v11353_v34 = vrot.slane %v9044_v47, 4  ;;  %7040 = vmatprep.subr.mxu1 %v9706_v61 }
 0x247   : >> { %1428 = vst [vmem:[#allocation3 + $0x50] sm:$0x88] %v1422_v32  ;;  %575 = vst [vmem:[#allocation3 + $0x8] sm:$0x22] %v569_v28  ;;  %v626_v45 = vrot.slane %v623_v2, 4  ;;  %vm11356_vm13 = vcmask 1022976   ;;  %7041 = vmatpush3.msra.mxu1 %v9706_v61 }
 0x248   : >> { %v693_v62 = vsel %vm564_vm6, %v11355_v43, %v689_v1  ;;  %v695_v46 = vsel %vm11356_vm13, %v686_v25, %v689_v1  ;;  %vm11358_vm3 = vmmov %vm11356_vm13  ;;  %v11359_v28 = vrot.slane %v9070_v5, 4  ;;  %vm11360_vm12 = vcmask 1014784  }
 0x249   : >> { %v630_v21 = vsel %vm564_vm6, %v11353_v34, %v626_v45  ;;  %v632_v26 = vsel %vm11354_vm5, %v623_v2, %v626_v45  ;;  %v694_v6 = vsel %vm11358_vm3, %v9055_v13, %v693_v62  ;;  %703 = vst.msk [vmem:[#allocation3 + $0x10] sm:$0x88] %vm9637_vm2, %v695_v46  ;;  %v809_v0 = vpop.permute.xlu0 %808  ;;  %v11361_v25 = vrot.slane %v9084_v31, 4  ;;  %vm11363_vm13 = vmmov %vm11360_vm12 }
 0x24a   : >> { %v631_v44 = vsel %vm11357_vm10, %v9044_v47, %v630_v21  ;;  %640 = vst.msk [vmem:[#allocation3 + $0x10] sm:$0x44] %vm9509_vm9, %v632_v26  ;;  %v748_v27 = vpop.permute.xlu1 %747  ;;  %700 = vst [vmem:[#allocation3 + $0x8] sm:$0x88] %v694_v6  ;;  %v812_v32 = vrot.slane %v809_v0, 4  ;;  %vm11362_vm5 = vcmask 1006592  }
 0x24b   : >> { %637 = vst [vmem:[#allocation3 + $0x8] sm:$0x44] %v631_v44  ;;  %v751_v63 = vrot.slane %v748_v27, 4  ;;  %vm11364_vm10 = vmmov %vm11362_vm5  ;;  %vm11376_vm3 = vcmask 834560  }
 0x24c   : >> { %v816_v13 = vsel %vm564_vm6, %v11361_v25, %v812_v32  ;;  %v818_v45 = vsel %vm11362_vm5, %v809_v0, %v812_v32  ;;  %vm11380_vm5 = vcmask 687104  }
 0x24d   : >> { %v755_v47 = vsel %vm564_vm6, %v11359_v28, %v751_v63  ;;  %v757_v2 = vsel %vm11360_vm12, %v748_v27, %v751_v63  ;;  %v817_v34 = vsel %vm11364_vm10, %v9084_v31, %v816_v13  ;;  %824 = vst.msk [vmem:[#allocation3 + $0x28] sm:$0x22] %vm9521_vm1, %v818_v45  ;;  %v930_v26 = vpop.permute.xlu0 %929  ;;  %v11366_v31 = vrot.slane %v9111_v60, 4 }
 0x24e   : >> { %v756_v1 = vsel %vm11363_vm13, %v9070_v5, %v755_v47  ;;  %763 = vst.msk [vmem:[#allocation3 + $0x28] sm:$0x11] %vm8195_vm4, %v757_v2  ;;  %v869_v21 = vpop.permute.xlu1 %868  ;;  %v7420_v43 = vld [vmem:[#allocation3 + $0x38] ss:$24 sps:$4 sm:$0xff]   ;;  %v7422_v62 = vld [vmem:[#allocation3 + $0x3c] ss:$24 sps:$4 sm:$0xff]  }
 0x24f   : >> { %762 = vst [vmem:[#allocation3 + $0x20] sm:$0x11] %v756_v1  ;;  %823 = vst [vmem:[#allocation3 + $0x20] sm:$0x22] %v817_v34  ;;  %v872_v46 = vrot.slane %v869_v21, 4  ;;  %v933_v44 = vrot.slane %v930_v26, 4  ;;  %4278 = vmatprep.subr.bf16.mxu0 %v7422_v62 }
 0x250   : >> { %v11365_v5 = vrot.slane %v9097_v52, 4  ;;  %4279 = vmatpush1.bf16.msra.mxu0 %v7420_v43  ;;  %v11367_v45 = vrot.slane %v9127_v17, 4  ;;  %vm11379_vm12 = vcmask 695296   ;;  %vm11383_vm13 = vcmask 1042432  }
 0x251   : >> { %v878_v27 = vsel %vm874_vm0, %v869_v21, %v872_v46  ;;  %v937_v0 = vsel %vm564_vm6, %v11366_v31, %v933_v44  ;;  %v939_v63 = vsel %vm935_vm15, %v930_v26, %v933_v44  ;;  %v3825_v2 = vpop.permute.xlu0 %3824  ;;  %v11369_v44 = vrot.slane %v9156_v53, 4  ;;  %vm11384_vm10 = vmmov %vm11383_vm13 }
 0x252   : >> { %v876_v6 = vsel %vm564_vm6, %v11365_v5, %v872_v46  ;;  %884 = vst.msk [vmem:[#allocation3 + $0x28] sm:$0x44] %vm9509_vm9, %v878_v27  ;;  %v938_v28 = vsel %vm935_vm15, %v9111_v60, %v937_v0  ;;  %v3753_v47 = vpop.permute.xlu1 %3752  ;;  %v3829_v13 = vrot.slane %v3825_v2, 4  ;;  %v9789_v2 = vld [vmem:[%s11314_s19 + $0x48] sm:$0xff] }
 0x253   : >> { %v877_v32 = vsel %vm874_vm0, %v9097_v52, %v876_v6  ;;  %945 = vst.msk [vmem:[#allocation3 + $0x28] sm:$0x88] %vm9637_vm2, %v939_v63  ;;  %944 = vst [vmem:[#allocation3 + $0x20] sm:$0x88] %v938_v28  ;;  %v3757_v25 = vrot.slane %v3753_v47, 4  ;;  %v11368_v52 = vrot.slane %v9125_v4, 4  ;;  %7042 = vmatprep.subr.mxu1 %v9789_v2 }
 0x254   : >> { %883 = vst [vmem:[#allocation3 + $0x20] sm:$0x44] %v877_v32  ;;  %v11370_v6 = vrot.slane %v9154_v11, 4  ;;  %7043 = vmatpush3.msra.mxu1 %v9789_v2 }
 0x255   : >> { %v3763_v1 = vsel %vm564_vm6, %v11367_v45, %v3757_v25  ;;  %v3835_v34 = vsel %vm564_vm6, %v11368_v52, %v3829_v13  ;;  %v3177_v43 = vpop.permute.xlu0 %3176  ;;  %v11373_v13 = vrot.slane %v9181_v8, 4 }
 0x256   : >> { %v3764_v60 = vsel %vm3759_vm8, %v9127_v17, %v3763_v1  ;;  %v3836_v21 = vsel %vm3831_vm11, %v9125_v4, %v3835_v34  ;;  %v3897_v26 = vpop.permute.xlu1 %3896  ;;  %v3181_v46 = vrot.slane %v3177_v43, 4  ;;  %vm11371_vm8 = vcmask 719872   ;;  %v9807_v1 = vld [vmem:[%s11314_s19 + $0x38] sm:$0xff] }
 0x257   : >> { %3770 = vst.msk [vmem:[#allocation3 + $0x130] sm:$0x11] %vm8195_vm4, %v3764_v60  ;;  %v3901_v62 = vrot.slane %v3897_v26, 4  ;;  %vm11375_vm11 = vcmask 703488  }
 0x258   : >> { %3842 = vst.msk [vmem:[#allocation3 + $0x130] sm:$0x22] %vm9521_vm1, %v3836_v21  ;;  %v3187_v17 = vsel %vm564_vm6, %v11370_v6, %v3181_v46  ;;  %v11378_v46 = vrot.slane %v9213_v10, 4 }
 0x259   : >> { %v3907_v5 = vsel %vm564_vm6, %v11369_v44, %v3901_v62  ;;  %v3188_v27 = vsel %vm11371_vm8, %v9154_v11, %v3187_v17  ;;  %v3321_v0 = vpop.permute.xlu0 %3320  ;;  %v9794_v11 = vld [vmem:[%s11314_s19 + $0x40] sm:$0xff]  ;;  %vm11385_vm8 = vcmask 678912  }
 0x25a   : >> { %v3908_v4 = vsel %vm3903_vm7, %v9156_v53, %v3907_v5  ;;  %v3249_v31 = vpop.permute.xlu1 %3248  ;;  %3194 = vst.msk [vmem:[#allocation3 + $0x100] sm:$0x11] %vm8195_vm4, %v3188_v27  ;;  %v3325_v47 = vrot.slane %v3321_v0, 4  ;;  %v11372_v53 = vrot.slane %v9183_v49, 4  ;;  %vm11374_vm7 = vcmask 711680   ;;  %7044 = vmatprep.subr.mxu1 %v9794_v11  ;;  %v9838_v5 = vld [vmem:[%s11314_s19 + $0x28] sm:$0xff] }
 0x25b   : >> { %v7424_v63 = vld [vmem:[#allocation3 + $0x8] ss:$24 sps:$4 sm:$0xff]   ;;  %v7426_v32 = vld [vmem:[#allocation3 + $0xc] ss:$24 sps:$4 sm:$0xff]   ;;  %3914 = vst.msk [vmem:[#allocation3 + $0x130] sm:$0x44] %vm9509_vm9, %v3908_v4  ;;  %7045 = vmatpush3.msra.mxu1 %v9794_v11 }
 0x25c   : >> { %v3253_v28 = vrot.slane %v3249_v31, 4  ;;  %4280 = vmatprep.subr.bf16.mxu0 %v7426_v32  ;;  %v3331_v45 = vsel %vm564_vm6, %v11373_v13, %v3325_v47  ;;  %7046 = vmatprep.subr.mxu1 %v9807_v1  ;;  %v11382_v47 = vrot.slane %v9242_v37, 4  ;;  %v9868_v13 = vld [vmem:[%s11314_s19 + $0x18] sm:$0xff] }
 0x25d   : >> { %4281 = vmatpush1.bf16.msra.mxu0 %v7424_v63  ;;  %v3332_v34 = vsel %vm11375_vm11, %v9181_v8, %v3331_v45  ;;  %v3465_v21 = vpop.permute.xlu0 %3464  ;;  %v11377_v8 = vrot.slane %v9215_v14, 4  ;;  %7047 = vmatpush3.msra.mxu1 %v9807_v1  ;;  %vm11387_vm11 = vmmov %vm11376_vm3 }
 0x25e   : >> { %v3259_v25 = vsel %vm564_vm6, %v11372_v53, %v3253_v28  ;;  %v3393_v60 = vpop.permute.xlu1 %3392  ;;  %3338 = vst.msk [vmem:[#allocation3 + $0x100] sm:$0x44] %vm9509_vm9, %v3332_v34  ;;  %v3469_v43 = vrot.slane %v3465_v21, 4 }
 0x25f   : >> { %v3260_v52 = vsel %vm11374_vm7, %v9183_v49, %v3259_v25  ;;  %v3397_v26 = vrot.slane %v3393_v60, 4  ;;  %v9822_v49 = vld [vmem:[%s11314_s19 + $0x30] sm:$0xff]  ;;  %vm11386_vm7 = vcmask 670720  }
 0x260   : >> { %3266 = vst.msk [vmem:[#allocation3 + $0x100] sm:$0x22] %vm9521_vm1, %v3260_v52  ;;  %6743 = vmatmul.mubr.msk.bf16.vlgmr.msra.gmra.mxu0 %vm11376_vm3, %v9207_v48  ;;  %v3475_v44 = vsel %vm564_vm6, %v11378_v46, %v3469_v43  ;;  %7048 = vmatprep.subr.mxu1 %v9822_v49  ;;  %v9899_v46 = vld [vmem:[%s11314_s19 + $0x8] sm:$0xff]  ;;  %vm11390_vm3 = vcmask 662528  }
 0x261   : >> { %v3403_v62 = vsel %vm564_vm6, %v11377_v8, %v3397_v26  ;;  %4308 = vmatprep.mubr.bf16.mxu0 %v11230_v9  ;;  %v3476_v6 = vsel %vm11380_vm5, %v9213_v10, %v3475_v44  ;;  %v3609_v4 = vpop.permute.xlu0 %3608  ;;  %7049 = vmatpush3.msra.mxu1 %v9822_v49  ;;  %v11381_v10 = vrot.slane %v9244_v59, 4  ;;  %v11389_v8 = vrot.slane %v9277_v33, 4 }
 0x262   : >> { %v3404_v48 = vsel %vm11379_vm12, %v9215_v14, %v3403_v62  ;;  %v3537_v17 = vpop.permute.xlu1 %3536  ;;  %v3957_v27 = vld [vmem:[#allocation3 + $0x130] sm:$0x77]  ;;  %3482 = vst.msk [vmem:[#allocation3 + $0x118] sm:$0x11] %vm8195_vm4, %v3476_v6  ;;  %v3613_v0 = vrot.slane %v3609_v4, 4  ;;  %v9853_v14 = vld [vmem:[%s11314_s19 + $0x20] sm:$0xff]  ;;  %7050 = vmatprep.subr.mxu1 %v9838_v5 }
 0x263   : >> { %3410 = vst.msk [vmem:[#allocation3 + $0x100] sm:$0x88] %vm9637_vm2, %v3404_v48  ;;  %v3541_v31 = vrot.slane %v3537_v17, 4  ;;  %v6738_v63 = vcombine.high %v3957_v27, %v3957_v27  ;;  %v6737_v32 = vcombine.low %v3957_v27, %v3957_v27  ;;  %7051 = vmatpush3.msra.mxu1 %v9838_v5  ;;  %vm11391_vm12 = vcmask 785408  }
 0x264   : >> { %v3619_v53 = vsel %vm564_vm6, %v11382_v47, %v3613_v0  ;;  %7052 = vmatprep.subr.mxu1 %v9853_v14  ;;  %vm11394_vm5 = vcmask 777216  }
 0x265   : >> { %v3547_v28 = vsel %vm564_vm6, %v11381_v10, %v3541_v31  ;;  %6745 = vmatprep.subr.msk.bf16.mxu0 %vm11383_vm13, %v6738_v63  ;;  %v4208_v25 = vsel %vm11384_vm10, %v6737_v32, 0  ;;  %v3620_v52 = vsel %vm11386_vm7, %v9242_v37, %v3619_v53  ;;  %v2601_v60 = vpop.permute.xlu0 %2600  ;;  %7053 = vmatpush3.msra.mxu1 %v9853_v14  ;;  %v11388_v37 = vrot.slane %v9279_v51, 4 }
 0x266   : >> { %v3548_v45 = vsel %vm11385_vm8, %v9244_v59, %v3547_v28  ;;  %v3681_v34 = vpop.permute.xlu1 %3680  ;;  %4322 = vmatpush1.bf16.msra.mxu0 %v4208_v25  ;;  %3626 = vst.msk [vmem:[#allocation3 + $0x118] sm:$0x44] %vm9509_vm9, %v3620_v52  ;;  %v2605_v26 = vrot.slane %v2601_v60, 4  ;;  %v9883_v59 = vld [vmem:[%s11314_s19 + $0x10] sm:$0xff]  ;;  %7054 = vmatprep.subr.mxu1 %v9868_v13  ;;  %v11393_v31 = vrot.slane %v9306_v38, 4  ;;  %vm11395_vm13 = vcmask 769024  }
 0x267   : >> { %3554 = vst.msk [vmem:[#allocation3 + $0x118] sm:$0x22] %vm9521_vm1, %v3548_v45  ;;  %v3685_v21 = vrot.slane %v3681_v34, 4  ;;  %7055 = vmatpush3.msra.mxu1 %v9868_v13  ;;  %v11397_v25 = vld [vmem:[#allocation29_spill] sm:$0xff]  ;;  %vm11399_vm10 = vcmask 760832   ;;  %vm11400_vm8 = vcmask 752640  }
 0x268   : >> { %6744 = vmatmul.mubr.msk.bf16.gmra.mxu0 %vm11387_vm11, %v9271_v22  ;;  %v2611_v62 = vsel %vm564_vm6, %v11389_v8, %v2605_v26  ;;  %7056 = vmatprep.subr.mxu1 %v9883_v59  ;;  %v11398_v45 = vrot.slane %v11397_v25, 4  ;;  %vm11403_vm7 = vcmask 744448   ;;  %vm11404_vm11 = vcmask 736256  }
 0x269   : >> { %v3691_v43 = vsel %vm564_vm6, %v11388_v37, %v3685_v21  ;;  %4351 = vmatprep.mubr.bf16.mxu0 %v11230_v9  ;;  %v2612_v44 = vsel %vm11391_vm12, %v9277_v33, %v2611_v62  ;;  %v2745_v6 = vpop.permute.xlu0 %2744  ;;  %7057 = vmatpush3.msra.mxu1 %v9883_v59  ;;  %v11392_v33 = vrot.slane %v9308_v58, 4  ;;  %vm11408_vm12 = vcmask 850944  }
 0x26a   : >> { %v3692_v22 = vsel %vm11390_vm3, %v9279_v51, %v3691_v43  ;;  %v2673_v48 = vpop.permute.xlu1 %2672  ;;  %2618 = vst.msk [vmem:[#allocation3 + $0xd0] sm:$0x11] %vm8195_vm4, %v2612_v44  ;;  %v2749_v4 = vrot.slane %v2745_v6, 4  ;;  %v9914_v51 = vld [vmem:[%s11314_s19] sm:$0xff]  ;;  %7058 = vmatprep.subr.mxu1 %v9899_v46  ;;  %v11402_v44 = vrot.slane %v9359_v7, 4  ;;  %vm11407_vm3 = vcmask 728064  }
 0x26b   : >> { %3698 = vst.msk [vmem:[#allocation3 + $0x118] sm:$0x88] %vm9637_vm2, %v3692_v22  ;;  %v2677_v17 = vrot.slane %v2673_v48, 4  ;;  %7059 = vmatpush3.msra.mxu1 %v9899_v46  ;;  %v11401_v22 = vrot.slane %v9361_v54, 4 }
 0x26c   : >> { %v2755_v0 = vsel %vm564_vm6, %v11393_v31, %v2749_v4  ;;  %7060 = vmatprep.subr.mxu1 %v9914_v51 }
 0x26d   : >> { %v2683_v27 = vsel %vm564_vm6, %v11392_v33, %v2677_v17  ;;  %v2756_v32 = vsel %vm11395_vm13, %v9306_v38, %v2755_v0  ;;  %v2889_v28 = vpop.permute.xlu0 %2888  ;;  %7061 = vmatpush3.msra.mxu1 %v9914_v51  ;;  %v11405_v0 = vrot.slane %v9388_v23, 4  ;;  %vm11412_vm13 = vcmask 834560  }
 0x26e   : >> { %v2684_v63 = vsel %vm11394_vm5, %v9308_v58, %v2683_v27  ;;  %v2817_v10 = vpop.permute.xlu1 %2816  ;;  %2762 = vst.msk [vmem:[#allocation3 + $0xd0] sm:$0x44] %vm9509_vm9, %v2756_v32  ;;  %v2893_v53 = vrot.slane %v2889_v28, 4  ;;  %7106 = vmatprep.subr.mxu1 %v9570_v29  ;;  %v11396_v58 = vrot.slane %v9336_v18, 4  ;;  %v11406_v32 = vrot.slane %v9386_v55, 4 }
 0x26f   : >> { %2690 = vst.msk [vmem:[#allocation3 + $0xd0] sm:$0x22] %vm9521_vm1, %v2684_v63  ;;  %v2821_v47 = vrot.slane %v2817_v10, 4  ;;  %vm11411_vm5 = vcmask 842752  }
 0x270   : >> { %v2899_v52 = vsel %vm564_vm6, %v11398_v45, %v2893_v53  ;;  %v11410_v45 = vrot.slane %v9414_v56, 4 }
 0x271   : >> { %v2827_v38 = vsel %vm564_vm6, %v11396_v58, %v2821_v47  ;;  %v2900_v60 = vsel %vm11400_vm8, %v11397_v25, %v2899_v52  ;;  %v3033_v26 = vpop.permute.xlu0 %3032  ;;  %vm11416_vm8 = vcmask 818176  }
 0x272   : >> { %v2828_v34 = vsel %vm11399_vm10, %v9336_v18, %v2827_v38  ;;  %v2961_v21 = vpop.permute.xlu1 %2960  ;;  %v7428_v37 = vld [vmem:[#allocation3 + $0x100] ss:$24 sps:$4 sm:$0xff]   ;;  %v7430_v43 = vld [vmem:[#allocation3 + $0x104] ss:$24 sps:$4 sm:$0xff]   ;;  %2906 = vst.msk [vmem:[#allocation3 + $0xe8] sm:$0x11] %vm8195_vm4, %v2900_v60 }
 0x273   : >> { %2834 = vst.msk [vmem:[#allocation3 + $0xd0] sm:$0x88] %vm9637_vm2, %v2828_v34  ;;  %v2965_v8 = vrot.slane %v2961_v21, 4  ;;  %v3037_v62 = vrot.slane %v3033_v26, 4  ;;  %4323 = vmatprep.subr.bf16.mxu0 %v7430_v43  ;;  %v11409_v38 = vrot.slane %v9416_v40, 4  ;;  %vm11415_vm10 = vcmask 826368  }
 0x274   : >> { %4324 = vmatpush1.bf16.msra.mxu0 %v7428_v37  ;;  %v11413_v37 = vrot.slane %v9441_v57, 4 }
 0x275   : >> { %v2971_v18 = vsel %vm564_vm6, %v11401_v22, %v2965_v8  ;;  %v3043_v48 = vsel %vm564_vm6, %v11402_v44, %v3037_v62  ;;  %v2025_v33 = vpop.permute.xlu0 %2024  ;;  %v11414_v8 = vrot.slane %v9439_v16, 4 }
 0x276   : >> { %v2972_v6 = vsel %vm11403_vm7, %v9361_v54, %v2971_v18  ;;  %v3044_v17 = vsel %vm11404_vm11, %v9359_v7, %v3043_v48  ;;  %v3105_v4 = vpop.permute.xlu1 %3104  ;;  %v2029_v31 = vrot.slane %v2025_v33, 4  ;;  %v11418_v33 = vrot.slane %v9470_v15, 4 }
 0x277   : >> { %2978 = vst.msk [vmem:[#allocation3 + $0xe8] sm:$0x22] %vm9521_vm1, %v2972_v6  ;;  %v3109_v27 = vrot.slane %v3105_v4, 4  ;;  %v11417_v4 = vrot.slane %v9472_v50, 4  ;;  %vm11419_vm7 = vcmask 809984   ;;  %vm11420_vm11 = vcmask 801792  }
 0x278   : >> { %3050 = vst.msk [vmem:[#allocation3 + $0xe8] sm:$0x44] %vm9509_vm9, %v3044_v17  ;;  %v2035_v54 = vsel %vm564_vm6, %v11406_v32, %v2029_v31 }
 0x279   : >> { %v3115_v63 = vsel %vm564_vm6, %v11405_v0, %v3109_v27  ;;  %v2036_v10 = vsel %vm11408_vm12, %v9386_v55, %v2035_v54  ;;  %v2169_v47 = vpop.permute.xlu0 %2168  ;;  %vm11424_vm12 = vcmask 891904  }
 0x27a   : >> { %v3116_v7 = vsel %vm11407_vm3, %v9388_v23, %v3115_v63  ;;  %v2097_v28 = vpop.permute.xlu1 %2096  ;;  %2042 = vst.msk [vmem:[#allocation3 + $0xa0] sm:$0x11] %vm8195_vm4, %v2036_v10  ;;  %v2173_v58 = vrot.slane %v2169_v47, 4  ;;  %vm11423_vm3 = vcmask 793600  }
 0x27b   : >> { %3122 = vst.msk [vmem:[#allocation3 + $0xe8] sm:$0x88] %vm9637_vm2, %v3116_v7  ;;  %v2101_v53 = vrot.slane %v2097_v28, 4  ;;  %v11421_v7 = vrot.slane %v9493_v24, 4  ;;  %v11422_v28 = vrot.slane %v9543_v35, 4 }
 0x27c   : >> { %v2179_v23 = vsel %vm564_vm6, %v11410_v45, %v2173_v58  ;;  %v11425_v45 = vrot.slane %v9541_v41, 4 }
 0x27d   : >> { %v2107_v25 = vsel %vm564_vm6, %v11409_v38, %v2101_v53  ;;  %v2180_v52 = vsel %vm11412_vm13, %v9414_v56, %v2179_v23  ;;  %v2313_v60 = vpop.permute.xlu0 %2312  ;;  %vm11428_vm13 = vcmask 875520  }
 0x27e   : >> { %v2108_v55 = vsel %vm11411_vm5, %v9416_v40, %v2107_v25  ;;  %v2241_v34 = vpop.permute.xlu1 %2240  ;;  %2186 = vst.msk [vmem:[#allocation3 + $0xa0] sm:$0x44] %vm9509_vm9, %v2180_v52  ;;  %v2317_v26 = vrot.slane %v2313_v60, 4  ;;  %vm11427_vm5 = vcmask 883712  }
 0x27f   : >> { %2114 = vst.msk [vmem:[#allocation3 + $0xa0] sm:$0x22] %vm9521_vm1, %v2108_v55  ;;  %v2245_v21 = vrot.slane %v2241_v34, 4  ;;  %v11426_v55 = vrot.slane %v9563_v12, 4 }
 0x280   : >> { %v2323_v40 = vsel %vm564_vm6, %v11414_v8, %v2317_v26 }
 0x281   : >> { %v2251_v43 = vsel %vm564_vm6, %v11413_v37, %v2245_v21  ;;  %v2324_v62 = vsel %vm11416_vm8, %v9439_v16, %v2323_v40  ;;  %v2457_v18 = vpop.permute.xlu0 %2456  ;;  %v11429_v37 = vld [vmem:[#allocation33_spill] sm:$0xff]  ;;  %v11431_v40 = vld [vmem:[#allocation30_spill] sm:$0xff]  ;;  %vm11434_vm8 = vcmask 859136  }
 0x282   : >> { %v2252_v56 = vsel %vm11415_vm10, %v9441_v57, %v2251_v43  ;;  %v2385_v22 = vpop.permute.xlu1 %2384  ;;  %v7431_v44 = vld [vmem:[#allocation3 + $0xd0] ss:$24 sps:$4 sm:$0xff]   ;;  %v7433_v48 = vld [vmem:[#allocation3 + $0xd4] ss:$24 sps:$4 sm:$0xff]   ;;  %2330 = vst.msk [vmem:[#allocation3 + $0xb8] sm:$0x11] %vm8195_vm4, %v2324_v62 }
 0x283   : >> { %2258 = vst.msk [vmem:[#allocation3 + $0xa0] sm:$0x88] %vm9637_vm2, %v2252_v56  ;;  %v2389_v6 = vrot.slane %v2385_v22, 4  ;;  %v2461_v17 = vrot.slane %v2457_v18, 4  ;;  %4325 = vmatprep.subr.bf16.mxu0 %v7433_v48  ;;  %v11430_v43 = vrot.slane %v11429_v37, 4  ;;  %v11432_v56 = vrot.slane %v11431_v40, 4 }
 0x284   : >> { %4326 = vmatpush1.bf16.msra.mxu0 %v7431_v44  ;;  %vm11433_vm10 = vcmask 867328   ;;  %v7442_v44 = vld [vmem:[#allocation3 + $0x44] ss:$24 sps:$4 sm:$0xff]   ;;  %v7440_v48 = vld [vmem:[#allocation3 + $0x40] ss:$24 sps:$4 sm:$0xff]  }
 0x285   : >> { %v2395_v57 = vsel %vm564_vm6, %v11417_v4, %v2389_v6  ;;  %v2467_v16 = vsel %vm564_vm6, %v11418_v33, %v2461_v17  ;;  %v1665_v63 = vpop.permute.xlu0 %1664  ;;  %v7445_v6 = vld [vmem:[#allocation3 + $0x14] ss:$24 sps:$4 sm:$0xff]   ;;  %v7443_v17 = vld [vmem:[#allocation3 + $0x10] ss:$24 sps:$4 sm:$0xff]  }
 0x286   : >> { %v2396_v27 = vsel %vm11419_vm7, %v9472_v50, %v2395_v57  ;;  %v2468_v31 = vsel %vm11420_vm11, %v9470_v15, %v2467_v16  ;;  %v2529_v0 = vpop.permute.xlu1 %2528  ;;  %v1669_v54 = vrot.slane %v1665_v63, 4  ;;  %v7651_v4 = vld [vmem:[%s10780_s1 + $0x8] sm:$0xff]  }
 0x287   : >> { %2402 = vst.msk [vmem:[#allocation3 + $0xb8] sm:$0x22] %vm9521_vm1, %v2396_v27  ;;  %v2533_v32 = vrot.slane %v2529_v0, 4 }
 0x288   : >> { %2474 = vst.msk [vmem:[#allocation3 + $0xb8] sm:$0x44] %vm9509_vm9, %v2468_v31  ;;  %v1675_v50 = vsel %vm564_vm6, %v11422_v28, %v1669_v54 }
 0x289   : >> { %v2539_v10 = vsel %vm564_vm6, %v11421_v7, %v2533_v32  ;;  %v1676_v47 = vsel %vm11424_vm12, %v9543_v35, %v1675_v50  ;;  %v1809_v58 = vpop.permute.xlu0 %1808 }
 0x28a   : >> { %v2540_v15 = vsel %vm11423_vm3, %v9493_v24, %v2539_v10  ;;  %v1737_v53 = vpop.permute.xlu1 %1736  ;;  %1682 = vst.msk [vmem:[#allocation3 + $0x70] sm:$0x88] %vm9637_vm2, %v1676_v47  ;;  %v1813_v25 = vrot.slane %v1809_v58, 4 }
 0x28b   : >> { %2546 = vst.msk [vmem:[#allocation3 + $0xb8] sm:$0x88] %vm9637_vm2, %v2540_v15  ;;  %v1741_v38 = vrot.slane %v1737_v53, 4 }
 0x28c   : >> { %v1819_v24 = vsel %vm564_vm6, %v11426_v55, %v1813_v25 }
 0x28d   : >> { %v1747_v23 = vsel %vm564_vm6, %v11425_v45, %v1741_v38  ;;  %v1820_v52 = vsel %vm11428_vm13, %v9563_v12, %v1819_v24  ;;  %v1953_v60 = vpop.permute.xlu0 %1952 }
 0x28e   : >> { %v1748_v35 = vsel %vm11427_vm5, %v9541_v41, %v1747_v23  ;;  %v1881_v34 = vpop.permute.xlu1 %1880  ;;  %1826 = vst.msk [vmem:[#allocation3 + $0x88] sm:$0x22] %vm9521_vm1, %v1820_v52  ;;  %v1957_v26 = vrot.slane %v1953_v60, 4 }
 0x28f   : >> { %1754 = vst.msk [vmem:[#allocation3 + $0x88] sm:$0x11] %vm8195_vm4, %v1748_v35  ;;  %v1885_v21 = vrot.slane %v1881_v34, 4  ;;  %vm11435_vm4 = vcmask 834560  }
 0x290   : >> { %v1963_v41 = vsel %vm564_vm6, %v11432_v56, %v1957_v26 }
 0x291   : >> { %v1891_v8 = vsel %vm564_vm6, %v11430_v43, %v1885_v21  ;;  %v1964_v39 = vsel %vm11434_vm8, %v11431_v40, %v1963_v41 }
 0x292   : >> { %v1892_v12 = vsel %vm11433_vm10, %v11429_v37, %v1891_v8  ;;  %v7434_v62 = vld [vmem:[#allocation3 + $0xa0] ss:$24 sps:$4 sm:$0xff]   ;;  %v7436_v22 = vld [vmem:[#allocation3 + $0xa4] ss:$24 sps:$4 sm:$0xff]   ;;  %1970 = vst.msk [vmem:[#allocation3 + $0x88] sm:$0x88] %vm9637_vm2, %v1964_v39  ;;  %vm11437_vm2 = vmmov %vm11435_vm4 }
 0x293   : >> { %1898 = vst.msk [vmem:[#allocation3 + $0x88] sm:$0x44] %vm9509_vm9, %v1892_v12  ;;  %4327 = vmatprep.subr.bf16.mxu0 %v7436_v22  ;;  %vm5202_vm10 = vcmask 1045504  }
 0x294   : >> { %4328 = vmatpush1.bf16.msra.mxu0 %v7434_v62 }
 0x29a   : >> { %v7437_v42 = vld [vmem:[#allocation3 + $0x70] ss:$24 sps:$4 sm:$0xff]   ;;  %v7439_v18 = vld [vmem:[#allocation3 + $0x74] ss:$24 sps:$4 sm:$0xff]   ;;  %v10096_v27 = vpop.permute.xlu0 %3969 }
 0x29b   : >> { %4329 = vmatprep.subr.bf16.mxu0 %v7439_v18 }
 0x29c   : >> { %4330 = vmatpush1.bf16.msra.mxu0 %v7437_v42 }
 0x29d   : >> { %4331 = vmatprep.subr.bf16.mxu0 %v7442_v44 }
 0x2a0   : >> { %4332 = vmatpush1.bf16.msra.mxu0 %v7440_v48 }
 0x2a1   : >> { %4333 = vmatprep.subr.bf16.mxu0 %v7445_v6 }
 0x2a4   : >> { %4334 = vmatpush1.bf16.msra.mxu0 %v7443_v17 }
 0x2a5   : >> { %7068 = vmatprep.subr.mxu0 %v9570_v29 }
 0x2a7   : >> { %6746 = vmatmul.mubr.msk.bf16.vlgmr.msra.gmra.mxu0 %vm11435_vm4, %v7650_v20 }
 0x2a8   : >> { %4361 = vmatprep.mubr.bf16.mxu0 %v11230_v9  ;;  %7069 = vmatpush3.msra.mxu0 %v9570_v29  ;;  %v10089_v9 = vpop.permute.xlu1 %3964 }
 0x2a9   : >> { %7070 = vmatprep.subr.mxu0 %v11436_v19 }
 0x2aa   : >> { %7071 = vmatpush3.msra.mxu0 %v11436_v19 }
 0x2ab   : >> { %7072 = vmatprep.subr.mxu0 %v9598_v3 }
 0x2ac   : >> { %7073 = vmatpush3.msra.mxu0 %v9598_v3  ;;  %v10107_v15 = vpop.permute.xlu1 %3974 }
 0x2ad   : >> { %7074 = vmatprep.subr.mxu0 %v9652_v36 }
 0x2ae   : >> { %7075 = vmatpush3.msra.mxu0 %v9652_v36 }
 0x2af   : >> { %6747 = vmatmul.mubr.msk.bf16.gmra.mxu0 %vm11437_vm2, %v7651_v4  ;;  %7076 = vmatprep.subr.mxu0 %v9667_v30 }
 0x2b0   : >> { %7077 = vmatpush3.msra.mxu0 %v9667_v30  ;;  %v10113_v23 = vpop.permute.xlu1 %3979 }
 0x2b1   : >> { %7078 = vmatprep.subr.mxu0 %v9706_v61 }
 0x2b2   : >> { %7079 = vmatpush3.msra.mxu0 %v9706_v61 }
 0x2b3   : >> { %7080 = vmatprep.subr.mxu0 %v9789_v2 }
 0x2b4   : >> { %7081 = vmatpush3.msra.mxu0 %v9789_v2 }
 0x2b5   : >> { %7082 = vmatprep.subr.mxu0 %v9794_v11 }
 0x2b6   : >> { %7083 = vmatpush3.msra.mxu0 %v9794_v11 }
 0x2b7   : >> { %7084 = vmatprep.subr.mxu0 %v9807_v1 }
 0x2b8   : >> { %7085 = vmatpush3.msra.mxu0 %v9807_v1 }
 0x2b9   : >> { %7086 = vmatprep.subr.mxu0 %v9822_v49 }
 0x2ba   : >> { %7087 = vmatpush3.msra.mxu0 %v9822_v49 }
 0x2bb   : >> { %7088 = vmatprep.subr.mxu0 %v9838_v5  ;;  %v4247_v57 = vpop.f32.mrf.mxu0 }
 0x2bc   : >> { %7089 = vmatpush3.msra.mxu0 %v9838_v5  ;;  %v4248_v33 = vadd.f32 %v4247_v57, %v10089_v9 }
 0x2bd   : >> { %7090 = vmatprep.subr.mxu0 %v9853_v14  ;;  %v4249_v16 = vpop.f32.mrf.mxu0 }
 0x2be   : >> { %7091 = vmatpush3.msra.mxu0 %v9853_v14  ;;  %v4396_v31 = vmin.f32 %v4248_v33, 0.0  ;;  %v4250_v0 = vadd.f32 %v4249_v16, %v10089_v9  ;;  %vm4372_vm9 = vcmp.gt.f32.partialorder %v4248_v33, 0.0 }
 0x2bf   : >> { %7092 = vmatprep.subr.mxu0 %v9868_v13  ;;  %v4251_v63 = vpop.f32.mrf.mxu0 }
 0x2c0   : >> { %7093 = vmatpush3.msra.mxu0 %v9868_v13  ;;  %v4252_v32 = vadd.f32 %v4251_v63, %v10096_v27  ;;  %v4420_v54 = vmul.f32 1.442695, %v4396_v31  ;;  %v4397_v7 = vmin.f32 %v4250_v0, 0.0  ;;  %vm4373_vm1 = vcmp.gt.f32.partialorder %v4250_v0, 0.0 }
 0x2c1   : >> { %7094 = vmatprep.subr.mxu0 %v9883_v59  ;;  %v4253_v10 = vpop.f32.mrf.mxu0 }
 0x2c2   : >> { %7095 = vmatpush3.msra.mxu0 %v9883_v59  ;;  %v4402_v28 = vmin.f32 %v4252_v32, 0.0  ;;  %v4254_v50 = vadd.f32 %v4253_v10, %v10096_v27  ;;  %7548 = vpow2.f32 %v4420_v54  ;;  %v4422_v53 = vmul.f32 1.442695, %v4397_v7  ;;  %v10208_v54 = vld [vmem:[%s11314_s19 + $0x78] sm:$0xff] }
 0x2c3   : >> { %7096 = vmatprep.subr.mxu0 %v9899_v46  ;;  %vm4378_vm7 = vcmp.gt.f32.partialorder %v4252_v32, 0.0 }
 0x2c4   : >> { %v4257_v47 = vpop.f32.mrf.mxu0  ;;  %7097 = vmatpush3.msra.mxu0 %v9899_v46  ;;  %v4432_v58 = vmul.f32 1.442695, %v4402_v28  ;;  %v4403_v38 = vmin.f32 %v4254_v50, 0.0  ;;  %7550 = vpow2.f32 %v4422_v53  ;;  %vm4379_vm11 = vcmp.gt.f32.partialorder %v4254_v50, 0.0 }
 0x2c5   : >> { %7098 = vmatprep.subr.mxu0 %v9914_v51  ;;  %v10116_v24 = vadd.f32 %v4257_v47, %v10107_v15 }
 0x2c6   : >> { %v4259_v25 = vpop.f32.mrf.mxu0  ;;  %7099 = vmatpush3.msra.mxu0 %v9914_v51  ;;  %7552 = vpow2.f32 %v4432_v58  ;;  %v4434_v45 = vmul.f32 1.442695, %v4403_v38 }
 0x2c7   : >> { %7144 = vmatprep.subr.mxu0 %v9570_v29  ;;  %v4408_v34 = vmin.f32 %v10116_v24, 0.0  ;;  %v10123_v60 = vadd.f32 %v4259_v25, %v10107_v15  ;;  %vm4384_vm3 = vcmp.gt.f32.partialorder %v10116_v24, 0.0 }
 0x2c8   : >> { %7554 = vpow2.f32 %v4434_v45  ;;  %v4261_v55 = vpop.f32.mrf.mxu0 }
 0x2c9   : >> { %v10119_v35 = vadd.f32 %v4261_v55, %v10113_v23  ;;  %v4444_v41 = vmul.f32 1.442695, %v4408_v34  ;;  %v4409_v39 = vmin.f32 %v10123_v60, 0.0  ;;  %vm4385_vm5 = vcmp.gt.f32.partialorder %v10123_v60, 0.0 }
 0x2ca   : >> { %v4263_v37 = vpop.f32.mrf.mxu0 }
 0x2cb   : >> { %v4414_v21 = vmin.f32 %v10119_v35, 0.0  ;;  %v10127_v40 = vadd.f32 %v4263_v37, %v10113_v23  ;;  %7556 = vpow2.f32 %v4444_v41  ;;  %v4446_v20 = vmul.f32 1.442695, %v4409_v39 }
 0x2cc   : >> { %vm4390_vm12 = vcmp.gt.f32.partialorder %v10119_v35, 0.0 }
 0x2cd   : >> { %v4456_v62 = vmul.f32 1.442695, %v4414_v21  ;;  %v4415_v6 = vmin.f32 %v10127_v40, 0.0  ;;  %vm4391_vm13 = vcmp.gt.f32.partialorder %v10127_v40, 0.0 }
 0x2cf   : >> { %v7549_v52 = vpop.eup %7548  ;;  %7558 = vpow2.f32 %v4456_v62  ;;  %v4458_v4 = vmul.f32 1.442695, %v4415_v6 }
 0x2d0   : >> { %v6748_v26 = vadd.f32 -1.0, %v7549_v52  ;;  %7560 = vpow2.f32 %v4446_v20 }
 0x2d1   : >> { %v7551_v43 = vpop.eup %7550  ;;  %7562 = vpow2.f32 %v4458_v4 }
 0x2d2   : >> { %v4492_v8 = vsel %vm4372_vm9, %v4248_v33, %v6748_v26  ;;  %v6749_v12 = vadd.f32 -1.0, %v7551_v43 }
 0x2d3   : >> { %v7553_v56 = vpop.eup %7552  ;;  %7062 = vmatprep.mubr.f32.mxu1 %v4492_v8 }
 0x2d4   : >> { %v6754_v22 = vadd.f32 -1.0, %v7553_v56  ;;  %v4493_v18 = vsel %vm4373_vm1, %v4250_v0, %v6749_v12 }
 0x2d5   : >> { %v7555_v42 = vpop.eup %7554  ;;  %7100 = vmatprep.mubr.f32.mxu0 %v4493_v18 }
 0x2d6   : >> { %v6755_v44 = vadd.f32 -1.0, %v7555_v42  ;;  %v4498_v48 = vsel %vm4378_vm7, %v4252_v32, %v6754_v22  ;;  %v10202_v32 = vld [vmem:[%s11314_s19 + $0x68] sm:$0x3f] }
 0x2d7   : >> { %7063 = vmatmul.mubr.f32.vlgmr.msra.gmra.mxu1 %v4498_v48 }
 0x2d8   : >> { %v4499_v17 = vsel %vm4379_vm11, %v4254_v50, %v6755_v44  ;;  %7107 = vmatpush3.msra.mxu1 %v9570_v29 }
 0x2d9   : >> { %7108 = vmatprep.subr.mxu1 %v11436_v19  ;;  %7101 = vmatmul.mubr.f32.vlgmr.msra.gmra.mxu0 %v4499_v17 }
 0x2da   : >> { %7109 = vmatpush3.msra.mxu1 %v11436_v19  ;;  %7145 = vmatpush3.msra.mxu0 %v9570_v29  ;;  %v7557_v29 = vpop.eup %7556 }
 0x2db   : >> { %7110 = vmatprep.subr.mxu1 %v9598_v3  ;;  %7146 = vmatprep.subr.mxu0 %v11436_v19 }
 0x2dc   : >> { %7111 = vmatpush3.msra.mxu1 %v9598_v3  ;;  %7147 = vmatpush3.msra.mxu0 %v11436_v19 }
 0x2dd   : >> { %7112 = vmatprep.subr.mxu1 %v9652_v36  ;;  %7148 = vmatprep.subr.mxu0 %v9598_v3 }
 0x2de   : >> { %7113 = vmatpush3.msra.mxu1 %v9652_v36  ;;  %7149 = vmatpush3.msra.mxu0 %v9598_v3  ;;  %v7559_v3 = vpop.eup %7558 }
 0x2df   : >> { %7114 = vmatprep.subr.mxu1 %v9667_v30  ;;  %7150 = vmatprep.subr.mxu0 %v9652_v36 }
 0x2e0   : >> { %7115 = vmatpush3.msra.mxu1 %v9667_v30  ;;  %7151 = vmatpush3.msra.mxu0 %v9652_v36  ;;  %v6760_v36 = vadd.f32 -1.0, %v7557_v29 }
 0x2e1   : >> { %7116 = vmatprep.subr.mxu1 %v9706_v61  ;;  %7152 = vmatprep.subr.mxu0 %v9667_v30 }
 0x2e2   : >> { %7117 = vmatpush3.msra.mxu1 %v9706_v61  ;;  %7153 = vmatpush3.msra.mxu0 %v9667_v30  ;;  %v6766_v30 = vadd.f32 -1.0, %v7559_v3  ;;  %v4504_v57 = vsel %vm4384_vm3, %v10116_v24, %v6760_v36 }
 0x2e3   : >> { %7118 = vmatprep.subr.mxu1 %v9789_v2  ;;  %7154 = vmatprep.subr.mxu0 %v9706_v61 }
 0x2e4   : >> { %7119 = vmatpush3.msra.mxu1 %v9789_v2  ;;  %7155 = vmatpush3.msra.mxu0 %v9706_v61  ;;  %v7561_v61 = vpop.eup %7560  ;;  %v4510_v33 = vsel %vm4390_vm12, %v10119_v35, %v6766_v30 }
 0x2e5   : >> { %7120 = vmatprep.subr.mxu1 %v9794_v11  ;;  %7156 = vmatprep.subr.mxu0 %v9789_v2  ;;  %v7563_v19 = vpop.eup %7562  ;;  %v6761_v16 = vadd.f32 -1.0, %v7561_v61 }
 0x2e6   : >> { %7121 = vmatpush3.msra.mxu1 %v9794_v11  ;;  %7157 = vmatpush3.msra.mxu0 %v9789_v2  ;;  %v6767_v31 = vadd.f32 -1.0, %v7563_v19 }
 0x2e7   : >> { %7122 = vmatprep.subr.mxu1 %v9807_v1  ;;  %7158 = vmatprep.subr.mxu0 %v9794_v11  ;;  %v4505_v0 = vsel %vm4385_vm5, %v10123_v60, %v6761_v16 }
 0x2e8   : >> { %7123 = vmatpush3.msra.mxu1 %v9807_v1  ;;  %7159 = vmatpush3.msra.mxu0 %v9794_v11  ;;  %v4511_v63 = vsel %vm4391_vm13, %v10127_v40, %v6767_v31 }
 0x2e9   : >> { %7124 = vmatprep.subr.mxu1 %v9822_v49  ;;  %7160 = vmatprep.subr.mxu0 %v9807_v1 }
 0x2ea   : >> { %7125 = vmatpush3.msra.mxu1 %v9822_v49  ;;  %7161 = vmatpush3.msra.mxu0 %v9807_v1 }
 0x2eb   : >> { %7126 = vmatprep.subr.mxu1 %v9838_v5  ;;  %7162 = vmatprep.subr.mxu0 %v9822_v49 }
 0x2ec   : >> { %7127 = vmatpush3.msra.mxu1 %v9838_v5  ;;  %7163 = vmatpush3.msra.mxu0 %v9822_v49 }
 0x2ed   : >> { %7128 = vmatprep.subr.mxu1 %v9853_v14  ;;  %7164 = vmatprep.subr.mxu0 %v9838_v5 }
 0x2ee   : >> { %7065 = vmatprep.mubr.f32.mxu1 %v4504_v57  ;;  %7129 = vmatpush3.msra.mxu1 %v9853_v14 }
 0x2ef   : >> { %7165 = vmatpush3.msra.mxu0 %v9838_v5  ;;  %7066 = vmatmul.mubr.f32.gmra.mxu1 %v4510_v33 }
 0x2f0   : >> { %7130 = vmatprep.subr.mxu1 %v9868_v13  ;;  %7166 = vmatprep.subr.mxu0 %v9853_v14 }
 0x2f1   : >> { %7131 = vmatpush3.msra.mxu1 %v9868_v13  ;;  %7167 = vmatpush3.msra.mxu0 %v9853_v14 }
 0x2f2   : >> { %7132 = vmatprep.subr.mxu1 %v9883_v59  ;;  %7168 = vmatprep.subr.mxu0 %v9868_v13 }
 0x2f3   : >> { %7103 = vmatprep.mubr.f32.mxu0 %v4505_v0  ;;  %7133 = vmatpush3.msra.mxu1 %v9883_v59 }
 0x2f4   : >> { %7169 = vmatpush3.msra.mxu0 %v9868_v13  ;;  %7134 = vmatprep.subr.mxu1 %v9899_v46 }
 0x2f5   : >> { %7104 = vmatmul.mubr.f32.gmra.mxu0 %v4511_v63  ;;  %7170 = vmatprep.subr.mxu0 %v9883_v59  ;;  %v7653_v63 = vld [vmem:[%s11314_s19 + $0x70] sm:$0xff] }
 0x2f6   : >> { %7135 = vmatpush3.msra.mxu1 %v9899_v46  ;;  %7171 = vmatpush3.msra.mxu0 %v9883_v59 }
 0x2f7   : >> { %7136 = vmatprep.subr.mxu1 %v9914_v51  ;;  %7172 = vmatprep.subr.mxu0 %v9899_v46 }
 0x2f8   : >> { %7137 = vmatpush3.msra.mxu1 %v9914_v51  ;;  %7173 = vmatpush3.msra.mxu0 %v9899_v46 }
 0x2f9   : >> { %7174 = vmatprep.subr.mxu0 %v9914_v51  ;;  %7182 = vmatprep.subr.mxu1 %v10208_v54 }
 0x2fa   : >> { %7175 = vmatpush3.msra.mxu0 %v9914_v51 }
 0x2fb   : >> { %7220 = vmatprep.subr.msk.mxu0 %vm5202_vm10, %v10202_v32 }
 0x320   : >> { %v4300_v7 = vpop.f32.mrf.mxu0 }
 0x321   : >> { %v4301_v10 = vadd.f32 %v4300_v7, %v10089_v9 }
 0x322   : >> { %v4302_v28 = vpop.f32.mrf.mxu0 }
 0x323   : >> { %v4398_v50 = vmin.f32 %v4301_v10, 0.0  ;;  %v4303_v47 = vadd.f32 %v4302_v28, %v10089_v9  ;;  %vm4374_vm8 = vcmp.gt.f32.partialorder %v4301_v10, 0.0 }
 0x324   : >> { %v4304_v53 = vpop.f32.mrf.mxu0 }
 0x325   : >> { %v4424_v58 = vmul.f32 1.442695, %v4398_v50  ;;  %v4399_v38 = vmin.f32 %v4303_v47, 0.0  ;;  %v4305_v25 = vadd.f32 %v4304_v53, %v10096_v27  ;;  %vm4375_vm4 = vcmp.gt.f32.partialorder %v4303_v47, 0.0  ;;  %v7654_v50 = vld [vmem:[%s11314_s19 + $0x68] sm:$0xff] }
 0x326   : >> { %v4306_v45 = vpop.f32.mrf.mxu0 }
 0x327   : >> { %7564 = vpow2.f32 %v4424_v58  ;;  %v4426_v55 = vmul.f32 1.442695, %v4399_v38  ;;  %v4404_v24 = vmin.f32 %v4305_v25, 0.0  ;;  %v4307_v35 = vadd.f32 %v4306_v45, %v10096_v27  ;;  %v7655_v58 = vld [vmem:[%s11314_s19 + $0x60] sm:$0xff]  ;;  %v7656_v45 = vld [vmem:[%s11314_s19 + $0x58] sm:$0xff] }
 0x328   : >> { %v4310_v52 = vpop.f32.mrf.mxu0  ;;  %vm4380_vm2 = vcmp.gt.f32.partialorder %v4305_v25, 0.0 }
 0x329   : >> { %7566 = vpow2.f32 %v4426_v55  ;;  %v4436_v34 = vmul.f32 1.442695, %v4404_v24  ;;  %v4311_v60 = vadd.f32 %v4310_v52, %v10107_v15  ;;  %v4405_v21 = vmin.f32 %v4307_v35, 0.0  ;;  %v7657_v55 = vld [vmem:[%s11314_s19 + $0x50] sm:$0xff] }
 0x32a   : >> { %v4312_v26 = vpop.f32.mrf.mxu0  ;;  %vm4381_vm9 = vcmp.gt.f32.partialorder %v4307_v35, 0.0 }
 0x32b   : >> { %7568 = vpow2.f32 %v4436_v34  ;;  %v4410_v37 = vmin.f32 %v4311_v60, 0.0  ;;  %v4313_v43 = vadd.f32 %v4312_v26, %v10107_v15  ;;  %v4438_v8 = vmul.f32 1.442695, %v4405_v21 }
 0x32c   : >> { %v4314_v40 = vpop.f32.mrf.mxu0  ;;  %vm4386_vm1 = vcmp.gt.f32.partialorder %v4311_v60, 0.0 }
 0x32d   : >> { %v4448_v56 = vmul.f32 1.442695, %v4410_v37  ;;  %v4411_v41 = vmin.f32 %v4313_v43, 0.0  ;;  %v4315_v12 = vadd.f32 %v4314_v40, %v10113_v23  ;;  %7570 = vpow2.f32 %v4438_v8 }
 0x32e   : >> { %v4316_v39 = vpop.f32.mrf.mxu0  ;;  %vm4387_vm7 = vcmp.gt.f32.partialorder %v4313_v43, 0.0 }
 0x32f   : >> { %7572 = vpow2.f32 %v4448_v56  ;;  %v4450_v62 = vmul.f32 1.442695, %v4411_v41  ;;  %v4416_v22 = vmin.f32 %v4315_v12, 0.0  ;;  %v4317_v42 = vadd.f32 %v4316_v39, %v10113_v23 }
 0x330   : >> { %vm4392_vm11 = vcmp.gt.f32.partialorder %v4315_v12, 0.0 }
 0x331   : >> { %7574 = vpow2.f32 %v4450_v62  ;;  %v4460_v18 = vmul.f32 1.442695, %v4416_v22  ;;  %v4417_v44 = vmin.f32 %v4317_v42, 0.0  ;;  %vm4393_vm3 = vcmp.gt.f32.partialorder %v4317_v42, 0.0 }
 0x333   : >> { %7576 = vpow2.f32 %v4460_v18  ;;  %v4462_v48 = vmul.f32 1.442695, %v4417_v44 }
 0x334   : >> { %v7565_v6 = vpop.eup %7564 }
 0x335   : >> { %7578 = vpow2.f32 %v4462_v48  ;;  %v6750_v17 = vadd.f32 -1.0, %v7565_v6 }
 0x336   : >> { %v7567_v20 = vpop.eup %7566 }
 0x337   : >> { %v4494_v4 = vsel %vm4374_vm8, %v4301_v10, %v6750_v17  ;;  %v6751_v29 = vadd.f32 -1.0, %v7567_v20 }
 0x338   : >> { %v7569_v3 = vpop.eup %7568  ;;  %7138 = vmatprep.mubr.f32.mxu1 %v4494_v4 }
 0x339   : >> { %v6756_v36 = vadd.f32 -1.0, %v7569_v3  ;;  %v4495_v30 = vsel %vm4375_vm4, %v4303_v47, %v6751_v29 }
 0x33a   : >> { %7176 = vmatprep.mubr.f32.mxu0 %v4495_v30  ;;  %v7571_v61 = vpop.eup %7570 }
 0x33b   : >> { %v4500_v19 = vsel %vm4380_vm2, %v4305_v25, %v6756_v36  ;;  %v6757_v33 = vadd.f32 -1.0, %v7571_v61 }
 0x33c   : >> { %v7573_v57 = vpop.eup %7572  ;;  %7139 = vmatmul.mubr.f32.vlgmr.msra.gmra.mxu1 %v4500_v19 }
 0x33d   : >> { %v6762_v16 = vadd.f32 -1.0, %v7573_v57  ;;  %7183 = vmatpush3.msra.mxu1 %v10208_v54  ;;  %v4501_v0 = vsel %vm4381_vm9, %v4307_v35, %v6757_v33 }
 0x33e   : >> { %v7575_v31 = vpop.eup %7574  ;;  %7184 = vmatprep.subr.mxu1 %v7653_v63  ;;  %7177 = vmatmul.mubr.f32.vlgmr.msra.gmra.mxu0 %v4501_v0 }
 0x33f   : >> { %v4506_v7 = vsel %vm4386_vm1, %v4311_v60, %v6762_v16  ;;  %v6763_v10 = vadd.f32 -1.0, %v7575_v31  ;;  %7185 = vmatpush3.msra.mxu1 %v7653_v63  ;;  %7221 = vmatpush3.msk.msra.mxu0 %vm5202_vm10, %v10202_v32  ;;  %vm11438_vm10 = vcmask 900096  }
 0x340   : >> { %v7577_v28 = vpop.eup %7576  ;;  %7141 = vmatprep.mubr.f32.mxu1 %v4506_v7  ;;  %7186 = vmatprep.subr.mxu1 %v7654_v50  ;;  %vm11439_vm2 = vmmov %vm11438_vm10 }
 0x341   : >> { %v4507_v54 = vsel %vm4387_vm7, %v4313_v43, %v6763_v10  ;;  %v6768_v47 = vadd.f32 -1.0, %v7577_v28  ;;  %7187 = vmatpush3.msra.mxu1 %v7654_v50  ;;  %7222 = vmatprep.subr.mxu0 %v7655_v58  ;;  %vm11440_vm1 = vmmov %vm11439_vm2 }
 0x342   : >> { %v7579_v53 = vpop.eup %7578  ;;  %7179 = vmatprep.mubr.f32.mxu0 %v4507_v54  ;;  %7188 = vmatprep.subr.mxu1 %v7655_v58 }
 0x343   : >> { %v4512_v38 = vsel %vm4392_vm11, %v4315_v12, %v6768_v47  ;;  %v6769_v25 = vadd.f32 -1.0, %v7579_v53  ;;  %7189 = vmatpush3.msra.mxu1 %v7655_v58  ;;  %7223 = vmatpush3.msra.mxu0 %v7655_v58 }
 0x344   : >> { %7142 = vmatmul.mubr.f32.gmra.mxu1 %v4512_v38  ;;  %7190 = vmatprep.subr.mxu1 %v7656_v45 }
 0x345   : >> { %v4513_v32 = vsel %vm4393_vm3, %v4317_v42, %v6769_v25  ;;  %7191 = vmatpush3.msra.mxu1 %v7656_v45  ;;  %7224 = vmatprep.subr.mxu0 %v7656_v45  ;;  %vm11441_vm3 = vmmov %vm11440_vm1 }
 0x346   : >> { %7180 = vmatmul.mubr.f32.gmra.mxu0 %v4513_v32  ;;  %7192 = vmatprep.subr.mxu1 %v7657_v55 }
 0x347   : >> { %7193 = vmatpush3.msra.mxu1 %v7657_v55  ;;  %7225 = vmatpush3.msra.mxu0 %v7656_v45 }
 0x348   : >> { %7194 = vmatprep.subr.mxu1 %v9789_v2  ;;  %7226 = vmatprep.subr.mxu0 %v7657_v55 }
 0x349   : >> { %7195 = vmatpush3.msra.mxu1 %v9789_v2  ;;  %7227 = vmatpush3.msra.mxu0 %v7657_v55 }
 0x34a   : >> { %7196 = vmatprep.subr.mxu1 %v9794_v11  ;;  %7228 = vmatprep.subr.mxu0 %v9789_v2 }
 0x34b   : >> { %7197 = vmatpush3.msra.mxu1 %v9794_v11  ;;  %7229 = vmatpush3.msra.mxu0 %v9789_v2 }
 0x34c   : >> { %7198 = vmatprep.subr.mxu1 %v9807_v1  ;;  %7230 = vmatprep.subr.mxu0 %v9794_v11 }
 0x34d   : >> { %7199 = vmatpush3.msra.mxu1 %v9807_v1  ;;  %7231 = vmatpush3.msra.mxu0 %v9794_v11 }
 0x34e   : >> { %7200 = vmatprep.subr.mxu1 %v9822_v49  ;;  %7232 = vmatprep.subr.mxu0 %v9807_v1 }
 0x34f   : >> { %7201 = vmatpush3.msra.mxu1 %v9822_v49  ;;  %7233 = vmatpush3.msra.mxu0 %v9807_v1 }
 0x350   : >> { %7202 = vmatprep.subr.mxu1 %v9838_v5  ;;  %7234 = vmatprep.subr.mxu0 %v9822_v49 }
 0x351   : >> { %7203 = vmatpush3.msra.mxu1 %v9838_v5  ;;  %7235 = vmatpush3.msra.mxu0 %v9822_v49 }
 0x352   : >> { %7204 = vmatprep.subr.mxu1 %v9853_v14  ;;  %7236 = vmatprep.subr.mxu0 %v9838_v5 }
 0x353   : >> { %7205 = vmatpush3.msra.mxu1 %v9853_v14  ;;  %7237 = vmatpush3.msra.mxu0 %v9838_v5 }
 0x354   : >> { %7206 = vmatprep.subr.mxu1 %v9868_v13  ;;  %7238 = vmatprep.subr.mxu0 %v9853_v14 }
 0x355   : >> { %7207 = vmatpush3.msra.mxu1 %v9868_v13  ;;  %7239 = vmatpush3.msra.mxu0 %v9853_v14 }
 0x356   : >> { %7208 = vmatprep.subr.mxu1 %v9883_v59  ;;  %7240 = vmatprep.subr.mxu0 %v9868_v13 }
 0x357   : >> { %7209 = vmatpush3.msra.mxu1 %v9883_v59  ;;  %7241 = vmatpush3.msra.mxu0 %v9868_v13 }
 0x358   : >> { %7210 = vmatprep.subr.mxu1 %v9899_v46  ;;  %7242 = vmatprep.subr.mxu0 %v9883_v59 }
 0x359   : >> { %7211 = vmatpush3.msra.mxu1 %v9899_v46  ;;  %7243 = vmatpush3.msra.mxu0 %v9883_v59 }
 0x35a   : >> { %7212 = vmatprep.subr.mxu1 %v9914_v51  ;;  %7244 = vmatprep.subr.mxu0 %v9899_v46 }
 0x35b   : >> { %7213 = vmatpush3.msra.mxu1 %v9914_v51  ;;  %7245 = vmatpush3.msra.mxu0 %v9899_v46 }
 0x35c   : >> { %7246 = vmatprep.subr.mxu0 %v9914_v51 }
 0x35d   : >> { %7247 = vmatpush3.msra.mxu0 %v9914_v51 }
 0x367   : >> { %v4353_v2 = vpop.f32.mrf.mxu0 }
 0x368   : >> { %v4354_v11 = vadd.f32 %v4353_v2, %v10089_v9 }
 0x369   : >> { %v4355_v1 = vpop.f32.mrf.mxu0 }
 0x36a   : >> { %v4400_v49 = vmin.f32 %v4354_v11, 0.0  ;;  %v4356_v5 = vadd.f32 %v4355_v1, %v10089_v9  ;;  %vm4376_vm12 = vcmp.gt.f32.partialorder %v4354_v11, 0.0 }
 0x36b   : >> { %v4357_v14 = vpop.f32.mrf.mxu0 }
 0x36c   : >> { %v4428_v13 = vmul.f32 1.442695, %v4400_v49  ;;  %v4401_v59 = vmin.f32 %v4356_v5, 0.0  ;;  %v4358_v24 = vadd.f32 %v4357_v14, %v10096_v27  ;;  %vm4377_vm5 = vcmp.gt.f32.partialorder %v4356_v5, 0.0 }
 0x36d   : >> { %v4359_v35 = vpop.f32.mrf.mxu0 }
 0x36e   : >> { %7580 = vpow2.f32 %v4428_v13  ;;  %v4430_v52 = vmul.f32 1.442695, %v4401_v59  ;;  %v4406_v46 = vmin.f32 %v4358_v24, 0.0  ;;  %v4360_v34 = vadd.f32 %v4359_v35, %v10096_v27 }
 0x36f   : >> { %v4363_v60 = vpop.f32.mrf.mxu0  ;;  %vm4382_vm13 = vcmp.gt.f32.partialorder %v4358_v24, 0.0 }
 0x370   : >> { %7582 = vpow2.f32 %v4430_v52  ;;  %v4440_v51 = vmul.f32 1.442695, %v4406_v46  ;;  %v4364_v21 = vadd.f32 %v4363_v60, %v10107_v15  ;;  %v4407_v26 = vmin.f32 %v4360_v34, 0.0 }
 0x371   : >> { %v4365_v37 = vpop.f32.mrf.mxu0  ;;  %vm4383_vm8 = vcmp.gt.f32.partialorder %v4360_v34, 0.0 }
 0x372   : >> { %7584 = vpow2.f32 %v4440_v51  ;;  %v4412_v9 = vmin.f32 %v4364_v21, 0.0  ;;  %v4366_v43 = vadd.f32 %v4365_v37, %v10107_v15  ;;  %v4442_v8 = vmul.f32 1.442695, %v4407_v26 }
 0x373   : >> { %v4367_v40 = vpop.f32.mrf.mxu0  ;;  %vm4388_vm4 = vcmp.gt.f32.partialorder %v4364_v21, 0.0 }
 0x374   : >> { %v4452_v56 = vmul.f32 1.442695, %v4412_v9  ;;  %v4413_v41 = vmin.f32 %v4366_v43, 0.0  ;;  %v4368_v12 = vadd.f32 %v4367_v40, %v10113_v23  ;;  %7586 = vpow2.f32 %v4442_v8 }
 0x375   : >> { %v4369_v39 = vpop.f32.mrf.mxu0  ;;  %vm4389_vm9 = vcmp.gt.f32.partialorder %v4366_v43, 0.0 }
 0x376   : >> { %7588 = vpow2.f32 %v4452_v56  ;;  %v4454_v27 = vmul.f32 1.442695, %v4413_v41  ;;  %v4418_v62 = vmin.f32 %v4368_v12, 0.0  ;;  %v4370_v22 = vadd.f32 %v4369_v39, %v10113_v23 }
 0x377   : >> { %vm4394_vm7 = vcmp.gt.f32.partialorder %v4368_v12, 0.0 }
 0x378   : >> { %7590 = vpow2.f32 %v4454_v27  ;;  %v4464_v42 = vmul.f32 1.442695, %v4418_v62  ;;  %v4419_v18 = vmin.f32 %v4370_v22, 0.0  ;;  %vm4395_vm11 = vcmp.gt.f32.partialorder %v4370_v22, 0.0 }
 0x37a   : >> { %7592 = vpow2.f32 %v4464_v42  ;;  %v4466_v44 = vmul.f32 1.442695, %v4419_v18 }
 0x37b   : >> { %v7581_v48 = vpop.eup %7580 }
 0x37c   : >> { %7594 = vpow2.f32 %v4466_v44  ;;  %v6752_v15 = vadd.f32 -1.0, %v7581_v48 }
 0x37d   : >> { %v7583_v6 = vpop.eup %7582 }
 0x37e   : >> { %v4496_v17 = vsel %vm4376_vm12, %v4354_v11, %v6752_v15  ;;  %v6753_v20 = vadd.f32 -1.0, %v7583_v6  ;;  %vm4641_vm12 = vcmask 314424  }
 0x37f   : >> { %v7585_v4 = vpop.eup %7584  ;;  %7214 = vmatprep.mubr.f32.mxu1 %v4496_v17 }
 0x380   : >> { %v6758_v29 = vadd.f32 -1.0, %v7585_v4  ;;  %v4497_v3 = vsel %vm4377_vm5, %v4356_v5, %v6753_v20  ;;  %vm4771_vm5 = vcmask 576824  }
 0x381   : >> { %7248 = vmatprep.mubr.msk.f32.mxu0 %vm11438_vm10, %v4497_v3  ;;  %v7587_v23 = vpop.eup %7586  ;;  %vm5039_vm10 = vcmask 1044280  }
 0x382   : >> { %v4502_v36 = vsel %vm4382_vm13, %v4358_v24, %v6758_v29  ;;  %v6759_v61 = vadd.f32 -1.0, %v7587_v23  ;;  %vm4901_vm13 = vcmask 839224  }
 0x383   : >> { %v7589_v30 = vpop.eup %7588  ;;  %7215 = vmatmul.mubr.f32.vlgmr.msra.gmra.mxu1 %v4502_v36 }
 0x384   : >> { %v6764_v19 = vadd.f32 -1.0, %v7589_v30  ;;  %v4503_v33 = vsel %vm4383_vm8, %v4360_v34, %v6759_v61  ;;  %vm5040_vm8 = vcmask 56324  }
 0x385   : >> { %v7591_v57 = vpop.eup %7590  ;;  %7249 = vmatmul.mubr.msk.f32.vlgmr.msra.gmra.mxu0 %vm11439_vm2, %v4503_v33  ;;  %vm11444_vm2 = vcmask 842752  }
 0x386   : >> { %v4508_v16 = vsel %vm4388_vm4, %v4364_v21, %v6764_v19  ;;  %v6765_v31 = vadd.f32 -1.0, %v7591_v57  ;;  %vm10318_vm4 = vmor %vm5040_vm8, %vm5039_vm10  ;;  %vm11466_vm10 = vcmask 1031168  }
 0x387   : >> { %v7593_v0 = vpop.eup %7592  ;;  %7217 = vmatprep.mubr.f32.mxu1 %v4508_v16  ;;  %vm11467_vm8 = vmmov %vm11466_vm10 }
 0x388   : >> { %v4509_v63 = vsel %vm4389_vm9, %v4366_v43, %v6765_v31  ;;  %v6770_v7 = vadd.f32 -1.0, %v7593_v0  ;;  %vm11445_vm9 = vmmov %vm11444_vm2 }
 0x389   : >> { %v7595_v10 = vpop.eup %7594  ;;  %7251 = vmatprep.mubr.msk.f32.mxu0 %vm11440_vm1, %v4509_v63  ;;  %vm11446_vm1 = vmmov %vm11444_vm2 }
 0x38a   : >> { %v4514_v28 = vsel %vm4394_vm7, %v4368_v12, %v6770_v7  ;;  %v6771_v50 = vadd.f32 -1.0, %v7595_v10  ;;  %vm11447_vm7 = vmmov %vm11446_vm1 }
 0x38b   : >> { %7218 = vmatmul.mubr.f32.gmra.mxu1 %v4514_v28 }
 0x38c   : >> { %v4515_v54 = vsel %vm4395_vm11, %v4370_v22, %v6771_v50  ;;  %vm5315_vm11 = vcmask 535864  }
 0x38d   : >> { %7252 = vmatmul.mubr.msk.f32.gmra.mxu0 %vm11441_vm3, %v4515_v54  ;;  %vm5325_vm3 = vcmask 482308  }
 0x397   : >> { %v7064_v47 = vpop.f32.mrf.mxu1 }
 0x398   : >> { %v6889_v53 = vpack.c.bf16 %v7064_v47, %v7064_v47 }
 0x399   : >> { %v4598_v58 = vpop.f32.mrf.mxu1  ;;  %v7102_v38 = vpop.f32.mrf.mxu0 }
 0x39a   : >> { %v6888_v25 = vpack.c.bf16 %v4598_v58, %v4598_v58  ;;  %4631 = vrot.lane.b32.xlu1 %v6889_v53, %s7768_s18  ;;  %v6893_v45 = vpack.c.bf16 %v7102_v38, %v7102_v38 }
 0x39b   : >> { %v4728_v32 = vpop.f32.mrf.mxu0 }
 0x39c   : >> { %4629 = vrot.lane.b32.xlu0 %v6888_v25, %s7768_s18  ;;  %v6892_v55 = vpack.c.bf16 %v4728_v32, %v4728_v32 }
 0x39e   : >> { %4761 = vrot.lane.b32.xlu1 %v6893_v45, %s7769_s28 }
 0x3a0   : >> { %4759 = vrot.lane.b32.xlu0 %v6892_v55, %s7769_s28 }
 0x3af   : >> { %v7067_v2 = vpop.f32.mrf.mxu1 }
 0x3b0   : >> { %v6891_v11 = vpack.c.bf16 %v7067_v2, %v7067_v2 }
 0x3b1   : >> { %v4608_v1 = vpop.f32.mrf.mxu1 }
 0x3b2   : >> { %v6890_v49 = vpack.c.bf16 %v4608_v1, %v4608_v1  ;;  %4635 = vrot.lane.b32.xlu1 %v6891_v11, %s7768_s18 }
 0x3b4   : >> { %4633 = vrot.lane.b32.xlu0 %v6890_v49, %s7768_s18 }
 0x3b5   : >> { %v7105_v5 = vpop.f32.mrf.mxu0 }
 0x3b6   : >> { %v6895_v14 = vpack.c.bf16 %v7105_v5, %v7105_v5 }
 0x3b7   : >> { %v4738_v13 = vpop.f32.mrf.mxu0 }
 0x3b8   : >> { %v6894_v59 = vpack.c.bf16 %v4738_v13, %v4738_v13  ;;  %4765 = vrot.lane.b32.xlu1 %v6895_v14, %s7769_s28 }
 0x3ba   : >> { %4763 = vrot.lane.b32.xlu0 %v6894_v59, %s7769_s28  ;;  %v7542_v59 = vld [vmem:[%s11460_s9 + $0x24] ss:$16 sps:$4 sm:$0xff]  }
 0x3fc   : >> { %v7140_v24 = vpop.f32.mrf.mxu1 }
 0x3fd   : >> { %v6897_v35 = vpack.c.bf16 %v7140_v24, %v7140_v24 }
 0x3fe   : >> { %v4858_v52 = vpop.f32.mrf.mxu1  ;;  %v7178_v34 = vpop.f32.mrf.mxu0 }
 0x3ff   : >> { %v6896_v46 = vpack.c.bf16 %v4858_v52, %v4858_v52  ;;  %4891 = vrot.lane.b32.xlu1 %v6897_v35, %s7770_s26  ;;  %v6901_v60 = vpack.c.bf16 %v7178_v34, %v7178_v34 }
 0x400   : >> { %v4988_v51 = vpop.f32.mrf.mxu0 }
 0x401   : >> { %4889 = vrot.lane.b32.xlu0 %v6896_v46, %s7770_s26  ;;  %v6900_v21 = vpack.c.bf16 %v4988_v51, %v4988_v51  ;;  %v7535_v51 = vld [vmem:[%s11460_s9 + $0x4] ss:$16 sps:$4 sm:$0xff]  }
 0x402   : >> { %6248 = vmatprep.mubr.bf16.mxu1 %v7535_v51 }
 0x403   : >> { %5021 = vrot.lane.b32.xlu1 %v6901_v60, %s11182_s7 }
 0x404   : >> { %v7143_v26 = vpop.f32.mrf.mxu1 }
 0x405   : >> { %v6899_v37 = vpack.c.bf16 %v7143_v26, %v7143_v26  ;;  %5019 = vrot.lane.b32.xlu0 %v6900_v21, %s11182_s7  ;;  %v5848_v21 = vld [vmem:[%s11461_s21 + $0x8] sm:$0xff]  ;;  %v5847_v26 = vld [vmem:[%s11462_s25] sm:$0xff] }
 0x406   : >> { %v4868_v9 = vpop.f32.mrf.mxu1  ;;  %v7181_v43 = vpop.f32.mrf.mxu0 }
 0x407   : >> { %v6898_v8 = vpack.c.bf16 %v4868_v9, %v4868_v9  ;;  %4895 = vrot.lane.b32.xlu1 %v6899_v37, %s7770_s26  ;;  %v6903_v56 = vpack.c.bf16 %v7181_v43, %v7181_v43  ;;  %v7541_v37 = vld [vmem:[%s11460_s9 + $0xc] ss:$16 sps:$4 sm:$0xff]  }
 0x408   : >> { %v4998_v40 = vpop.f32.mrf.mxu0  ;;  %v5850_v9 = vld [vmem:[%s11462_s25 + $0x18] sm:$0xff] }
 0x409   : >> { %4893 = vrot.lane.b32.xlu0 %v6898_v8, %s7770_s26  ;;  %v6902_v41 = vpack.c.bf16 %v4998_v40, %v4998_v40  ;;  %v5849_v40 = vld [vmem:[%s11462_s25 + $0x10] sm:$0xff] }
 0x40b   : >> { %5025 = vrot.lane.b32.xlu1 %v6903_v56, %s11182_s7 }
 0x40c   : >> { %v4632_v12 = vpop.permute.xlu1 %4631 }
 0x40d   : >> { %5023 = vrot.lane.b32.xlu0 %v6902_v41, %s11182_s7  ;;  %4643 = vst.msk [vmem:[#allocation4 + $0x8] sm:$0xf] %vm4641_vm12, %v4632_v12  ;;  %s11450_s7 = smov 117  }
 0x40e   : >> { %v4630_v39 = vpop.permute.xlu0 %4629 }
 0x40f   : >> { %4642 = vst.msk [vmem:[#allocation4] sm:$0xf] %vm4641_vm12, %v4630_v39 }
 0x410   : >> { %v4762_v27 = vpop.permute.xlu1 %4761 }
 0x411   : >> { %4773 = vst.msk [vmem:[#allocation4 + $0x8] sm:$0xf] %vm4771_vm5, %v4762_v27 }
 0x412   : >> { %v4760_v62 = vpop.permute.xlu0 %4759 }
 0x413   : >> { %4772 = vst.msk [vmem:[#allocation4] sm:$0xf] %vm4771_vm5, %v4760_v62 }
 0x424   : >> { %v4636_v22 = vpop.permute.xlu1 %4635 }
 0x425   : >> { %4645 = vst.msk [vmem:[#allocation4 + $0x18] sm:$0xf] %vm4641_vm12, %v4636_v22 }
 0x426   : >> { %v4634_v42 = vpop.permute.xlu0 %4633 }
 0x427   : >> { %4644 = vst.msk [vmem:[#allocation4 + $0x10] sm:$0xf] %vm4641_vm12, %v4634_v42 }
 0x42a   : >> { %v4766_v18 = vpop.permute.xlu1 %4765 }
 0x42b   : >> { %4775 = vst.msk [vmem:[#allocation4 + $0x18] sm:$0xf] %vm4771_vm5, %v4766_v18 }
 0x42c   : >> { %v4764_v44 = vpop.permute.xlu0 %4763 }
 0x42d   : >> { %4774 = vst.msk [vmem:[#allocation4 + $0x10] sm:$0xf] %vm4771_vm5, %v4764_v44  ;;  %vm10343_vm5 = vmor %vm5325_vm3, %vm564_vm6  ;;  %vm11463_vm6 = vcmask 785408   ;;  %vm11474_vm3 = vcmask 973824  }
 0x42e   : >> { %6869 = vmatprep.mubr.msk.bf16.mxu0 %vm11463_vm6, %v7541_v37  ;;  %vm11475_vm6 = vmmov %vm11474_vm3 }
 0x443   : >> { %v7216_v48 = vpop.f32.mrf.mxu1 }
 0x444   : >> { %v6905_v19 = vpack.c.bf16 %v7216_v48, %v7216_v48 }
 0x445   : >> { %v7250_v15 = vpop.f32.mrf.mxu0  ;;  %v5128_v6 = vpop.f32.mrf.mxu1 }
 0x446   : >> { %v6904_v57 = vpack.c.bf16 %v5128_v6, %v5128_v6  ;;  %v6909_v33 = vpack.c.bf16 %v7250_v15, %v7250_v15 }
 0x447   : >> { %v5272_v17 = vpop.f32.mrf.mxu0 }
 0x448   : >> { %v6908_v16 = vpack.c.bf16 %v5272_v17, %v5272_v17 }
 0x44b   : >> { %v7219_v20 = vpop.f32.mrf.mxu1 }
 0x44c   : >> { %v6907_v30 = vpack.c.bf16 %v7219_v20, %v7219_v20 }
 0x44d   : >> { %v7253_v4 = vpop.f32.mrf.mxu0  ;;  %v5138_v36 = vpop.f32.mrf.mxu1 }
 0x44e   : >> { %v6911_v29 = vpack.c.bf16 %v7253_v4, %v7253_v4  ;;  %v6906_v61 = vpack.c.bf16 %v5138_v36, %v5138_v36 }
 0x44f   : >> { %v5282_v3 = vpop.f32.mrf.mxu0 }
 0x450   : >> { %v6910_v23 = vpack.c.bf16 %v5282_v3, %v5282_v3  ;;  %5309 = vrot.lane.b32.xlu1 %v6911_v29, %s7769_s28 }
 0x452   : >> { %5307 = vrot.lane.b32.xlu0 %v6910_v23, %s7769_s28 }
 0x454   : >> { %5165 = vrot.lane.b32.xlu1 %v6907_v30, %s7768_s18 }
 0x456   : >> { %5163 = vrot.lane.b32.xlu0 %v6906_v61, %s7768_s18 }
 0x458   : >> { %5161 = vrot.lane.b32.xlu1 %v6905_v19, %s7768_s18 }
 0x45a   : >> { %5159 = vrot.lane.b32.xlu0 %v6904_v57, %s7768_s18 }
 0x45c   : >> { %5305 = vrot.lane.b32.xlu1 %v6909_v33, %s7769_s28 }
 0x45e   : >> { %5303 = vrot.lane.b32.xlu0 %v6908_v16, %s7769_s28 }
 0x471   : >> { %v4892_v31 = vpop.permute.xlu1 %4891 }
 0x472   : >> { %4903 = vst.msk [vmem:[#allocation4 + $0x8] sm:$0xf] %vm4901_vm13, %v4892_v31 }
 0x473   : >> { %v4890_v0 = vpop.permute.xlu0 %4889 }
 0x474   : >> { %4902 = vst.msk [vmem:[#allocation4] sm:$0xf] %vm4901_vm13, %v4890_v0 }
 0x475   : >> { %v5022_v63 = vpop.permute.xlu1 %5021 }
 0x476   : >> { %v5028_v10 = vrot.slane %v5022_v63, 4 }
 0x477   : >> { %v5020_v28 = vpop.permute.xlu0 %5019 }
 0x478   : >> { %v5032_v50 = vsel %vm11444_vm2, %v5028_v10, %v5022_v63  ;;  %v5027_v54 = vrot.slane %v5020_v28, 4 }
 0x479   : >> { %5043 = vst.msk [vmem:[#allocation4 + $0x8] sm:$0xff] %vm10318_vm4, %v5032_v50  ;;  %v4896_v47 = vpop.permute.xlu1 %4895 }
 0x47a   : >> { %v5031_v53 = vsel %vm11445_vm9, %v5027_v54, %v5020_v28  ;;  %4905 = vst.msk [vmem:[#allocation4 + $0x18] sm:$0xf] %vm4901_vm13, %v4896_v47  ;;  %vm11470_vm9 = vcmask 1039360  }
 0x47b   : >> { %5042 = vst.msk [vmem:[#allocation4] sm:$0xff] %vm10318_vm4, %v5031_v53  ;;  %v4894_v58 = vpop.permute.xlu0 %4893 }
 0x47c   : >> { %4904 = vst.msk [vmem:[#allocation4 + $0x10] sm:$0xf] %vm4901_vm13, %v4894_v58 }
 0x47d   : >> { %v5026_v38 = vpop.permute.xlu1 %5025 }
 0x47e   : >> { %v5030_v25 = vrot.slane %v5026_v38, 4 }
 0x47f   : >> { %v5024_v45 = vpop.permute.xlu0 %5023 }
 0x480   : >> { %v5034_v32 = vsel %vm11446_vm1, %v5030_v25, %v5026_v38  ;;  %v5029_v55 = vrot.slane %v5024_v45, 4  ;;  %vm11471_vm1 = vmmov %vm11470_vm9 }
 0x481   : >> { %5045 = vst.msk [vmem:[#allocation4 + $0x18] sm:$0xff] %vm10318_vm4, %v5034_v32 }
 0x482   : >> { %v5033_v2 = vsel %vm11447_vm7, %v5029_v55, %v5024_v45  ;;  %vm11472_vm7 = vcmask 965632  }
 0x483   : >> { %5044 = vst.msk [vmem:[#allocation4 + $0x10] sm:$0xff] %vm10318_vm4, %v5033_v2  ;;  %vm11468_vm4 = vcmask 957440  }
 0x484   : >> { %vm11469_vm2 = vmmov %vm11468_vm4 }
 0x4c2   : >> { %v5310_v11 = vpop.permute.xlu1 %5309 }
 0x4c4   : >> { %v5308_v1 = vpop.permute.xlu0 %5307 }
 0x4c6   : >> { %v5166_v49 = vpop.permute.xlu1 %5165 }
 0x4c7   : >> { %5174 = vst.msk [vmem:[#allocation4 + $0x1c] sm:$0xf] %vm4641_vm12, %v5166_v49 }
 0x4c8   : >> { %5319 = vst.msk [vmem:[#allocation4 + $0x1c] sm:$0xf] %vm5315_vm11, %v5310_v11  ;;  %v5164_v5 = vpop.permute.xlu0 %5163 }
 0x4c9   : >> { %5173 = vst.msk [vmem:[#allocation4 + $0x14] sm:$0xf] %vm4641_vm12, %v5164_v5 }
 0x4ca   : >> { %5318 = vst.msk [vmem:[#allocation4 + $0x14] sm:$0xf] %vm5315_vm11, %v5308_v1  ;;  %v5162_v14 = vpop.permute.xlu1 %5161 }
 0x4cb   : >> { %5172 = vst.msk [vmem:[#allocation4 + $0xc] sm:$0xf] %vm4641_vm12, %v5162_v14 }
 0x4cc   : >> { %v5160_v13 = vpop.permute.xlu0 %5159 }
 0x4cd   : >> { %5171 = vst.msk [vmem:[#allocation4 + $0x4] sm:$0xf] %vm4641_vm12, %v5160_v13  ;;  %vm11464_vm12 = vcmask 1022976  }
 0x4ce   : >> { %v5306_v24 = vpop.permute.xlu1 %5305  ;;  %vm11465_vm13 = vmmov %vm11464_vm12 }
 0x4cf   : >> { %v5323_v35 = vld [vmem:[#allocation4 + $0x18] sm:$0xff]  ;;  %5317 = vst.msk [vmem:[#allocation4 + $0xc] sm:$0xf] %vm5315_vm11, %v5306_v24 }
 0x4d0   : >> { %5330 = vst.msk [vmem:[#allocation5 + $0x18] sm:$0xff] %vm10343_vm5, %v5323_v35  ;;  %v5304_v52 = vpop.permute.xlu0 %5303 }
 0x4d1   : >> { %v5322_v46 = vld [vmem:[#allocation4 + $0x10] sm:$0xff]  ;;  %5316 = vst.msk [vmem:[#allocation4 + $0x4] sm:$0xf] %vm5315_vm11, %v5304_v52  ;;  %vm11473_vm11 = vmmov %vm11472_vm7 }
 0x4d2   : >> { %5329 = vst.msk [vmem:[#allocation5 + $0x10] sm:$0xff] %vm10343_vm5, %v5322_v46 }
 0x4d6   : >> { %v5321_v34 = vld [vmem:[#allocation4 + $0x8] sm:$0xff] }
 0x4d7   : >> { %5328 = vst.msk [vmem:[#allocation5 + $0x8] sm:$0xff] %vm10343_vm5, %v5321_v34  ;;  %5405 = vrot.lane.b32.xlu1 %v5321_v34, %s11203_s16 }
 0x4d8   : >> { %v5320_v60 = vld [vmem:[#allocation4] sm:$0xff] }
 0x4d9   : >> { %5327 = vst.msk [vmem:[#allocation5] sm:$0xff] %vm10343_vm5, %v5320_v60  ;;  %5403 = vrot.lane.b32.xlu0 %v5320_v60, %s11203_s16 }
 0x4db   : >> { %5373 = vrot.lane.b32.xlu1 %v5321_v34, %s11202_s23 }
 0x4dd   : >> { %5371 = vrot.lane.b32.xlu0 %v5320_v60, %s11202_s23 }
 0x4df   : >> { %5661 = vrot.lane.b32.xlu1 %v5321_v34, %s11450_s7 }
 0x4e1   : >> { %5659 = vrot.lane.b32.xlu0 %v5320_v60, %s11450_s7 }
 0x4e3   : >> { %5341 = vrot.lane.b32.xlu1 %v5321_v34, %s11451_s0 }
 0x4e5   : >> { %5339 = vrot.lane.b32.xlu0 %v5320_v60, %s11451_s0 }
 0x4e7   : >> { %5629 = vrot.lane.b32.xlu1 %v5321_v34, %s11452_s6 }
 0x4e9   : >> { %5627 = vrot.lane.b32.xlu0 %v5320_v60, %s11452_s6 }
 0x4eb   : >> { %5597 = vrot.lane.b32.xlu1 %v5321_v34, %s11453_s3 }
 0x4ed   : >> { %5595 = vrot.lane.b32.xlu0 %v5320_v60, %s11453_s3 }
 0x4ef   : >> { %5533 = vrot.lane.b32.xlu1 %v5321_v34, %s11207_s15 }
 0x4f1   : >> { %5531 = vrot.lane.b32.xlu0 %v5320_v60, %s11207_s15 }
 0x4f3   : >> { %5565 = vrot.lane.b32.xlu1 %v5321_v34, %s11454_s4 }
 0x4f5   : >> { %5563 = vrot.lane.b32.xlu0 %v5320_v60, %s11454_s4 }
 0x4f7   : >> { %5501 = vrot.lane.b32.xlu1 %v5321_v34, %s11206_s24 }
 0x4f9   : >> { %5499 = vrot.lane.b32.xlu0 %v5320_v60, %s11206_s24 }
 0x4fb   : >> { %5757 = vrot.lane.b32.xlu1 %v5321_v34, %s11455_s5 }
 0x4fd   : >> { %5755 = vrot.lane.b32.xlu0 %v5320_v60, %s11455_s5 }
 0x4ff   : >> { %5469 = vrot.lane.b32.xlu1 %v5321_v34, %s11456_s2 }
 0x501   : >> { %5467 = vrot.lane.b32.xlu0 %v5320_v60, %s11456_s2 }
 0x503   : >> { %5409 = vrot.lane.b32.xlu1 %v5323_v35, %s11203_s16 }
 0x505   : >> { %5407 = vrot.lane.b32.xlu0 %v5322_v46, %s11203_s16  ;;  %s11458_s16 = smov 124  }
 0x507   : >> { %5377 = vrot.lane.b32.xlu1 %v5323_v35, %s11202_s23 }
 0x509   : >> { %5723 = vrot.lane.b32.xlu0 %v5320_v60, %s11457_s8 }
 0x50b   : >> { %5665 = vrot.lane.b32.xlu1 %v5323_v35, %s11450_s7 }
 0x50d   : >> { %5375 = vrot.lane.b32.xlu0 %v5322_v46, %s11202_s23 }
 0x50f   : >> { %5345 = vrot.lane.b32.xlu1 %v5323_v35, %s11451_s0 }
 0x511   : >> { %5663 = vrot.lane.b32.xlu0 %v5322_v46, %s11450_s7 }
 0x513   : >> { %5633 = vrot.lane.b32.xlu1 %v5323_v35, %s11452_s6 }
 0x515   : >> { %5343 = vrot.lane.b32.xlu0 %v5322_v46, %s11451_s0  ;;  %s11512_s0 = sld [smem:[#allocation51_spill]] }
 0x517   : >> { %5601 = vrot.lane.b32.xlu1 %v5323_v35, %s11453_s3 }
 0x519   : >> { %5631 = vrot.lane.b32.xlu0 %v5322_v46, %s11452_s6  ;;  %s11515_s6 = sld [smem:[#allocation9_spill]] }
 0x51b   : >> { %5537 = vrot.lane.b32.xlu1 %v5323_v35, %s11207_s15 }
 0x51d   : >> { %5435 = vrot.lane.b32.xlu0 %v5320_v60, %s11458_s16 }
 0x51f   : >> { %5569 = vrot.lane.b32.xlu1 %v5323_v35, %s11454_s4  ;;  %s356_s21 = sadd.s32 1, %s11515_s6  }
 0x520   : >> { %p353_p5 = scmp.ge.s32.totalorder %s356_s21, 8  }
 0x521   : >> { %5599 = vrot.lane.b32.xlu0 %v5322_v46, %s11453_s3  ;;  %s11508_s3 = sld [smem:[#allocation53_spill]] }
 0x523   : >> { %5505 = vrot.lane.b32.xlu1 %v5323_v35, %s11206_s24 }
 0x525   : >> { %5535 = vrot.lane.b32.xlu0 %v5322_v46, %s11207_s15  ;;  %s11459_s15 = smov 116  }
 0x527   : >> { %5761 = vrot.lane.b32.xlu1 %v5323_v35, %s11455_s5 }
 0x529   : >> { %5567 = vrot.lane.b32.xlu0 %v5322_v46, %s11454_s4  ;;  %s11516_s4 = sld [smem:[#allocation7_spill]] }
 0x52b   : >> { %5473 = vrot.lane.b32.xlu1 %v5323_v35, %s11456_s2 }
 0x52d   : >> { %5503 = vrot.lane.b32.xlu0 %v5322_v46, %s11206_s24  ;;  %s11511_s24 = sld [smem:[#allocation50_spill]] }
 0x52f   : >> { %5729 = vrot.lane.b32.xlu1 %v5323_v35, %s11457_s8 }
 0x531   : >> { %5759 = vrot.lane.b32.xlu0 %v5322_v46, %s11455_s5  ;;  %s6616_s5 = scalar_lea.vmem %s11516_s4, %s11515_s6 }
 0x533   : >> { %5725 = vrot.lane.b32.xlu1 %v5321_v34, %s11457_s8 }
 0x535   : >> { %5471 = vrot.lane.b32.xlu0 %v5322_v46, %s11456_s2 }
 0x537   : >> { %5441 = vrot.lane.b32.xlu1 %v5323_v35, %s11458_s16 }
 0x539   : >> { %5727 = vrot.lane.b32.xlu0 %v5322_v46, %s11457_s8 }
 0x53b   : >> { %5697 = vrot.lane.b32.xlu1 %v5323_v35, %s11459_s15 }
 0x53d   : >> { %5439 = vrot.lane.b32.xlu0 %v5322_v46, %s11458_s16 }
 0x53f   : >> { %5437 = vrot.lane.b32.xlu1 %v5321_v34, %s11458_s16 }
 0x541   : >> { %5695 = vrot.lane.b32.xlu0 %v5322_v46, %s11459_s15 }
 0x543   : >> { %5693 = vrot.lane.b32.xlu1 %v5321_v34, %s11459_s15 }
 0x545   : >> { %5691 = vrot.lane.b32.xlu0 %v5320_v60, %s11459_s15 }
 0x547   : >> { %5858 = vperm.xlu1 %7331, %v5848_v21  }
 0x549   : >> { %v5406_v43 = vpop.permute.xlu1 %5405  ;;  %5853 = vperm.xlu0 %7332, %v5847_v26  }
 0x54a   : >> { %v5412_v8 = vrot.slane %v5406_v43, 4 }
 0x54b   : >> { %5868 = vperm.xlu1 %7331, %v5850_v9   ;;  %v5404_v56 = vpop.permute.xlu0 %5403 }
 0x54c   : >> { %v5416_v41 = vsel %vm11464_vm12, %v5406_v43, %v5412_v8  ;;  %v5411_v12 = vrot.slane %v5404_v56, 4  ;;  %vm11476_vm12 = vcmask 982016  }
 0x54d   : >> { %5424 = vst.msk [vmem:[#allocation5 + $0x68] sm:$0xff] %vm10343_vm5, %v5416_v41  ;;  %v5374_v39 = vpop.permute.xlu1 %5373  ;;  %5863 = vperm.xlu0 %7332, %v5849_v40  }
 0x54e   : >> { %v5415_v27 = vsel %vm11465_vm13, %v5404_v56, %v5411_v12  ;;  %v5380_v62 = vrot.slane %v5374_v39, 4  ;;  %vm11477_vm13 = vmmov %vm11476_vm12 }
 0x54f   : >> { %5423 = vst.msk [vmem:[#allocation5 + $0x60] sm:$0xff] %vm10343_vm5, %v5415_v27  ;;  %v5372_v22 = vpop.permute.xlu0 %5371 }
 0x550   : >> { %v5384_v42 = vsel %vm11466_vm10, %v5374_v39, %v5380_v62  ;;  %v5379_v18 = vrot.slane %v5372_v22, 4  ;;  %vm11478_vm10 = vcmask 932864  }
 0x551   : >> { %5392 = vst.msk [vmem:[#allocation5 + $0x48] sm:$0xff] %vm10343_vm5, %v5384_v42  ;;  %v5662_v44 = vpop.permute.xlu1 %5661 }
 0x552   : >> { %v5383_v48 = vsel %vm11467_vm8, %v5372_v22, %v5379_v18  ;;  %v5668_v15 = vrot.slane %v5662_v44, 4  ;;  %vm11479_vm8 = vmmov %vm11478_vm10 }
 0x553   : >> { %5391 = vst.msk [vmem:[#allocation5 + $0x40] sm:$0xff] %vm10343_vm5, %v5383_v48  ;;  %v5660_v6 = vpop.permute.xlu0 %5659 }
 0x554   : >> { %v5672_v17 = vsel %vm11468_vm4, %v5662_v44, %v5668_v15  ;;  %v5667_v20 = vrot.slane %v5660_v6, 4  ;;  %vm11480_vm4 = vcmask 1006592  }
 0x555   : >> { %5680 = vst.msk [vmem:[#allocation5 + $0x168] sm:$0xff] %vm10343_vm5, %v5672_v17  ;;  %v5342_v4 = vpop.permute.xlu1 %5341 }
 0x556   : >> { %v5671_v29 = vsel %vm11469_vm2, %v5660_v6, %v5667_v20  ;;  %v5348_v3 = vrot.slane %v5342_v4, 4  ;;  %vm11481_vm2 = vmmov %vm11480_vm4 }
 0x557   : >> { %5679 = vst.msk [vmem:[#allocation5 + $0x160] sm:$0xff] %vm10343_vm5, %v5671_v29  ;;  %v5340_v23 = vpop.permute.xlu0 %5339 }
 0x558   : >> { %v5352_v36 = vsel %vm11470_vm9, %v5342_v4, %v5348_v3  ;;  %v5347_v30 = vrot.slane %v5340_v23, 4  ;;  %vm11482_vm9 = vcmask 1022976  }
 0x559   : >> { %5360 = vst.msk [vmem:[#allocation5 + $0x28] sm:$0xff] %vm10343_vm5, %v5352_v36  ;;  %v5630_v61 = vpop.permute.xlu1 %5629 }
 0x55a   : >> { %v5351_v19 = vsel %vm11471_vm1, %v5340_v23, %v5347_v30  ;;  %v5636_v57 = vrot.slane %v5630_v61, 4  ;;  %vm11483_vm1 = vmmov %vm11482_vm9 }
 0x55b   : >> { %5359 = vst.msk [vmem:[#allocation5 + $0x20] sm:$0xff] %vm10343_vm5, %v5351_v19  ;;  %v5628_v33 = vpop.permute.xlu0 %5627 }
 0x55c   : >> { %v5640_v16 = vsel %vm11472_vm7, %v5630_v61, %v5636_v57  ;;  %v5635_v31 = vrot.slane %v5628_v33, 4  ;;  %vm11484_vm7 = vcmask 1031168  }
 0x55d   : >> { %5648 = vst.msk [vmem:[#allocation5 + $0x148] sm:$0xff] %vm10343_vm5, %v5640_v16  ;;  %v5598_v0 = vpop.permute.xlu1 %5597 }
 0x55e   : >> { %v5639_v63 = vsel %vm11473_vm11, %v5628_v33, %v5635_v31  ;;  %v5604_v7 = vrot.slane %v5598_v0, 4  ;;  %vm11485_vm11 = vcmask 941056   ;;  %v7451_v31 = vld [vmem:[#allocation5 + $0x64] ss:$8 sps:$4 sm:$0xff]  }
 0x55f   : >> { %5647 = vst.msk [vmem:[#allocation5 + $0x140] sm:$0xff] %vm10343_vm5, %v5639_v63  ;;  %v5596_v10 = vpop.permute.xlu0 %5595 }
 0x560   : >> { %v5608_v28 = vsel %vm11474_vm3, %v5598_v0, %v5604_v7  ;;  %v5603_v50 = vrot.slane %v5596_v10, 4  ;;  %vm11486_vm3 = vcmask 957440  }
 0x561   : >> { %5616 = vst.msk [vmem:[#allocation5 + $0x128] sm:$0xff] %vm10343_vm5, %v5608_v28  ;;  %v5534_v54 = vpop.permute.xlu1 %5533 }
 0x562   : >> { %v5607_v47 = vsel %vm11475_vm6, %v5596_v10, %v5603_v50  ;;  %v5540_v53 = vrot.slane %v5534_v54, 4  ;;  %vm11487_vm6 = vmmov %vm11484_vm7  ;;  %v7449_v10 = vld [vmem:[#allocation5 + $0x60] ss:$8 sps:$4 sm:$0xff]  }
 0x563   : >> { %5615 = vst.msk [vmem:[#allocation5 + $0x120] sm:$0xff] %vm10343_vm5, %v5607_v47  ;;  %v5532_v58 = vpop.permute.xlu0 %5531 }
 0x564   : >> { %v5544_v38 = vsel %vm935_vm15, %v5534_v54, %v5540_v53  ;;  %v5539_v25 = vrot.slane %v5532_v58, 4 }
 0x565   : >> { %5552 = vst.msk [vmem:[#allocation5 + $0xe8] sm:$0xff] %vm10343_vm5, %v5544_v38  ;;  %v5566_v45 = vpop.permute.xlu1 %5565 }
 0x566   : >> { %v5543_v32 = vsel %vm935_vm15, %v5532_v58, %v5539_v25  ;;  %v5572_v55 = vrot.slane %v5566_v45, 4 }
 0x567   : >> { %5551 = vst.msk [vmem:[#allocation5 + $0xe0] sm:$0xff] %vm10343_vm5, %v5543_v32  ;;  %v5564_v2 = vpop.permute.xlu0 %5563 }
 0x568   : >> { %v5576_v11 = vsel %vm11476_vm12, %v5566_v45, %v5572_v55  ;;  %v5571_v1 = vrot.slane %v5564_v2, 4  ;;  %vm11488_vm12 = vcmask 1039360  }
 0x569   : >> { %5584 = vst.msk [vmem:[#allocation5 + $0x108] sm:$0xff] %vm10343_vm5, %v5576_v11  ;;  %v5502_v49 = vpop.permute.xlu1 %5501 }
 0x56a   : >> { %v5575_v5 = vsel %vm11477_vm13, %v5564_v2, %v5571_v1  ;;  %v5508_v14 = vrot.slane %v5502_v49, 4  ;;  %vm11489_vm13 = vmmov %vm11486_vm3  ;;  %v7457_v2 = vld [vmem:[#allocation5 + $0x44] ss:$8 sps:$4 sm:$0xff]  }
 0x56b   : >> { %5583 = vst.msk [vmem:[#allocation5 + $0x100] sm:$0xff] %vm10343_vm5, %v5575_v5  ;;  %v5500_v13 = vpop.permute.xlu0 %5499 }
 0x56c   : >> { %v5512_v24 = vsel %vm874_vm0, %v5502_v49, %v5508_v14  ;;  %v5507_v35 = vrot.slane %v5500_v13, 4 }
 0x56d   : >> { %5520 = vst.msk [vmem:[#allocation5 + $0xc8] sm:$0xff] %vm10343_vm5, %v5512_v24  ;;  %v5758_v52 = vpop.permute.xlu1 %5757 }
 0x56e   : >> { %v5511_v46 = vsel %vm874_vm0, %v5500_v13, %v5507_v35  ;;  %v5764_v34 = vrot.slane %v5758_v52, 4  ;;  %v7455_v13 = vld [vmem:[#allocation5 + $0x40] ss:$8 sps:$4 sm:$0xff]  }
 0x56f   : >> { %5519 = vst.msk [vmem:[#allocation5 + $0xc0] sm:$0xff] %vm10343_vm5, %v5511_v46  ;;  %v5756_v60 = vpop.permute.xlu0 %5755  ;;  %v7463_v46 = vld [vmem:[#allocation5 + $0x164] ss:$8 sps:$4 sm:$0xff]  }
 0x570   : >> { %v5768_v51 = vsel %vm11478_vm10, %v5758_v52, %v5764_v34  ;;  %v5763_v21 = vrot.slane %v5756_v60, 4  ;;  %vm11490_vm10 = vcmask 965632  }
 0x571   : >> { %5776 = vst.msk [vmem:[#allocation5 + $0x1c8] sm:$0xff] %vm10343_vm5, %v5768_v51  ;;  %v5470_v26 = vpop.permute.xlu1 %5469 }
 0x572   : >> { %v5767_v37 = vsel %vm11479_vm8, %v5756_v60, %v5763_v21  ;;  %v5476_v9 = vrot.slane %v5470_v26, 4  ;;  %vm11491_vm8 = vmmov %vm11488_vm12 }
 0x573   : >> { %5775 = vst.msk [vmem:[#allocation5 + $0x1c0] sm:$0xff] %vm10343_vm5, %v5767_v37  ;;  %v5468_v43 = vpop.permute.xlu0 %5467  ;;  %v7461_v37 = vld [vmem:[#allocation5 + $0x160] ss:$8 sps:$4 sm:$0xff]  }
 0x574   : >> { %v5480_v8 = vsel %vm11480_vm4, %v5470_v26, %v5476_v9  ;;  %v5475_v40 = vrot.slane %v5468_v43, 4  ;;  %vm11492_vm4 = vcmask 973824  }
 0x575   : >> { %5488 = vst.msk [vmem:[#allocation5 + $0xa8] sm:$0xff] %vm10343_vm5, %v5480_v8  ;;  %v5410_v56 = vpop.permute.xlu1 %5409 }
 0x576   : >> { %v5479_v41 = vsel %vm11481_vm2, %v5468_v43, %v5475_v40  ;;  %v5414_v12 = vrot.slane %v5410_v56, 4  ;;  %vm11493_vm2 = vmmov %vm11490_vm10  ;;  %v7469_v40 = vld [vmem:[#allocation5 + $0x24] ss:$8 sps:$4 sm:$0xff]  }
 0x577   : >> { %5487 = vst.msk [vmem:[#allocation5 + $0xa0] sm:$0xff] %vm10343_vm5, %v5479_v41  ;;  %v5408_v39 = vpop.permute.xlu0 %5407 }
 0x578   : >> { %v5418_v27 = vsel %vm11482_vm9, %v5410_v56, %v5414_v12  ;;  %v5413_v62 = vrot.slane %v5408_v39, 4  ;;  %vm11494_vm9 = vcmask 1014784  }
 0x579   : >> { %5426 = vst.msk [vmem:[#allocation5 + $0x78] sm:$0xff] %vm10343_vm5, %v5418_v27  ;;  %v5378_v22 = vpop.permute.xlu1 %5377 }
 0x57a   : >> { %v5417_v42 = vsel %vm11483_vm1, %v5408_v39, %v5413_v62  ;;  %v5382_v18 = vrot.slane %v5378_v22, 4  ;;  %vm11495_vm1 = vcmask 982016   ;;  %v7467_v62 = vld [vmem:[#allocation5 + $0x20] ss:$8 sps:$4 sm:$0xff]  }
 0x57b   : >> { %5425 = vst.msk [vmem:[#allocation5 + $0x70] sm:$0xff] %vm10343_vm5, %v5417_v42  ;;  %v5724_v44 = vpop.permute.xlu0 %5723 }
 0x57c   : >> { %v5386_v48 = vsel %vm11484_vm7, %v5378_v22, %v5382_v18  ;;  %v5731_v15 = vrot.slane %v5724_v44, 4  ;;  %vm11496_vm7 = vmmov %vm11492_vm4 }
 0x57d   : >> { %5394 = vst.msk [vmem:[#allocation5 + $0x58] sm:$0xff] %vm10343_vm5, %v5386_v48  ;;  %v5666_v6 = vpop.permute.xlu1 %5665  ;;  %v7478_v48 = vld [vmem:[#allocation5 + $0x144] ss:$8 sps:$4 sm:$0xff]  }
 0x57e   : >> { %v5735_v17 = vsel %vm11485_vm11, %v5724_v44, %v5731_v15  ;;  %v5670_v20 = vrot.slane %v5666_v6, 4  ;;  %v7475_v44 = vld [vmem:[#allocation5 + $0x14] ss:$8 sps:$4 sm:$0xff]   ;;  %vm11497_vm11 = vcmask 932864  }
 0x57f   : >> { %5743 = vst.msk [vmem:[#allocation5 + $0x1a0] sm:$0xff] %vm10343_vm5, %v5735_v17  ;;  %v5376_v4 = vpop.permute.xlu0 %5375 }
 0x580   : >> { %v5674_v29 = vsel %vm11486_vm3, %v5666_v6, %v5670_v20  ;;  %v5381_v3 = vrot.slane %v5376_v4, 4  ;;  %v7473_v20 = vld [vmem:[#allocation5 + $0x10] ss:$8 sps:$4 sm:$0xff]   ;;  %vm11499_vm3 = vcmask 1006592  }
 0x581   : >> { %5682 = vst.msk [vmem:[#allocation5 + $0x178] sm:$0xff] %vm10343_vm5, %v5674_v29  ;;  %v5346_v23 = vpop.permute.xlu1 %5345 }
 0x582   : >> { %v5385_v36 = vsel %vm11487_vm6, %v5376_v4, %v5381_v3  ;;  %v5350_v30 = vrot.slane %v5346_v23, 4  ;;  %v7446_v61 = vld [vmem:[#allocation5 + $0x70] ss:$8 sps:$4 sm:$0xff]   ;;  %v7448_v19 = vld [vmem:[#allocation5 + $0x74] ss:$8 sps:$4 sm:$0xff]   ;;  %vm11500_vm6 = vcmask 941056  }
 0x583   : >> { %5393 = vst.msk [vmem:[#allocation5 + $0x50] sm:$0xff] %vm10343_vm5, %v5385_v36  ;;  %v5664_v57 = vpop.permute.xlu0 %5663  ;;  %6216 = vmatprep.subr.bf16.mxu1 %v7448_v19  ;;  %v7476_v4 = vld [vmem:[#allocation5 + $0x140] ss:$8 sps:$4 sm:$0xff]   ;;  %v7481_v36 = vld [vmem:[#allocation5 + $0x4] ss:$8 sps:$4 sm:$0xff]  }
 0x584   : >> { %v5354_v33 = vsel %vm11488_vm12, %v5346_v23, %v5350_v30  ;;  %v5669_v16 = vrot.slane %v5664_v57, 4  ;;  %6217 = vmatpush1.bf16.msra.mxu1 %v7446_v61  ;;  %vm11502_vm12 = vmmov %vm11500_vm6 }
 0x585   : >> { %5362 = vst.msk [vmem:[#allocation5 + $0x38] sm:$0xff] %vm10343_vm5, %v5354_v33  ;;  %v5634_v0 = vpop.permute.xlu1 %5633  ;;  %6218 = vmatprep.subr.bf16.mxu1 %v7451_v31  ;;  %v7479_v31 = vld [vmem:[#allocation5] ss:$8 sps:$4 sm:$0xff]  }
 0x586   : >> { %v5673_v63 = vsel %vm11489_vm13, %v5664_v57, %v5669_v16  ;;  %v5638_v7 = vrot.slane %v5634_v0, 4  ;;  %vm11503_vm13 = vmmov %vm11499_vm3 }
 0x587   : >> { %5681 = vst.msk [vmem:[#allocation5 + $0x170] sm:$0xff] %vm10343_vm5, %v5673_v63  ;;  %v5344_v28 = vpop.permute.xlu0 %5343 }
 0x588   : >> { %v5642_v50 = vsel %vm11490_vm10, %v5634_v0, %v5638_v7  ;;  %v5349_v54 = vrot.slane %v5344_v28, 4  ;;  %6219 = vmatpush1.bf16.msra.mxu1 %v7449_v10  ;;  %v7487_v7 = vld [vmem:[#allocation5 + $0x124] ss:$8 sps:$4 sm:$0xff]   ;;  %vm11504_vm10 = vmmov %vm11494_vm9 }
 0x589   : >> { %5650 = vst.msk [vmem:[#allocation5 + $0x158] sm:$0xff] %vm10343_vm5, %v5642_v50  ;;  %v5602_v47 = vpop.permute.xlu1 %5601 }
 0x58a   : >> { %v5353_v53 = vsel %vm11491_vm8, %v5344_v28, %v5349_v54  ;;  %v5606_v58 = vrot.slane %v5602_v47, 4  ;;  %v7452_v38 = vld [vmem:[#allocation5 + $0x50] ss:$8 sps:$4 sm:$0xff]   ;;  %v7454_v25 = vld [vmem:[#allocation5 + $0x54] ss:$8 sps:$4 sm:$0xff]   ;;  %vm11505_vm8 = vmmov %vm11500_vm6 }
 0x58b   : >> { %5361 = vst.msk [vmem:[#allocation5 + $0x30] sm:$0xff] %vm10343_vm5, %v5353_v53  ;;  %v5632_v45 = vpop.permute.xlu0 %5631  ;;  %6220 = vmatprep.subr.bf16.mxu1 %v7454_v25  ;;  %v7485_v53 = vld [vmem:[#allocation5 + $0x120] ss:$8 sps:$4 sm:$0xff]  }
 0x58c   : >> { %v5610_v32 = vsel %vm11492_vm4, %v5602_v47, %v5606_v58  ;;  %v5637_v55 = vrot.slane %v5632_v45, 4  ;;  %6221 = vmatpush1.bf16.msra.mxu1 %v7452_v38  ;;  %vm11506_vm4 = vmmov %vm11494_vm9 }
 0x58d   : >> { %5618 = vst.msk [vmem:[#allocation5 + $0x138] sm:$0xff] %vm10343_vm5, %v5610_v32  ;;  %v5538_v11 = vpop.permute.xlu1 %5537  ;;  %6222 = vmatprep.subr.bf16.mxu1 %v7457_v2 }
 0x58e   : >> { %v5641_v1 = vsel %vm11493_vm2, %v5632_v45, %v5637_v55  ;;  %v5542_v49 = vrot.slane %v5538_v11, 4  ;;  %v7458_v5 = vld [vmem:[#allocation5 + $0x170] ss:$8 sps:$4 sm:$0xff]   ;;  %v7460_v14 = vld [vmem:[#allocation5 + $0x174] ss:$8 sps:$4 sm:$0xff]   ;;  %vm11507_vm2 = vmmov %vm11506_vm4 }
 0x58f   : >> { %5649 = vst.msk [vmem:[#allocation5 + $0x150] sm:$0xff] %vm10343_vm5, %v5641_v1  ;;  %v5436_v24 = vpop.permute.xlu0 %5435  ;;  %6269 = vmatprep.subr.bf16.mxu0 %v7460_v14  ;;  %v7493_v45 = vld [vmem:[#allocation5 + $0xe4] ss:$8 sps:$4 sm:$0xff]  }
 0x590   : >> { %v5546_v35 = vsel %vm935_vm15, %v5538_v11, %v5542_v49  ;;  %v5443_v52 = vrot.slane %v5436_v24, 4  ;;  %6223 = vmatpush1.bf16.msra.mxu1 %v7455_v13  ;;  %6270 = vmatpush1.bf16.msra.mxu0 %v7458_v5  ;;  %v7491_v5 = vld [vmem:[#allocation5 + $0xe0] ss:$8 sps:$4 sm:$0xff]  }
 0x591   : >> { %5554 = vst.msk [vmem:[#allocation5 + $0xf8] sm:$0xff] %vm10343_vm5, %v5546_v35  ;;  %v5570_v34 = vpop.permute.xlu1 %5569  ;;  %6271 = vmatprep.subr.bf16.mxu0 %v7463_v46 }
 0x592   : >> { %v5447_v60 = vsel %vm11494_vm9, %v5436_v24, %v5443_v52  ;;  %v5574_v51 = vrot.slane %v5570_v34, 4  ;;  %v7464_v21 = vld [vmem:[#allocation5 + $0x30] ss:$8 sps:$4 sm:$0xff]   ;;  %v7466_v26 = vld [vmem:[#allocation5 + $0x34] ss:$8 sps:$4 sm:$0xff]   ;;  %vm6394_vm9 = vcmask 482304  }
 0x593   : >> { %5455 = vst.msk [vmem:[#allocation5 + $0x80] sm:$0xff] %vm10343_vm5, %v5447_v60  ;;  %v5600_v9 = vpop.permute.xlu0 %5599  ;;  %6224 = vmatprep.subr.bf16.mxu1 %v7466_v26  ;;  %v7499_v24 = vld [vmem:[#allocation5 + $0x104] ss:$8 sps:$4 sm:$0xff]  }
 0x594   : >> { %v5578_v43 = vsel %vm11495_vm1, %v5570_v34, %v5574_v51  ;;  %v5605_v8 = vrot.slane %v5600_v9, 4  ;;  %6225 = vmatpush1.bf16.msra.mxu1 %v7464_v21  ;;  %6272 = vmatpush1.bf16.msra.mxu0 %v7461_v37  ;;  %v7497_v51 = vld [vmem:[#allocation5 + $0x100] ss:$8 sps:$4 sm:$0xff]  }
 0x595   : >> { %5586 = vst.msk [vmem:[#allocation5 + $0x118] sm:$0xff] %vm10343_vm5, %v5578_v43  ;;  %v5506_v56 = vpop.permute.xlu1 %5505  ;;  %6226 = vmatprep.subr.bf16.mxu1 %v7469_v40 }
 0x596   : >> { %v5609_v41 = vsel %vm11496_vm7, %v5600_v9, %v5605_v8  ;;  %v5510_v12 = vrot.slane %v5506_v56, 4  ;;  %v7470_v39 = vld [vmem:[#allocation5 + $0x150] ss:$8 sps:$4 sm:$0xff]   ;;  %v7472_v27 = vld [vmem:[#allocation5 + $0x154] ss:$8 sps:$4 sm:$0xff]  }
 0x597   : >> { %5617 = vst.msk [vmem:[#allocation5 + $0x130] sm:$0xff] %vm10343_vm5, %v5609_v41  ;;  %v5536_v22 = vpop.permute.xlu0 %5535  ;;  %6273 = vmatprep.subr.bf16.mxu0 %v7472_v27  ;;  %v7505_v9 = vld [vmem:[#allocation5 + $0xc4] ss:$8 sps:$4 sm:$0xff]  }
 0x598   : >> { %v5514_v42 = vsel %vm874_vm0, %v5506_v56, %v5510_v12  ;;  %v5541_v18 = vrot.slane %v5536_v22, 4  ;;  %6227 = vmatpush1.bf16.msra.mxu1 %v7467_v62  ;;  %6274 = vmatpush1.bf16.msra.mxu0 %v7470_v39  ;;  %v7503_v39 = vld [vmem:[#allocation5 + $0xc0] ss:$8 sps:$4 sm:$0xff]  }
 0x599   : >> { %5522 = vst.msk [vmem:[#allocation5 + $0xd8] sm:$0xff] %vm10343_vm5, %v5514_v42  ;;  %v5762_v15 = vpop.permute.xlu1 %5761  ;;  %6228 = vmatprep.subr.bf16.mxu1 %v7475_v44  ;;  %6275 = vmatprep.subr.bf16.mxu0 %v7478_v48 }
 0x59a   : >> { %v5545_v6 = vsel %vm935_vm15, %v5536_v22, %v5541_v18  ;;  %v5766_v17 = vrot.slane %v5762_v15, 4  ;;  %vm11498_vm15 = vmmov %vm11495_vm1  ;;  %v7511_v22 = vld [vmem:[#allocation5 + $0x1c4] ss:$8 sps:$4 sm:$0xff]  }
 0x59b   : >> { %5553 = vst.msk [vmem:[#allocation5 + $0xf0] sm:$0xff] %vm10343_vm5, %v5545_v6  ;;  %v5568_v29 = vpop.permute.xlu0 %5567  ;;  %v7509_v6 = vld [vmem:[#allocation5 + $0x1c0] ss:$8 sps:$4 sm:$0xff]  }
 0x59c   : >> { %v5770_v3 = vsel %vm11497_vm11, %v5762_v15, %v5766_v17  ;;  %v5573_v23 = vrot.slane %v5568_v29, 4  ;;  %6229 = vmatpush1.bf16.msra.mxu1 %v7473_v20  ;;  %6276 = vmatpush1.bf16.msra.mxu0 %v7476_v4 }
 0x59d   : >> { %5778 = vst.msk [vmem:[#allocation5 + $0x1d8] sm:$0xff] %vm10343_vm5, %v5770_v3  ;;  %v5474_v30 = vpop.permute.xlu1 %5473  ;;  %6230 = vmatprep.subr.bf16.mxu1 %v7481_v36 }
 0x59e   : >> { %v5577_v61 = vsel %vm11498_vm15, %v5568_v29, %v5573_v23  ;;  %v5478_v19 = vrot.slane %v5474_v30, 4  ;;  %v7482_v57 = vld [vmem:[#allocation5 + $0x130] ss:$8 sps:$4 sm:$0xff]   ;;  %v7484_v33 = vld [vmem:[#allocation5 + $0x134] ss:$8 sps:$4 sm:$0xff]  }
 0x59f   : >> { %5585 = vst.msk [vmem:[#allocation5 + $0x110] sm:$0xff] %vm10343_vm5, %v5577_v61  ;;  %v5504_v16 = vpop.permute.xlu0 %5503  ;;  %6277 = vmatprep.subr.bf16.mxu0 %v7484_v33  ;;  %v7517_v29 = vld [vmem:[#allocation5 + $0xa4] ss:$8 sps:$4 sm:$0xff]  }
 0x5a0   : >> { %v5482_v0 = vsel %vm11499_vm3, %v5474_v30, %v5478_v19  ;;  %v5509_v63 = vrot.slane %v5504_v16, 4  ;;  %6231 = vmatpush1.bf16.msra.mxu1 %v7479_v31  ;;  %6278 = vmatpush1.bf16.msra.mxu0 %v7482_v57  ;;  %v7515_v57 = vld [vmem:[#allocation5 + $0xa0] ss:$8 sps:$4 sm:$0xff]  }
 0x5a1   : >> { %5490 = vst.msk [vmem:[#allocation5 + $0xb8] sm:$0xff] %vm10343_vm5, %v5482_v0  ;;  %v5730_v10 = vpop.permute.xlu1 %5729  ;;  %6279 = vmatprep.subr.bf16.mxu0 %v7487_v7 }
 0x5a2   : >> { %v5513_v28 = vsel %vm874_vm0, %v5504_v16, %v5509_v63  ;;  %v5734_v50 = vrot.slane %v5730_v10, 4  ;;  %v7488_v54 = vld [vmem:[#allocation5 + $0xf0] ss:$8 sps:$4 sm:$0xff]   ;;  %v7490_v47 = vld [vmem:[#allocation5 + $0xf4] ss:$8 sps:$4 sm:$0xff]   ;;  %vm11501_vm0 = vmmov %vm11497_vm11 }
 0x5a3   : >> { %5521 = vst.msk [vmem:[#allocation5 + $0xd0] sm:$0xff] %vm10343_vm5, %v5513_v28  ;;  %v5760_v58 = vpop.permute.xlu0 %5759  ;;  %6232 = vmatprep.subr.bf16.mxu1 %v7490_v47 }
 0x5a4   : >> { %v5738_v38 = vsel %vm11500_vm6, %v5730_v10, %v5734_v50  ;;  %v5765_v25 = vrot.slane %v5760_v58, 4  ;;  %6233 = vmatpush2.bf16.msra.mxu1 %v7488_v54  ;;  %6280 = vmatpush1.bf16.msra.mxu0 %v7485_v53  ;;  %v7533_v53 = vld [vmem:[%s11460_s9] ss:$16 sps:$4 sm:$0xff]  }
 0x5a5   : >> { %5746 = vst.msk [vmem:[#allocation5 + $0x1b8] sm:$0xff] %vm10343_vm5, %v5738_v38  ;;  %v5726_v32 = vpop.permute.xlu1 %5725  ;;  %6234 = vmatprep.subr.bf16.mxu1 %v7493_v45  ;;  %v6385_v45 = vld [vmem:[%s11508_s3 + $0x78] sm:$0xff] }
 0x5a6   : >> { %v5769_v55 = vsel %vm11501_vm0, %v5760_v58, %v5765_v25  ;;  %v5732_v2 = vrot.slane %v5726_v32, 4  ;;  %v7494_v11 = vld [vmem:[#allocation5 + $0x110] ss:$8 sps:$4 sm:$0xff]   ;;  %v7496_v1 = vld [vmem:[#allocation5 + $0x114] ss:$8 sps:$4 sm:$0xff]   ;;  %v7771_v25 = vmov 0.0  }
 0x5a7   : >> { %5777 = vst.msk [vmem:[#allocation5 + $0x1d0] sm:$0xff] %vm10343_vm5, %v5769_v55  ;;  %v5472_v49 = vpop.permute.xlu0 %5471  ;;  %6281 = vmatprep.subr.bf16.mxu0 %v7496_v1  ;;  %v7545_v55 = vld [vmem:[%s11460_s9 + $0x2c] ss:$16 sps:$4 sm:$0xff]   ;;  %v7544_v1 = vld [vmem:[%s11460_s9 + $0x20] ss:$16 sps:$4 sm:$0xff]  }
 0x5a8   : >> { %v5736_v14 = vsel %vm11502_vm12, %v5726_v32, %v5732_v2  ;;  %v5477_v13 = vrot.slane %v5472_v49, 4  ;;  %6235 = vmatpush2.bf16.msra.mxu1 %v7491_v5  ;;  %6282 = vmatpush1.bf16.msra.mxu0 %v7494_v11  ;;  %v7539_v32 = vld [vmem:[%s11460_s9 + $0x8] ss:$16 sps:$4 sm:$0xff]   ;;  %v6384_v2 = vld [vmem:[%s11508_s3 + $0x70] sm:$0xff] }
 0x5a9   : >> { %5744 = vst.msk [vmem:[#allocation5 + $0x1a8] sm:$0xff] %vm10343_vm5, %v5736_v14  ;;  %v5442_v35 = vpop.permute.xlu1 %5441  ;;  %6283 = vmatprep.subr.bf16.mxu0 %v7499_v24  ;;  %v6383_v11 = vld [vmem:[%s11508_s3 + $0x68] sm:$0xff]  ;;  %v6381_v14 = vld [vmem:[%s11508_s3 + $0x58] sm:$0xff] }
 0x5aa   : >> { %v5481_v52 = vsel %vm11503_vm13, %v5472_v49, %v5477_v13  ;;  %v5446_v46 = vrot.slane %v5442_v35, 4  ;;  %v7500_v34 = vld [vmem:[#allocation5 + $0xd0] ss:$8 sps:$4 sm:$0xff]   ;;  %v7502_v60 = vld [vmem:[#allocation5 + $0xd4] ss:$8 sps:$4 sm:$0xff]   ;;  %v6382_v49 = vld [vmem:[%s11508_s3 + $0x60] sm:$0xff] }
 0x5ab   : >> { %5489 = vst.msk [vmem:[#allocation5 + $0xb0] sm:$0xff] %vm10343_vm5, %v5481_v52  ;;  %v5728_v21 = vpop.permute.xlu0 %5727  ;;  %6236 = vmatprep.subr.bf16.mxu1 %v7502_v60  ;;  %v7547_v5 = vld [vmem:[%s11460_s9 + $0x28] ss:$16 sps:$4 sm:$0xff]   ;;  %v6380_v13 = vld [vmem:[%s11508_s3 + $0x50] sm:$0xff]  ;;  %v6374_v60 = vld [vmem:[%s11508_s3 + $0x20] sm:$0xff]  ;;  %vm6511_vm13 = vcmask 187392  }
 0x5ac   : >> { %v5450_v26 = vsel %vm11504_vm10, %v5442_v35, %v5446_v46  ;;  %v5733_v37 = vrot.slane %v5728_v21, 4  ;;  %6237 = vmatpush2.bf16.msra.mxu1 %v7500_v34  ;;  %6284 = vmatpush1.bf16.msra.mxu0 %v7497_v51  ;;  %v6379_v24 = vld [vmem:[%s11508_s3 + $0x48] sm:$0xff]  ;;  %v6378_v35 = vld [vmem:[%s11508_s3 + $0x40] sm:$0xff]  ;;  %v6377_v52 = vld [vmem:[%s11508_s3 + $0x38] sm:$0xff]  ;;  %vm6555_vm10 = vcmask 130112  }
 0x5ad   : >> { %5458 = vst.msk [vmem:[#allocation5 + $0x98] sm:$0xff] %vm10343_vm5, %v5450_v26  ;;  %v5698_v43 = vpop.permute.xlu1 %5697  ;;  %6238 = vmatprep.subr.bf16.mxu1 %v7505_v9  ;;  %v6376_v46 = vld [vmem:[%s11508_s3 + $0x30] sm:$0xff]  ;;  %v6375_v34 = vld [vmem:[%s11508_s3 + $0x28] sm:$0xff]  ;;  %v6373_v51 = vld [vmem:[%s11508_s3 + $0x18] sm:$0xff] }
 0x5ae   : >> { %v5737_v8 = vsel %vm11505_vm8, %v5728_v21, %v5733_v37  ;;  %v5702_v40 = vrot.slane %v5698_v43, 4  ;;  %v7506_v56 = vld [vmem:[#allocation5 + $0x1d0] ss:$8 sps:$4 sm:$0xff]   ;;  %v7508_v41 = vld [vmem:[#allocation5 + $0x1d4] ss:$8 sps:$4 sm:$0xff]   ;;  %v6370_v37 = vld [vmem:[%s11508_s3] sm:$0xff] }
 0x5af   : >> { %5745 = vst.msk [vmem:[#allocation5 + $0x1b0] sm:$0xff] %vm10343_vm5, %v5737_v8  ;;  %v5440_v12 = vpop.permute.xlu0 %5439  ;;  %6289 = vmatprep.subr.bf16.mxu0 %v7508_v41  ;;  %v6372_v21 = vld [vmem:[%s11508_s3 + $0x10] sm:$0xff]  ;;  %v6371_v26 = vld [vmem:[%s11508_s3 + $0x8] sm:$0xff]  ;;  %v6393_v9 = vld [vmem:[%s11508_s3 + $0xb8] sm:$0x7]  ;;  %vm6562_vm8 = vcmask 195712  }
 0x5b0   : >> { %v5706_v27 = vsel %vm1237_vm14, %v5698_v43, %v5702_v40  ;;  %v5445_v62 = vrot.slane %v5440_v12, 4  ;;  %6239 = vmatpush2.bf16.msra.mxu1 %v7503_v39  ;;  %6290 = vmatpush2.bf16.msra.mxu0 %v7506_v56  ;;  %v7523_v31 = vld [vmem:[#allocation5 + $0x1a4] ss:$8 sps:$4 sm:$0xff]   ;;  %v7521_v10 = vld [vmem:[#allocation5 + $0x1a0] ss:$8 sps:$4 sm:$0xff]   ;;  %v6392_v43 = vld [vmem:[%s11508_s3 + $0xb0] sm:$0xff] }
 0x5b1   : >> { %5714 = vst.msk [vmem:[#allocation5 + $0x198] sm:$0xff] %vm10343_vm5, %v5706_v27  ;;  %v5438_v42 = vpop.permute.xlu1 %5437  ;;  %6291 = vmatprep.subr.bf16.mxu0 %v7511_v22  ;;  %v6391_v8 = vld [vmem:[%s11508_s3 + $0xa8] sm:$0xff]  ;;  %v6390_v40 = vld [vmem:[%s11508_s3 + $0xa0] sm:$0xff]  ;;  %v6389_v56 = vld [vmem:[%s11508_s3 + $0x98] sm:$0xff] }
 0x5b2   : >> { %v5449_v18 = vsel %vm11506_vm4, %v5440_v12, %v5445_v62  ;;  %v5444_v44 = vrot.slane %v5438_v42, 4  ;;  %v7512_v48 = vld [vmem:[#allocation5 + $0xb0] ss:$8 sps:$4 sm:$0xff]   ;;  %v7514_v15 = vld [vmem:[#allocation5 + $0xb4] ss:$8 sps:$4 sm:$0xff]   ;;  %v6386_v39 = vld [vmem:[%s11508_s3 + $0x80] sm:$0xff] }
 0x5b3   : >> { %5457 = vst.msk [vmem:[#allocation5 + $0x90] sm:$0xff] %vm10343_vm5, %v5449_v18  ;;  %v5696_v17 = vpop.permute.xlu0 %5695  ;;  %6240 = vmatprep.subr.bf16.mxu1 %v7514_v15  ;;  %v6388_v41 = vld [vmem:[%s11508_s3 + $0x90] sm:$0xff]  ;;  %v6387_v12 = vld [vmem:[%s11508_s3 + $0x88] sm:$0xff]  ;;  %vm6569_vm4 = vcmask 261312  }
 0x5b4   : >> { %v5448_v20 = vsel %vm11507_vm2, %v5438_v42, %v5444_v44  ;;  %v5701_v4 = vrot.slane %v5696_v17, 4  ;;  %6241 = vmatpush2.bf16.msra.mxu1 %v7512_v48  ;;  %6292 = vmatpush2.bf16.msra.mxu0 %v7509_v6  ;;  %vm6592_vm2 = vcmask 254976  }
 0x5b5   : >> { %5456 = vst.msk [vmem:[#allocation5 + $0x88] sm:$0xff] %vm10343_vm5, %v5448_v20  ;;  %v5694_v3 = vpop.permute.xlu1 %5693  ;;  %6242 = vmatprep.subr.bf16.mxu1 %v7517_v29 }
 0x5b6   : >> { %v5705_v23 = vsel %vm1237_vm14, %v5696_v17, %v5701_v4  ;;  %v5700_v36 = vrot.slane %v5694_v3, 4  ;;  %v7518_v30 = vld [vmem:[#allocation5 + $0x1b0] ss:$8 sps:$4 sm:$0xff]   ;;  %v7520_v61 = vld [vmem:[#allocation5 + $0x1b4] ss:$8 sps:$4 sm:$0xff]  }
 0x5b7   : >> { %5713 = vst.msk [vmem:[#allocation5 + $0x190] sm:$0xff] %vm10343_vm5, %v5705_v23  ;;  %v5692_v19 = vpop.permute.xlu0 %5691  ;;  %6293 = vmatprep.subr.bf16.mxu0 %v7520_v61 }
 0x5b8   : >> { %v5704_v33 = vsel %vm1237_vm14, %v5694_v3, %v5700_v36  ;;  %v5699_v16 = vrot.slane %v5692_v19, 4  ;;  %6243 = vmatpush2.bf16.msra.mxu1 %v7515_v57  ;;  %6294 = vmatpush2.bf16.msra.mxu0 %v7518_v30 }
 0x5b9   : >> { %5712 = vst.msk [vmem:[#allocation5 + $0x188] sm:$0xff] %vm10343_vm5, %v5704_v33  ;;  %6295 = vmatprep.subr.bf16.mxu0 %v7523_v31 }
 0x5ba   : >> { %v5703_v0 = vsel %vm1237_vm14, %v5692_v19, %v5699_v16  ;;  %v7524_v63 = vld [vmem:[#allocation5 + $0x90] ss:$8 sps:$4 sm:$0xff]   ;;  %v7526_v7 = vld [vmem:[#allocation5 + $0x94] ss:$8 sps:$4 sm:$0xff]   ;;  %vm11509_vm14 = vcmask 785408  }
 0x5bb   : >> { %5711 = vst.msk [vmem:[#allocation5 + $0x180] sm:$0xff] %vm10343_vm5, %v5703_v0  ;;  %6244 = vmatprep.subr.bf16.mxu1 %v7526_v7  ;;  %vm11510_vm5 = vcmask 1042432  }
 0x5bc   : >> { %v7529_v28 = vld [vmem:[#allocation5 + $0x84] ss:$8 sps:$4 sm:$0xff]   ;;  %6245 = vmatpush2.bf16.msra.mxu1 %v7524_v63  ;;  %6296 = vmatpush2.bf16.msra.mxu0 %v7521_v10  ;;  %v7527_v47 = vld [vmem:[#allocation5 + $0x80] ss:$8 sps:$4 sm:$0xff]  }
 0x5bd   : >> { %6246 = vmatprep.subr.bf16.mxu1 %v7529_v28 }
 0x5be   : >> { %v7530_v50 = vld [vmem:[#allocation5 + $0x190] ss:$8 sps:$4 sm:$0xff]   ;;  %v7532_v54 = vld [vmem:[#allocation5 + $0x194] ss:$8 sps:$4 sm:$0xff]  }
 0x5bf   : >> { %6297 = vmatprep.subr.bf16.mxu0 %v7532_v54 }
 0x5c0   : >> { %6247 = vmatpush2.bf16.msra.mxu1 %v7527_v47  ;;  %6298 = vmatpush2.bf16.msra.mxu0 %v7530_v50 }
 0x5c1   : >> { %6410 = vmatprep.subr.mxu1 %v7771_v25 }
 0x5c2   : >> { %v7536_v58 = vld [vmem:[#allocation5 + $0x180] ss:$8 sps:$4 sm:$0xff]   ;;  %v7538_v38 = vld [vmem:[#allocation5 + $0x184] ss:$8 sps:$4 sm:$0xff]   ;;  %v5859_v20 = vpop.permute.xlu1 %5858 }
 0x5c3   : >> { %6249 = vmatmul.mubr.bf16.vlgmr.msra.gmra.mxu1 %v7533_v53  ;;  %6299 = vmatprep.subr.bf16.mxu0 %v7538_v38 }
 0x5c4   : >> { %6300 = vmatpush2.bf16.msra.mxu0 %v7536_v58  ;;  %6258 = vmatprep.mubr.bf16.mxu1 %v7542_v59  ;;  %v5854_v62 = vpop.permute.xlu0 %5853 }
 0x5c5   : >> { %6411 = vmatpush1.msra.mxu1 %v6385_v45 }
 0x5c6   : >> { %6412 = vmatprep.subr.mxu1 %v7771_v25  ;;  %v5869_v54 = vpop.permute.xlu1 %5868 }
 0x5c7   : >> { %6302 = vmatmul.mubr.bf16.vlgmr.msra.gmra.mxu0 %v7539_v32  ;;  %6413 = vmatpush1.msra.mxu1 %v6384_v2 }
 0x5c8   : >> { %6870 = vmatprep.mubr.msk.bf16.mxu0 %vm11509_vm14, %v7545_v55  ;;  %6414 = vmatprep.subr.mxu1 %v7771_v25  ;;  %v5864_v31 = vpop.permute.xlu0 %5863  ;;  %vm11517_vm14 = vcmask 1041409  }
 0x5c9   : >> { %6415 = vmatpush1.msra.mxu1 %v6383_v11 }
 0x5ca   : >> { %6416 = vmatprep.subr.mxu1 %v7771_v25 }
 0x5cb   : >> { %6259 = vmatmul.mubr.bf16.gmra.mxu1 %v7544_v1 }
 0x5cc   : >> { %6417 = vmatpush1.msra.mxu1 %v6382_v49 }
 0x5cd   : >> { %6418 = vmatprep.subr.mxu1 %v7771_v25 }
 0x5ce   : >> { %6419 = vmatpush1.msra.mxu1 %v6381_v14 }
 0x5cf   : >> { %6312 = vmatmul.mubr.bf16.gmra.mxu0 %v7547_v5  ;;  %6420 = vmatprep.subr.mxu1 %v7771_v25 }
 0x5d0   : >> { %6421 = vmatpush1.msra.mxu1 %v6380_v13 }
 0x5d1   : >> { %6422 = vmatprep.subr.mxu1 %v7771_v25 }
 0x5d2   : >> { %6423 = vmatpush1.msra.mxu1 %v6379_v24 }
 0x5d3   : >> { %6424 = vmatprep.subr.mxu1 %v7771_v25 }
 0x5d4   : >> { %6425 = vmatpush1.msra.mxu1 %v6378_v35 }
 0x5d5   : >> { %6426 = vmatprep.subr.mxu1 %v7771_v25 }
 0x5d6   : >> { %6427 = vmatpush1.msra.mxu1 %v6377_v52 }
 0x5d7   : >> { %6428 = vmatprep.subr.mxu1 %v7771_v25 }
 0x5d8   : >> { %6429 = vmatpush1.msra.mxu1 %v6376_v46 }
 0x5d9   : >> { %6430 = vmatprep.subr.mxu1 %v7771_v25 }
 0x5da   : >> { %6431 = vmatpush1.msra.mxu1 %v6375_v34 }
 0x5db   : >> { %6432 = vmatprep.subr.mxu1 %v7771_v25 }
 0x5dc   : >> { %6433 = vmatpush1.msra.mxu1 %v6374_v60 }
 0x5dd   : >> { %6434 = vmatprep.subr.mxu1 %v7771_v25 }
 0x5de   : >> { %6435 = vmatpush1.msra.mxu1 %v6373_v51 }
 0x5df   : >> { %6436 = vmatprep.subr.mxu1 %v7771_v25 }
 0x5e0   : >> { %6437 = vmatpush1.msra.mxu1 %v6372_v21 }
 0x5e1   : >> { %6438 = vmatprep.subr.mxu1 %v7771_v25 }
 0x5e2   : >> { %6439 = vmatpush1.msra.mxu1 %v6371_v26 }
 0x5e3   : >> { %6440 = vmatprep.subr.mxu1 %v7771_v25 }
 0x5e4   : >> { %6441 = vmatpush1.msra.mxu1 %v6370_v37 }
 0x5e5   : >> { %6458 = vmatprep.subr.mxu1 %v7771_v25 }
 0x5e6   : >> { %6879 = vmatpush2.msk.msra.mxu1 %vm11510_vm5, %v6393_v9  ;;  %vm6617_vm5 = vcmask 8192  }
 0x5e7   : >> { %6460 = vmatprep.subr.mxu1 %v7771_v25 }
 0x5e8   : >> { %6461 = vmatpush2.msra.mxu1 %v6392_v43 }
 0x5e9   : >> { %6462 = vmatprep.subr.mxu1 %v7771_v25 }
 0x5ea   : >> { %6463 = vmatpush2.msra.mxu1 %v6391_v8 }
 0x5eb   : >> { %6464 = vmatprep.subr.mxu1 %v7771_v25 }
 0x5ec   : >> { %6465 = vmatpush2.msra.mxu1 %v6390_v40 }
 0x5ed   : >> { %6466 = vmatprep.subr.mxu1 %v7771_v25 }
 0x5ee   : >> { %6467 = vmatpush2.msra.mxu1 %v6389_v56 }
 0x5ef   : >> { %6468 = vmatprep.subr.mxu1 %v7771_v25 }
 0x5f0   : >> { %6469 = vmatpush2.msra.mxu1 %v6388_v41 }
 0x5f1   : >> { %6470 = vmatprep.subr.mxu1 %v7771_v25 }
 0x5f2   : >> { %6471 = vmatpush2.msra.mxu1 %v6387_v12 }
 0x5f3   : >> { %6472 = vmatprep.subr.mxu1 %v7771_v25 }
 0x5f4   : >> { %6473 = vmatpush2.msra.mxu1 %v6386_v39 }
 0x683   : >> { %v6250_v27 = vpop.f32.mrf.mxu1 }
 0x684   : >> { %v6251_v42 = vadd.f32 %v6250_v27, %v5854_v62 }
 0x685   : >> { %v6252_v22 = vpop.f32.mrf.mxu1 }
 0x686   : >> { %v6253_v48 = vadd.f32 %v6252_v22, %v5854_v62 }
 0x687   : >> { %v6254_v18 = vpop.f32.mrf.mxu1  ;;  %v6303_v44 = vpop.f32.mrf.mxu0 }
 0x688   : >> { %v10716_v15 = vadd.f32 %v6303_v44, %v6251_v42  ;;  %v6255_v3 = vadd.f32 %v6254_v18, %v5859_v20 }
 0x689   : >> { %v6256_v6 = vpop.f32.mrf.mxu1  ;;  %v6305_v17 = vpop.f32.mrf.mxu0 }
 0x68a   : >> { %v6330_v4 = vmin.f32 %v10716_v15, 0.0  ;;  %v6306_v29 = vadd.f32 %v6305_v17, %v6253_v48  ;;  %v6257_v61 = vadd.f32 %v6256_v6, %v5859_v20  ;;  %vm6322_vm7 = vcmp.gt.f32.partialorder %v10716_v15, 0.0 }
 0x68b   : >> { %v6260_v23 = vpop.f32.mrf.mxu1  ;;  %v6307_v36 = vpop.f32.mrf.mxu0 }
 0x68c   : >> { %v6338_v30 = vmul.f32 1.442695, %v6330_v4  ;;  %v6331_v19 = vmin.f32 %v6306_v29, 0.0  ;;  %v10719_v57 = vadd.f32 %v6307_v36, %v6255_v3  ;;  %v6261_v7 = vadd.f32 %v6260_v23, %v5864_v31  ;;  %v6499_v23 = vld [vmem:[%s11511_s24 + $0x20] sm:$0xff] }
 0x68d   : >> { %v6262_v33 = vpop.f32.mrf.mxu1  ;;  %v6309_v16 = vpop.f32.mrf.mxu0  ;;  %vm6323_vm1 = vcmp.gt.f32.partialorder %v6306_v29, 0.0 }
 0x68e   : >> { %7596 = vpow2.f32 %v6338_v30  ;;  %v6340_v0 = vmul.f32 1.442695, %v6331_v19  ;;  %v6310_v63 = vadd.f32 %v6309_v16, %v6257_v61  ;;  %v6332_v10 = vmin.f32 %v10719_v57, 0.0  ;;  %v6496_v61 = vld [vmem:[%s11511_s24 + $0x8] sm:$0xff] }
 0x68f   : >> { %v6264_v28 = vpop.f32.mrf.mxu1  ;;  %v6313_v50 = vpop.f32.mrf.mxu0  ;;  %v6263_v47 = vadd.f32 %v6262_v33, %v5864_v31  ;;  %vm6324_vm15 = vcmp.gt.f32.partialorder %v10719_v57, 0.0  ;;  %v6500_v16 = vld [vmem:[%s11511_s24 + $0x28] sm:$0xff] }
 0x690   : >> { %7598 = vpow2.f32 %v6340_v0  ;;  %v6333_v53 = vmin.f32 %v6310_v63, 0.0  ;;  %v6342_v59 = vmul.f32 1.442695, %v6332_v10  ;;  %v6314_v58 = vadd.f32 %v6313_v50, %v6261_v7 }
 0x691   : >> { %v6266_v38 = vpop.f32.mrf.mxu1  ;;  %v6315_v25 = vpop.f32.mrf.mxu0  ;;  %v6265_v32 = vadd.f32 %v6264_v28, %v5869_v54  ;;  %vm6325_vm11 = vcmp.gt.f32.partialorder %v6310_v63, 0.0 }
 0x692   : >> { %v6344_v45 = vmul.f32 1.442695, %v6333_v53  ;;  %v6316_v55 = vadd.f32 %v6315_v25, %v6263_v47  ;;  %7600 = vpow2.f32 %v6342_v59  ;;  %v6334_v2 = vmin.f32 %v6314_v58, 0.0  ;;  %v6498_v59 = vld [vmem:[%s11511_s24 + $0x18] sm:$0xff] }
 0x693   : >> { %v6317_v11 = vpop.f32.mrf.mxu0  ;;  %v6267_v1 = vadd.f32 %v6266_v38, %v5869_v54  ;;  %vm6326_vm6 = vcmp.gt.f32.partialorder %v6314_v58, 0.0  ;;  %v6501_v54 = vld [vmem:[%s11511_s24 + $0x30] sm:$0xff] }
 0x694   : >> { %7602 = vpow2.f32 %v6344_v45  ;;  %v6335_v49 = vmin.f32 %v6316_v55, 0.0  ;;  %v6318_v5 = vadd.f32 %v6317_v11, %v6265_v32  ;;  %v6346_v14 = vmul.f32 1.442695, %v6334_v2  ;;  %v6502_v32 = vld [vmem:[%s11511_s24 + $0x38] sm:$0xff] }
 0x695   : >> { %v6319_v13 = vpop.f32.mrf.mxu0  ;;  %vm6327_vm3 = vcmp.gt.f32.partialorder %v6316_v55, 0.0 }
 0x696   : >> { %v6348_v24 = vmul.f32 1.442695, %v6335_v49  ;;  %v6336_v35 = vmin.f32 %v6318_v5, 0.0  ;;  %v6320_v52 = vadd.f32 %v6319_v13, %v6267_v1  ;;  %7604 = vpow2.f32 %v6346_v14  ;;  %v6884_v14 = vld [vmem:[%s11512_s0] ss:$0 sm:$0xff] }
 0x697   : >> { %vm6328_vm12 = vcmp.gt.f32.partialorder %v6318_v5, 0.0 }
 0x698   : >> { %7606 = vpow2.f32 %v6348_v24  ;;  %v6350_v46 = vmul.f32 1.442695, %v6336_v35  ;;  %v6337_v34 = vmin.f32 %v6320_v52, 0.0  ;;  %vm6329_vm0 = vcmp.gt.f32.partialorder %v6320_v52, 0.0 }
 0x699   : >> { %v11513_v24 = vlaneseq }
 0x69a   : >> { %7608 = vpow2.f32 %v6350_v46  ;;  %v6352_v60 = vmul.f32 1.442695, %v6337_v34 }
 0x69b   : >> { %v7597_v51 = vpop.eup %7596  ;;  %v6545_v35 = vand.u32 127, %v11513_v24 }
 0x69c   : >> { %7610 = vpow2.f32 %v6352_v60  ;;  %v6871_v26 = vadd.f32 -1.0, %v7597_v51 }
 0x69d   : >> { %v7599_v21 = vpop.eup %7598  ;;  %v6550_v34 = vadd.s32 4294967288, %v6545_v35  ;;  %v6557_v60 = vadd.s32 4294967280, %v6545_v35  ;;  %v6564_v51 = vadd.s32 4294967272, %v6545_v35 }
 0x69e   : >> { %v6872_v37 = vadd.f32 -1.0, %v7599_v21  ;;  %v6362_v40 = vsel %vm6322_vm7, %v10716_v15, %v6871_v26 }
 0x69f   : >> { %v7601_v9 = vpop.eup %7600 }
 0x6a0   : >> { %v6363_v43 = vsel %vm6323_vm1, %v6306_v29, %v6872_v37  ;;  %v6873_v56 = vadd.f32 -1.0, %v7601_v9  ;;  %v6495_v29 = vld [vmem:[%s11511_s24] sm:$0xff] }
 0x6a1   : >> { %v7603_v8 = vpop.eup %7602  ;;  %6880 = vmatprep.mubr.msk.f32.mxu1 %vm6394_vm9, %v6363_v43  ;;  %v11514_v37 = vld [vmem:[#allocation10_spill] sm:$0xff] }
 0x6a2   : >> { %6475 = vmatmul.mubr.f32.vlgmr.msra.gmra.mxu1 %v6362_v40  ;;  %v6874_v41 = vadd.f32 -1.0, %v7603_v8  ;;  %v6364_v62 = vsel %vm6324_vm15, %v10719_v57, %v6873_v56  ;;  %v6553_v9 = vsub.s32 %v6550_v34, %v11514_v37  ;;  %v6560_v43 = vsub.s32 %v6557_v60, %v11514_v37 }
 0x6a3   : >> { %v7605_v12 = vpop.eup %7604  ;;  %v6548_v8 = vsub.s32 %v6545_v35, %v11514_v37  ;;  %v6567_v40 = vsub.s32 %v6564_v51, %v11514_v37 }
 0x6a4   : >> { %v6365_v39 = vsel %vm6325_vm11, %v6310_v63, %v6874_v41  ;;  %v6875_v22 = vadd.f32 -1.0, %v7605_v12  ;;  %v6497_v63 = vld [vmem:[%s11511_s24 + $0x10] sm:$0xff] }
 0x6a5   : >> { %v7607_v27 = vpop.eup %7606  ;;  %6881 = vmatprep.mubr.msk.f32.mxu1 %vm6394_vm9, %v6365_v39 }
 0x6a6   : >> { %6480 = vmatmul.mubr.f32.gmra.mxu1 %v6364_v62  ;;  %v6876_v42 = vadd.f32 -1.0, %v7607_v27  ;;  %v6366_v15 = vsel %vm6326_vm6, %v6314_v58, %v6875_v22 }
 0x6a7   : >> { %v7609_v18 = vpop.eup %7608 }
 0x6a8   : >> { %v6367_v44 = vsel %vm6327_vm3, %v6316_v55, %v6876_v42  ;;  %v6877_v6 = vadd.f32 -1.0, %v7609_v18 }
 0x6a9   : >> { %v7611_v48 = vpop.eup %7610  ;;  %6882 = vmatprep.mubr.msk.f32.mxu1 %vm6394_vm9, %v6367_v44 }
 0x6aa   : >> { %6485 = vmatmul.mubr.f32.gmra.mxu1 %v6366_v15  ;;  %v6878_v17 = vadd.f32 -1.0, %v7611_v48  ;;  %v6368_v4 = vsel %vm6328_vm12, %v6318_v5, %v6877_v6 }
 0x6ac   : >> { %v6369_v20 = vsel %vm6329_vm0, %v6320_v52, %v6878_v17 }
 0x6ad   : >> { %6883 = vmatprep.mubr.msk.f32.mxu1 %vm6394_vm9, %v6369_v20 }
 0x6ae   : >> { %6490 = vmatmul.mubr.f32.gmra.mxu1 %v6368_v4 }
 0x762   : >> { %v6476_v3 = vpop.f32.mrf.mxu1 }
 0x763   : >> { %v6503_v36 = vmul.f32 %v6495_v29, %v6476_v3  ;;  %v6507_v19 = vmul.f32 %v6499_v23, %v6476_v3 }
 0x764   : >> { %v6478_v30 = vpop.f32.mrf.mxu1 }
 0x765   : >> { %v6512_v57 = vsel %vm6511_vm13, %v6503_v36, 0.0  ;;  %v6524_v10 = vsel %vm6511_vm13, %v6507_v19, 0.0 }
 0x766   : >> { %6513 = vadd.xlane.f32.xlu0 %v6512_v57  ;;  %v6481_v33 = vpop.f32.mrf.mxu1 }
 0x767   : >> { %v6504_v31 = vmul.f32 %v6496_v61, %v6481_v33  ;;  %v6508_v7 = vmul.f32 %v6500_v16, %v6481_v33 }
 0x768   : >> { %v6483_v0 = vpop.f32.mrf.mxu1 }
 0x769   : >> { %v6515_v28 = vsel %vm6511_vm13, %v6504_v31, 0.0  ;;  %v6527_v38 = vsel %vm6511_vm13, %v6508_v7, 0.0 }
 0x76a   : >> { %6525 = vadd.xlane.f32.xlu0 %v6524_v10  ;;  %6516 = vadd.xlane.f32.xlu1 %v6515_v28  ;;  %v6486_v50 = vpop.f32.mrf.mxu1 }
 0x76b   : >> { %v6505_v47 = vmul.f32 %v6497_v63, %v6486_v50  ;;  %v6509_v58 = vmul.f32 %v6501_v54, %v6486_v50 }
 0x76c   : >> { %v6488_v53 = vpop.f32.mrf.mxu1 }
 0x76d   : >> { %v6518_v25 = vsel %vm6511_vm13, %v6505_v47, 0.0  ;;  %v6530_v1 = vsel %vm6511_vm13, %v6509_v58, 0.0 }
 0x76e   : >> { %6528 = vadd.xlane.f32.xlu0 %v6527_v38  ;;  %6519 = vadd.xlane.f32.xlu1 %v6518_v25  ;;  %v6491_v45 = vpop.f32.mrf.mxu1 }
 0x76f   : >> { %v6506_v55 = vmul.f32 %v6498_v59, %v6491_v45  ;;  %v6510_v11 = vmul.f32 %v6502_v32, %v6491_v45 }
 0x770   : >> { %v6493_v2 = vpop.f32.mrf.mxu1 }
 0x771   : >> { %v6521_v49 = vsel %vm6511_vm13, %v6506_v55, 0.0  ;;  %v6533_v5 = vsel %vm6511_vm13, %v6510_v11, 0.0 }
 0x772   : >> { %6531 = vadd.xlane.f32.xlu0 %v6530_v1  ;;  %6522 = vadd.xlane.f32.xlu1 %v6521_v49 }
 0x776   : >> { %6534 = vadd.xlane.f32.xlu0 %v6533_v5 }
 0x78c   : >> { %6603 = vbcast.lane.b32.xlu0 %v6884_v14, 256 }
 0x7ef   : >> { %v6514_v13 = vpop.xlane.xlu0 %6513 }
 0x7f0   : >> { %v6549_v22 = vrot.slane %v6514_v13, %v6548_v8 }
 0x7f3   : >> { %v6526_v52 = vpop.xlane.xlu0 %6525  ;;  %v6517_v46 = vpop.xlane.xlu1 %6516 }
 0x7f4   : >> { %v6554_v12 = vrot.slane %v6517_v46, %v6553_v9  ;;  %v6574_v42 = vrot.slane %v6526_v52, %v6548_v8 }
 0x7f6   : >> { %v6556_v48 = vsel %vm6555_vm10, %v6554_v12, %v6549_v22 }
 0x7f7   : >> { %v6529_v21 = vpop.xlane.xlu0 %6528  ;;  %v6520_v26 = vpop.xlane.xlu1 %6519 }
 0x7f8   : >> { %v6578_v39 = vrot.slane %v6529_v21, %v6553_v9  ;;  %v6561_v27 = vrot.slane %v6520_v26, %v6560_v43 }
 0x7fa   : >> { %v6579_v15 = vsel %vm6555_vm10, %v6578_v39, %v6574_v42  ;;  %v6563_v17 = vsel %vm6562_vm8, %v6561_v27, %v6556_v48 }
 0x7fb   : >> { %v6532_v56 = vpop.xlane.xlu0 %6531  ;;  %v6523_v41 = vpop.xlane.xlu1 %6522 }
 0x7fc   : >> { %v6583_v62 = vrot.slane %v6532_v56, %v6560_v43  ;;  %v6568_v18 = vrot.slane %v6523_v41, %v6567_v40 }
 0x7fe   : >> { %v6584_v20 = vsel %vm6562_vm8, %v6583_v62, %v6579_v15  ;;  %v6570_v4 = vsel %vm6569_vm4, %v6568_v18, %v6563_v17 }
 0x7ff   : >> { %v6535_v44 = vpop.xlane.xlu0 %6534 }
 0x800   : >> { %v6588_v6 = vrot.slane %v6535_v44, %v6567_v40 }
 0x802   : >> { %v6589_v29 = vsel %vm6569_vm4, %v6588_v6, %v6584_v20 }
 0x803   : >> { %v6590_v3 = vsel %vm11517_vm14, %v6589_v29, %v6570_v4  ;;  %v6604_v36 = vpop.permute.xlu0 %6603 }
 0x804   : >> { %v6593_v23 = vsel %vm6592_vm2, %v6590_v3, 0.0 }
 0x805   : >> { %6594 = vadd.xlane.f32.xlu1 %v6593_v23 }
 0x88e   : >> { %v6595_v30 = vpop.xlane.xlu1 %6594 }
 0x88f   : >> { %v6606_v61 = vadd.f32 %v6604_v36, %v6595_v30 }
 0x891   : >> { %6609 = vperm.xlu1 %7331, %v6606_v61  }
 0x90b   : > { %355 = sbr.rel (!%p353_p5) target bundleno = 27 (0x1b), region = 95 }
 0x90c   : >> { %v6610_v19 = vpop.permute.xlu1 %6609 }
 0x90d   : >> { %v6614_v57 = vrot.slane %v6610_v19, %v6548_v8 }
 0x90f   : >> { %6618 = vst.msk [vmem:[%s6616_s5] sm:$0x1] %vm6617_vm5, %v6614_v57 }
 0x910 PF: > { %s11518_s2 = sld [smem:[#allocation6_spill]] }
 0x916   : > { %s19_s30 = sadd.s32 1, %s11518_s2  }
 0x917   : > { %p16_p6 = scmp.ge.s32.totalorder %s19_s30, 4  }
 0x919   :  { %18 = sbr.rel (!%p16_p6) target bundleno = 10 (0xa), region = 106 }

</bundles_post_ra>
